<compile_context>
chip_gen: v7x
topology: tpu7x:2x2x1
jax: 0.10.0
libtpu: 0.0.40
codegen_flags: <defaults>
</compile_context>

<pallas_src>
import jax
import jax.numpy as jnp
from jax.experimental import pallas as pl

# ----------------------- small-but-consistent CCT config --------------------
IMG = 16              # img_size
CIN = 4               # n_input_channels
EMB = 32              # embedding_dim
K = 3                 # conv kernel_size
STRIDE = 2
PAD = 1
PK, PS, PP = 3, 2, 1  # pooling kernel / stride / padding
NUM_LAYERS = 2
NUM_HEADS = 4
MLP_RATIO = 2.0
NUM_CLASSES = 10
B = 2

DH = EMB // NUM_HEADS
FFN = int(EMB * MLP_RATIO)
SCALE = DH ** -0.5
LN_EPS = 1e-5

H_CONV = (IMG + 2 * PAD - K) // STRIDE + 1        # 8
H_POOL = (H_CONV + 2 * PP - PK) // PS + 1         # 4
SEQ = H_POOL * H_POOL                             # 16  (== Tokenizer.sequence_length())

PER_LAYER = 11        # weight tensors per encoder layer


# ------------------------------- helpers ------------------------------------
def _layernorm(x, g, b):
    mu = jnp.mean(x, axis=-1, keepdims=True)
    var = jnp.mean(jnp.square(x - mu), axis=-1, keepdims=True)
    return (x - mu) * jax.lax.rsqrt(var + LN_EPS) * g + b


def _gelu(x):
    # exact (erf-based) GELU, matches torch.nn.functional.gelu default
    return 0.5 * x * (1.0 + jax.lax.erf(x * 0.7071067811865476))


def _softmax_rows(s):
    # softmax over the last (lane) axis; reciprocal moves onto the EUP slot.
    s = s - jnp.max(s, axis=-1, keepdims=True)
    e = jnp.exp(s)
    return e * pl.reciprocal(jnp.sum(e, axis=-1, keepdims=True), approx=True)


# ------------------------------ fused kernel ---------------------------------
def cct_kernel(patches_ref, convw_ref, pos_ref, *refs):
    """Entire CCT forward for the whole batch in one invocation (all data in VMEM)."""
    o_ref = refs[-1]
    layer_refs = refs[:NUM_LAYERS * PER_LAYER]
    ng_ref, nb_ref, pw_ref, pb_ref, wf_ref, bf_ref = refs[NUM_LAYERS * PER_LAYER:-1]

    # ---- Tokenizer: conv (im2col matmul) + ReLU + fused 3x3/2 max-pool -------
    conv = jnp.maximum(
        jnp.dot(patches_ref[...], convw_ref[...], preferred_element_type=jnp.float32),
        0.0)                                                       # (B*Hc*Wc, EMB)

    pos = pos_ref[...]                                             # (SEQ, EMB)
    x_rows = []
    for b in range(B):
        cb = conv[b * H_CONV * H_CONV:(b + 1) * H_CONV * H_CONV, :]  # rows = y*Wc + x
        row_blocks = []
        for p in range(H_POOL):                                    # pooled spatial row
            r0 = max(PS * p - PP, 0)
            r1 = min(PS * p - PP + PK, H_CONV)
            rp = cb[r0 * H_CONV:(r0 + 1) * H_CONV, :]              # (Hc, EMB), sublane = x
            for r in range(r0 + 1, r1):
                rp = jnp.maximum(rp, cb[r * H_CONV:(r + 1) * H_CONV, :])
            toks = []
            for q in range(H_POOL):                                # pooled spatial col
                c0 = max(PS * q - PP, 0)
                c1 = min(PS * q - PP + PK, H_CONV)
                t = rp[c0:c0 + 1, :]
                for c in range(c0 + 1, c1):
                    t = jnp.maximum(t, rp[c:c + 1, :])
                toks.append(t)                                     # (1, EMB)
            row_blocks.append(jnp.concatenate(toks, axis=0))       # (H_POOL, EMB)
        tok_b = jnp.concatenate(row_blocks, axis=0)                # (SEQ, EMB)
        x_rows.append(tok_b + pos)                                 # + learnable pos emb
    x = jnp.concatenate(x_rows, axis=0)                            # (B*SEQ, EMB)

    # ---- Transformer encoder layers ------------------------------------------
    for l in range(NUM_LAYERS):
        g0, b0, wqkv, wproj, bproj, g1, b1, w1, bb1, w2, bb2 = [
            r[...] for r in layer_refs[l * PER_LAYER:(l + 1) * PER_LAYER]]

        # multi-head self-attention on the pre-normed input (qkv batched over B)
        xn = _layernorm(x, g0, b0)
        qkv = jnp.dot(xn, wqkv, preferred_element_type=jnp.float32)  # (B*SEQ, 3*EMB)

        per_batch = []
        for b in range(B):
            s0 = b * SEQ
            heads = []
            for h in range(NUM_HEADS):
                q = qkv[s0:s0 + SEQ, h * DH:(h + 1) * DH]
                k = qkv[s0:s0 + SEQ, EMB + h * DH:EMB + (h + 1) * DH]
                v = qkv[s0:s0 + SEQ, 2 * EMB + h * DH:2 * EMB + (h + 1) * DH]
                s = jnp.dot(q, k.T, preferred_element_type=jnp.float32) * SCALE
                pattn = _softmax_rows(s)                            # (SEQ, SEQ)
                heads.append(jnp.dot(pattn, v, preferred_element_type=jnp.float32))
            per_batch.append(jnp.concatenate(heads, axis=1))        # head-concat (SEQ, EMB)
        attn = jnp.concatenate(per_batch, axis=0)                   # (B*SEQ, EMB)
        attn = jnp.dot(attn, wproj, preferred_element_type=jnp.float32) + bproj

        x = x + attn                      # residual (drop_path = identity at eval)
        x = _layernorm(x, g1, b1)         # norm1
        h1 = _gelu(jnp.dot(x, w1, preferred_element_type=jnp.float32) + bb1)
        x = x + jnp.dot(h1, w2, preferred_element_type=jnp.float32) + bb2

    # ---- final LayerNorm + sequence pooling (softmax attention pool) + fc ----
    xn = _layernorm(x, ng_ref[...], nb_ref[...])                    # (B*SEQ, EMB)
    scores = jnp.sum(xn * pw_ref[...], axis=-1, keepdims=True) + pb_ref[...]  # (B*SEQ, 1)
    pooled_rows = []
    for b in range(B):
        gb = scores[b * SEQ:(b + 1) * SEQ, :]
        gb = gb - jnp.max(gb, axis=0, keepdims=True)
        eb = jnp.exp(gb)
        ab = eb * pl.reciprocal(jnp.sum(eb, axis=0, keepdims=True), approx=True)
        xb = xn[b * SEQ:(b + 1) * SEQ, :]
        pooled_rows.append(jnp.sum(xb * ab, axis=0, keepdims=True))  # (1, EMB)
    pooled = jnp.concatenate(pooled_rows, axis=0)                    # (B, EMB)
    o_ref[...] = (jnp.dot(pooled, wf_ref[...], preferred_element_type=jnp.float32)
                  + bf_ref[...])


# ------------------------------ wrapper --------------------------------------
@jax.jit
def cct_forward(x_nchw, params):
    # im2col patch construction is XLA-side glue feeding the single fused kernel.
    # TODO(synk): at realistic CCT sizes, move the im2col gather inside the kernel
    # (strided pl.ds reads of the padded NHWC image) to avoid the ~K*K HBM replication.
    x = jnp.transpose(x_nchw, (0, 2, 3, 1))                          # NCHW -> NHWC
    xp = jnp.pad(x, ((0, 0), (PAD, PAD), (PAD, PAD), (0, 0)))
    cols = []
    for dy in range(K):
        for dx in range(K):
            cols.append(xp[:, dy:dy + STRIDE * (H_CONV - 1) + 1:STRIDE,
                           dx:dx + STRIDE * (H_CONV - 1) + 1:STRIDE, :])
    patches = jnp.stack(cols, axis=3).reshape(B * H_CONV * H_CONV, K * K * CIN)

    # conv weight (EMB, CIN, K, K) -> (K*K*CIN, EMB), matching im2col column order
    w_conv = jnp.transpose(params["conv_w"], (2, 3, 1, 0)).reshape(K * K * CIN, EMB)

    flat = [patches, w_conv, params["pos_emb"][0]]
    for lp in params["layers"]:
        flat += [lp["g0"], lp["b0"], lp["wqkv_t"], lp["wproj_t"], lp["bproj"],
                 lp["g1"], lp["b1"], lp["w1_t"], lp["bb1"], lp["w2_t"], lp["bb2"]]
    flat += [params["norm_g"], params["norm_b"], params["pool_w"], params["pool_b"],
             params["fc_w_t"], params["fc_b"]]

    # Single fused pallas_call, no grid: whole model state fits in VMEM on v5e/v6e/v7x.
    # TODO(synk): on v7x, a size-2 "parallel" batch grid (or pl.core_map) could split the
    # two batch elements across the 2 TensorCores.
    return pl.pallas_call(
        cct_kernel,
        out_shape=jax.ShapeDtypeStruct((B, NUM_CLASSES), jnp.float32),
    )(*flat)


# ------------------------------ parameters -----------------------------------
def init_params(key):
    def nrm(k, shape, scale=0.05):
        return scale * jax.random.normal(k, shape, dtype=jnp.float32)

    ks = iter(jax.random.split(key, 64))
    params = {}
    # Tokenizer: Conv2d(CIN, EMB, K, STRIDE, PAD, bias=False)
    params["conv_w"] = nrm(next(ks), (EMB, CIN, K, K), 0.1)
    # learnable positional embedding (trunc_normal std=0.2 in the reference)
    params["pos_emb"] = nrm(next(ks), (1, SEQ, EMB), 0.2)

    layers = []
    for _ in range(NUM_LAYERS):
        wqkv = nrm(next(ks), (3 * EMB, EMB))            # Linear(EMB, 3*EMB, bias=False)
        wproj = nrm(next(ks), (EMB, EMB))               # Linear(EMB, EMB)
        w1 = nrm(next(ks), (FFN, EMB))                  # Linear(EMB, FFN)
        w2 = nrm(next(ks), (EMB, FFN))                  # Linear(FFN, EMB)
        layers.append(dict(
            g0=jnp.ones((1, EMB), jnp.float32), b0=jnp.zeros((1, EMB), jnp.float32),
            wqkv_t=wqkv.T,
            wproj_t=wproj.T, bproj=nrm(next(ks), (1, EMB), 0.01),
            g1=jnp.ones((1, EMB), jnp.float32), b1=jnp.zeros((1, EMB), jnp.float32),
            w1_t=w1.T, bb1=nrm(next(ks), (1, FFN), 0.01),
            w2_t=w2.T, bb2=nrm(next(ks), (1, EMB), 0.01),
        ))
    params["layers"] = layers

    params["norm_g"] = jnp.ones((1, EMB), jnp.float32)
    params["norm_b"] = jnp.zeros((1, EMB), jnp.float32)
    params["pool_w"] = nrm(next(ks), (1, EMB))          # attention_pool: Linear(EMB, 1)
    params["pool_b"] = nrm(next(ks), (1, 1), 0.01)
    wfc = nrm(next(ks), (NUM_CLASSES, EMB))             # fc: Linear(EMB, NUM_CLASSES)
    params["fc_w_t"] = wfc.T
    params["fc_b"] = nrm(next(ks), (1, NUM_CLASSES), 0.01)
    return params


# --------------------------------- main --------------------------------------
if __name__ == "__main__":
    key = jax.random.PRNGKey(0)
    pkey, xkey = jax.random.split(key)
    params = init_params(pkey)

    x = jax.random.normal(xkey, (B, CIN, IMG, IMG), dtype=jnp.float32)  # NCHW like torch

    out = cct_forward(x, params)
    out = jax.block_until_ready(out)
    assert out.shape == (B, NUM_CLASSES) and out.dtype == jnp.float32
    assert bool(jnp.all(jnp.isfinite(out)))
    print("KERNEL_OK")
</pallas_src>

<mosaic_0001>
module attributes {stable_mosaic.version = 11 : i64} {
  func.func @cct_kernel(%arg0: memref<128x36xf32, #tpu.memory_space<vmem>>, %arg1: memref<36x32xf32, #tpu.memory_space<vmem>>, %arg2: memref<16x32xf32, #tpu.memory_space<vmem>>, %arg3: memref<1x32xf32, #tpu.memory_space<vmem>>, %arg4: memref<1x32xf32, #tpu.memory_space<vmem>>, %arg5: memref<32x96xf32, #tpu.memory_space<vmem>>, %arg6: memref<32x32xf32, #tpu.memory_space<vmem>>, %arg7: memref<1x32xf32, #tpu.memory_space<vmem>>, %arg8: memref<1x32xf32, #tpu.memory_space<vmem>>, %arg9: memref<1x32xf32, #tpu.memory_space<vmem>>, %arg10: memref<32x64xf32, #tpu.memory_space<vmem>>, %arg11: memref<1x64xf32, #tpu.memory_space<vmem>>, %arg12: memref<64x32xf32, #tpu.memory_space<vmem>>, %arg13: memref<1x32xf32, #tpu.memory_space<vmem>>, %arg14: memref<1x32xf32, #tpu.memory_space<vmem>>, %arg15: memref<1x32xf32, #tpu.memory_space<vmem>>, %arg16: memref<32x96xf32, #tpu.memory_space<vmem>>, %arg17: memref<32x32xf32, #tpu.memory_space<vmem>>, %arg18: memref<1x32xf32, #tpu.memory_space<vmem>>, %arg19: memref<1x32xf32, #tpu.memory_space<vmem>>, %arg20: memref<1x32xf32, #tpu.memory_space<vmem>>, %arg21: memref<32x64xf32, #tpu.memory_space<vmem>>, %arg22: memref<1x64xf32, #tpu.memory_space<vmem>>, %arg23: memref<64x32xf32, #tpu.memory_space<vmem>>, %arg24: memref<1x32xf32, #tpu.memory_space<vmem>>, %arg25: memref<1x32xf32, #tpu.memory_space<vmem>>, %arg26: memref<1x32xf32, #tpu.memory_space<vmem>>, %arg27: memref<1x32xf32, #tpu.memory_space<vmem>>, %arg28: memref<1x1xf32, #tpu.memory_space<vmem>>, %arg29: memref<32x10xf32, #tpu.memory_space<vmem>>, %arg30: memref<1x10xf32, #tpu.memory_space<vmem>>, %arg31: memref<2x10xf32, #tpu.memory_space<vmem>>) attributes {dimension_semantics = [], scalar_prefetch = 0 : i64, scratch_operands = 0 : i64, tpu.core_type = #tpu.core_type<tc>} {
    %c0 = arith.constant 0 : index
    %c0_0 = arith.constant 0 : index
    %0 = vector.load %arg0[%c0, %c0_0] : memref<128x36xf32, #tpu.memory_space<vmem>>, vector<128x36xf32>
    %c0_1 = arith.constant 0 : index
    %c0_2 = arith.constant 0 : index
    %1 = vector.load %arg1[%c0_1, %c0_2] : memref<36x32xf32, #tpu.memory_space<vmem>>, vector<36x32xf32>
    %cst = arith.constant dense<0.000000e+00> : vector<128x32xf32>
    %2 = tpu.matmul %0, %1, %cst {dimension_numbers = #tpu.dot_dimension_numbers<[1], [0], [0], [1], [0, 0, 1, 1], [], []>} : vector<128x36xf32>, vector<36x32xf32>, vector<128x32xf32> -> vector<128x32xf32>
    %cst_3 = arith.constant 0.000000e+00 : f32
    %3 = vector.broadcast %cst_3 : f32 to vector<128x32xf32>
    %4 = arith.maximumf %2, %3 : vector<128x32xf32>
    %c0_4 = arith.constant 0 : index
    %c0_5 = arith.constant 0 : index
    %5 = vector.load %arg2[%c0_4, %c0_5] : memref<16x32xf32, #tpu.memory_space<vmem>>, vector<16x32xf32>
    %6 = vector.extract_strided_slice %4 {offsets = [0, 0], sizes = [64, 32], strides = [1, 1]} : vector<128x32xf32> to vector<64x32xf32>
    %7 = vector.extract_strided_slice %6 {offsets = [0, 0], sizes = [8, 32], strides = [1, 1]} : vector<64x32xf32> to vector<8x32xf32>
    %8 = vector.extract_strided_slice %6 {offsets = [8, 0], sizes = [8, 32], strides = [1, 1]} : vector<64x32xf32> to vector<8x32xf32>
    %9 = arith.maximumf %7, %8 : vector<8x32xf32>
    %10 = vector.extract_strided_slice %9 {offsets = [0, 0], sizes = [1, 32], strides = [1, 1]} : vector<8x32xf32> to vector<1x32xf32>
    %11 = vector.extract_strided_slice %9 {offsets = [1, 0], sizes = [1, 32], strides = [1, 1]} : vector<8x32xf32> to vector<1x32xf32>
    %12 = arith.maximumf %10, %11 : vector<1x32xf32>
    %13 = vector.extract_strided_slice %9 {offsets = [1, 0], sizes = [1, 32], strides = [1, 1]} : vector<8x32xf32> to vector<1x32xf32>
    %14 = vector.extract_strided_slice %9 {offsets = [2, 0], sizes = [1, 32], strides = [1, 1]} : vector<8x32xf32> to vector<1x32xf32>
    %15 = arith.maximumf %13, %14 : vector<1x32xf32>
    %16 = vector.extract_strided_slice %9 {offsets = [3, 0], sizes = [1, 32], strides = [1, 1]} : vector<8x32xf32> to vector<1x32xf32>
    %17 = arith.maximumf %15, %16 : vector<1x32xf32>
    %18 = vector.extract_strided_slice %9 {offsets = [3, 0], sizes = [1, 32], strides = [1, 1]} : vector<8x32xf32> to vector<1x32xf32>
    %19 = vector.extract_strided_slice %9 {offsets = [4, 0], sizes = [1, 32], strides = [1, 1]} : vector<8x32xf32> to vector<1x32xf32>
    %20 = arith.maximumf %18, %19 : vector<1x32xf32>
    %21 = vector.extract_strided_slice %9 {offsets = [5, 0], sizes = [1, 32], strides = [1, 1]} : vector<8x32xf32> to vector<1x32xf32>
    %22 = arith.maximumf %20, %21 : vector<1x32xf32>
    %23 = vector.extract_strided_slice %9 {offsets = [5, 0], sizes = [1, 32], strides = [1, 1]} : vector<8x32xf32> to vector<1x32xf32>
    %24 = vector.extract_strided_slice %9 {offsets = [6, 0], sizes = [1, 32], strides = [1, 1]} : vector<8x32xf32> to vector<1x32xf32>
    %25 = arith.maximumf %23, %24 : vector<1x32xf32>
    %26 = vector.extract_strided_slice %9 {offsets = [7, 0], sizes = [1, 32], strides = [1, 1]} : vector<8x32xf32> to vector<1x32xf32>
    %27 = arith.maximumf %25, %26 : vector<1x32xf32>
    %28 = tpu.concatenate %12, %17, %22, %27 in 0 : vector<1x32xf32>, vector<1x32xf32>, vector<1x32xf32>, vector<1x32xf32> -> vector<4x32xf32>
    %29 = vector.extract_strided_slice %6 {offsets = [8, 0], sizes = [8, 32], strides = [1, 1]} : vector<64x32xf32> to vector<8x32xf32>
    %30 = vector.extract_strided_slice %6 {offsets = [16, 0], sizes = [8, 32], strides = [1, 1]} : vector<64x32xf32> to vector<8x32xf32>
    %31 = arith.maximumf %29, %30 : vector<8x32xf32>
    %32 = vector.extract_strided_slice %6 {offsets = [24, 0], sizes = [8, 32], strides = [1, 1]} : vector<64x32xf32> to vector<8x32xf32>
    %33 = arith.maximumf %31, %32 : vector<8x32xf32>
    %34 = vector.extract_strided_slice %33 {offsets = [0, 0], sizes = [1, 32], strides = [1, 1]} : vector<8x32xf32> to vector<1x32xf32>
    %35 = vector.extract_strided_slice %33 {offsets = [1, 0], sizes = [1, 32], strides = [1, 1]} : vector<8x32xf32> to vector<1x32xf32>
    %36 = arith.maximumf %34, %35 : vector<1x32xf32>
    %37 = vector.extract_strided_slice %33 {offsets = [1, 0], sizes = [1, 32], strides = [1, 1]} : vector<8x32xf32> to vector<1x32xf32>
    %38 = vector.extract_strided_slice %33 {offsets = [2, 0], sizes = [1, 32], strides = [1, 1]} : vector<8x32xf32> to vector<1x32xf32>
    %39 = arith.maximumf %37, %38 : vector<1x32xf32>
    %40 = vector.extract_strided_slice %33 {offsets = [3, 0], sizes = [1, 32], strides = [1, 1]} : vector<8x32xf32> to vector<1x32xf32>
    %41 = arith.maximumf %39, %40 : vector<1x32xf32>
    %42 = vector.extract_strided_slice %33 {offsets = [3, 0], sizes = [1, 32], strides = [1, 1]} : vector<8x32xf32> to vector<1x32xf32>
    %43 = vector.extract_strided_slice %33 {offsets = [4, 0], sizes = [1, 32], strides = [1, 1]} : vector<8x32xf32> to vector<1x32xf32>
    %44 = arith.maximumf %42, %43 : vector<1x32xf32>
    %45 = vector.extract_strided_slice %33 {offsets = [5, 0], sizes = [1, 32], strides = [1, 1]} : vector<8x32xf32> to vector<1x32xf32>
    %46 = arith.maximumf %44, %45 : vector<1x32xf32>
    %47 = vector.extract_strided_slice %33 {offsets = [5, 0], sizes = [1, 32], strides = [1, 1]} : vector<8x32xf32> to vector<1x32xf32>
    %48 = vector.extract_strided_slice %33 {offsets = [6, 0], sizes = [1, 32], strides = [1, 1]} : vector<8x32xf32> to vector<1x32xf32>
    %49 = arith.maximumf %47, %48 : vector<1x32xf32>
    %50 = vector.extract_strided_slice %33 {offsets = [7, 0], sizes = [1, 32], strides = [1, 1]} : vector<8x32xf32> to vector<1x32xf32>
    %51 = arith.maximumf %49, %50 : vector<1x32xf32>
    %52 = tpu.concatenate %36, %41, %46, %51 in 0 : vector<1x32xf32>, vector<1x32xf32>, vector<1x32xf32>, vector<1x32xf32> -> vector<4x32xf32>
    %53 = vector.extract_strided_slice %6 {offsets = [24, 0], sizes = [8, 32], strides = [1, 1]} : vector<64x32xf32> to vector<8x32xf32>
    %54 = vector.extract_strided_slice %6 {offsets = [32, 0], sizes = [8, 32], strides = [1, 1]} : vector<64x32xf32> to vector<8x32xf32>
    %55 = arith.maximumf %53, %54 : vector<8x32xf32>
    %56 = vector.extract_strided_slice %6 {offsets = [40, 0], sizes = [8, 32], strides = [1, 1]} : vector<64x32xf32> to vector<8x32xf32>
    %57 = arith.maximumf %55, %56 : vector<8x32xf32>
    %58 = vector.extract_strided_slice %57 {offsets = [0, 0], sizes = [1, 32], strides = [1, 1]} : vector<8x32xf32> to vector<1x32xf32>
    %59 = vector.extract_strided_slice %57 {offsets = [1, 0], sizes = [1, 32], strides = [1, 1]} : vector<8x32xf32> to vector<1x32xf32>
    %60 = arith.maximumf %58, %59 : vector<1x32xf32>
    %61 = vector.extract_strided_slice %57 {offsets = [1, 0], sizes = [1, 32], strides = [1, 1]} : vector<8x32xf32> to vector<1x32xf32>
    %62 = vector.extract_strided_slice %57 {offsets = [2, 0], sizes = [1, 32], strides = [1, 1]} : vector<8x32xf32> to vector<1x32xf32>
    %63 = arith.maximumf %61, %62 : vector<1x32xf32>
    %64 = vector.extract_strided_slice %57 {offsets = [3, 0], sizes = [1, 32], strides = [1, 1]} : vector<8x32xf32> to vector<1x32xf32>
    %65 = arith.maximumf %63, %64 : vector<1x32xf32>
    %66 = vector.extract_strided_slice %57 {offsets = [3, 0], sizes = [1, 32], strides = [1, 1]} : vector<8x32xf32> to vector<1x32xf32>
    %67 = vector.extract_strided_slice %57 {offsets = [4, 0], sizes = [1, 32], strides = [1, 1]} : vector<8x32xf32> to vector<1x32xf32>
    %68 = arith.maximumf %66, %67 : vector<1x32xf32>
    %69 = vector.extract_strided_slice %57 {offsets = [5, 0], sizes = [1, 32], strides = [1, 1]} : vector<8x32xf32> to vector<1x32xf32>
    %70 = arith.maximumf %68, %69 : vector<1x32xf32>
    %71 = vector.extract_strided_slice %57 {offsets = [5, 0], sizes = [1, 32], strides = [1, 1]} : vector<8x32xf32> to vector<1x32xf32>
    %72 = vector.extract_strided_slice %57 {offsets = [6, 0], sizes = [1, 32], strides = [1, 1]} : vector<8x32xf32> to vector<1x32xf32>
    %73 = arith.maximumf %71, %72 : vector<1x32xf32>
    %74 = vector.extract_strided_slice %57 {offsets = [7, 0], sizes = [1, 32], strides = [1, 1]} : vector<8x32xf32> to vector<1x32xf32>
    %75 = arith.maximumf %73, %74 : vector<1x32xf32>
    %76 = tpu.concatenate %60, %65, %70, %75 in 0 : vector<1x32xf32>, vector<1x32xf32>, vector<1x32xf32>, vector<1x32xf32> -> vector<4x32xf32>
    %77 = vector.extract_strided_slice %6 {offsets = [40, 0], sizes = [8, 32], strides = [1, 1]} : vector<64x32xf32> to vector<8x32xf32>
    %78 = vector.extract_strided_slice %6 {offsets = [48, 0], sizes = [8, 32], strides = [1, 1]} : vector<64x32xf32> to vector<8x32xf32>
    %79 = arith.maximumf %77, %78 : vector<8x32xf32>
    %80 = vector.extract_strided_slice %6 {offsets = [56, 0], sizes = [8, 32], strides = [1, 1]} : vector<64x32xf32> to vector<8x32xf32>
    %81 = arith.maximumf %79, %80 : vector<8x32xf32>
    %82 = vector.extract_strided_slice %81 {offsets = [0, 0], sizes = [1, 32], strides = [1, 1]} : vector<8x32xf32> to vector<1x32xf32>
    %83 = vector.extract_strided_slice %81 {offsets = [1, 0], sizes = [1, 32], strides = [1, 1]} : vector<8x32xf32> to vector<1x32xf32>
    %84 = arith.maximumf %82, %83 : vector<1x32xf32>
    %85 = vector.extract_strided_slice %81 {offsets = [1, 0], sizes = [1, 32], strides = [1, 1]} : vector<8x32xf32> to vector<1x32xf32>
    %86 = vector.extract_strided_slice %81 {offsets = [2, 0], sizes = [1, 32], strides = [1, 1]} : vector<8x32xf32> to vector<1x32xf32>
    %87 = arith.maximumf %85, %86 : vector<1x32xf32>
    %88 = vector.extract_strided_slice %81 {offsets = [3, 0], sizes = [1, 32], strides = [1, 1]} : vector<8x32xf32> to vector<1x32xf32>
    %89 = arith.maximumf %87, %88 : vector<1x32xf32>
    %90 = vector.extract_strided_slice %81 {offsets = [3, 0], sizes = [1, 32], strides = [1, 1]} : vector<8x32xf32> to vector<1x32xf32>
    %91 = vector.extract_strided_slice %81 {offsets = [4, 0], sizes = [1, 32], strides = [1, 1]} : vector<8x32xf32> to vector<1x32xf32>
    %92 = arith.maximumf %90, %91 : vector<1x32xf32>
    %93 = vector.extract_strided_slice %81 {offsets = [5, 0], sizes = [1, 32], strides = [1, 1]} : vector<8x32xf32> to vector<1x32xf32>
    %94 = arith.maximumf %92, %93 : vector<1x32xf32>
    %95 = vector.extract_strided_slice %81 {offsets = [5, 0], sizes = [1, 32], strides = [1, 1]} : vector<8x32xf32> to vector<1x32xf32>
    %96 = vector.extract_strided_slice %81 {offsets = [6, 0], sizes = [1, 32], strides = [1, 1]} : vector<8x32xf32> to vector<1x32xf32>
    %97 = arith.maximumf %95, %96 : vector<1x32xf32>
    %98 = vector.extract_strided_slice %81 {offsets = [7, 0], sizes = [1, 32], strides = [1, 1]} : vector<8x32xf32> to vector<1x32xf32>
    %99 = arith.maximumf %97, %98 : vector<1x32xf32>
    %100 = tpu.concatenate %84, %89, %94, %99 in 0 : vector<1x32xf32>, vector<1x32xf32>, vector<1x32xf32>, vector<1x32xf32> -> vector<4x32xf32>
    %101 = tpu.concatenate %28, %52, %76, %100 in 0 : vector<4x32xf32>, vector<4x32xf32>, vector<4x32xf32>, vector<4x32xf32> -> vector<16x32xf32>
    %102 = arith.addf %101, %5 : vector<16x32xf32>
    %103 = vector.extract_strided_slice %4 {offsets = [64, 0], sizes = [64, 32], strides = [1, 1]} : vector<128x32xf32> to vector<64x32xf32>
    %104 = vector.extract_strided_slice %103 {offsets = [0, 0], sizes = [8, 32], strides = [1, 1]} : vector<64x32xf32> to vector<8x32xf32>
    %105 = vector.extract_strided_slice %103 {offsets = [8, 0], sizes = [8, 32], strides = [1, 1]} : vector<64x32xf32> to vector<8x32xf32>
    %106 = arith.maximumf %104, %105 : vector<8x32xf32>
    %107 = vector.extract_strided_slice %106 {offsets = [0, 0], sizes = [1, 32], strides = [1, 1]} : vector<8x32xf32> to vector<1x32xf32>
    %108 = vector.extract_strided_slice %106 {offsets = [1, 0], sizes = [1, 32], strides = [1, 1]} : vector<8x32xf32> to vector<1x32xf32>
    %109 = arith.maximumf %107, %108 : vector<1x32xf32>
    %110 = vector.extract_strided_slice %106 {offsets = [1, 0], sizes = [1, 32], strides = [1, 1]} : vector<8x32xf32> to vector<1x32xf32>
    %111 = vector.extract_strided_slice %106 {offsets = [2, 0], sizes = [1, 32], strides = [1, 1]} : vector<8x32xf32> to vector<1x32xf32>
    %112 = arith.maximumf %110, %111 : vector<1x32xf32>
    %113 = vector.extract_strided_slice %106 {offsets = [3, 0], sizes = [1, 32], strides = [1, 1]} : vector<8x32xf32> to vector<1x32xf32>
    %114 = arith.maximumf %112, %113 : vector<1x32xf32>
    %115 = vector.extract_strided_slice %106 {offsets = [3, 0], sizes = [1, 32], strides = [1, 1]} : vector<8x32xf32> to vector<1x32xf32>
    %116 = vector.extract_strided_slice %106 {offsets = [4, 0], sizes = [1, 32], strides = [1, 1]} : vector<8x32xf32> to vector<1x32xf32>
    %117 = arith.maximumf %115, %116 : vector<1x32xf32>
    %118 = vector.extract_strided_slice %106 {offsets = [5, 0], sizes = [1, 32], strides = [1, 1]} : vector<8x32xf32> to vector<1x32xf32>
    %119 = arith.maximumf %117, %118 : vector<1x32xf32>
    %120 = vector.extract_strided_slice %106 {offsets = [5, 0], sizes = [1, 32], strides = [1, 1]} : vector<8x32xf32> to vector<1x32xf32>
    %121 = vector.extract_strided_slice %106 {offsets = [6, 0], sizes = [1, 32], strides = [1, 1]} : vector<8x32xf32> to vector<1x32xf32>
    %122 = arith.maximumf %120, %121 : vector<1x32xf32>
    %123 = vector.extract_strided_slice %106 {offsets = [7, 0], sizes = [1, 32], strides = [1, 1]} : vector<8x32xf32> to vector<1x32xf32>
    %124 = arith.maximumf %122, %123 : vector<1x32xf32>
    %125 = tpu.concatenate %109, %114, %119, %124 in 0 : vector<1x32xf32>, vector<1x32xf32>, vector<1x32xf32>, vector<1x32xf32> -> vector<4x32xf32>
    %126 = vector.extract_strided_slice %103 {offsets = [8, 0], sizes = [8, 32], strides = [1, 1]} : vector<64x32xf32> to vector<8x32xf32>
    %127 = vector.extract_strided_slice %103 {offsets = [16, 0], sizes = [8, 32], strides = [1, 1]} : vector<64x32xf32> to vector<8x32xf32>
    %128 = arith.maximumf %126, %127 : vector<8x32xf32>
    %129 = vector.extract_strided_slice %103 {offsets = [24, 0], sizes = [8, 32], strides = [1, 1]} : vector<64x32xf32> to vector<8x32xf32>
    %130 = arith.maximumf %128, %129 : vector<8x32xf32>
    %131 = vector.extract_strided_slice %130 {offsets = [0, 0], sizes = [1, 32], strides = [1, 1]} : vector<8x32xf32> to vector<1x32xf32>
    %132 = vector.extract_strided_slice %130 {offsets = [1, 0], sizes = [1, 32], strides = [1, 1]} : vector<8x32xf32> to vector<1x32xf32>
    %133 = arith.maximumf %131, %132 : vector<1x32xf32>
    %134 = vector.extract_strided_slice %130 {offsets = [1, 0], sizes = [1, 32], strides = [1, 1]} : vector<8x32xf32> to vector<1x32xf32>
    %135 = vector.extract_strided_slice %130 {offsets = [2, 0], sizes = [1, 32], strides = [1, 1]} : vector<8x32xf32> to vector<1x32xf32>
    %136 = arith.maximumf %134, %135 : vector<1x32xf32>
    %137 = vector.extract_strided_slice %130 {offsets = [3, 0], sizes = [1, 32], strides = [1, 1]} : vector<8x32xf32> to vector<1x32xf32>
    %138 = arith.maximumf %136, %137 : vector<1x32xf32>
    %139 = vector.extract_strided_slice %130 {offsets = [3, 0], sizes = [1, 32], strides = [1, 1]} : vector<8x32xf32> to vector<1x32xf32>
    %140 = vector.extract_strided_slice %130 {offsets = [4, 0], sizes = [1, 32], strides = [1, 1]} : vector<8x32xf32> to vector<1x32xf32>
    %141 = arith.maximumf %139, %140 : vector<1x32xf32>
    %142 = vector.extract_strided_slice %130 {offsets = [5, 0], sizes = [1, 32], strides = [1, 1]} : vector<8x32xf32> to vector<1x32xf32>
    %143 = arith.maximumf %141, %142 : vector<1x32xf32>
    %144 = vector.extract_strided_slice %130 {offsets = [5, 0], sizes = [1, 32], strides = [1, 1]} : vector<8x32xf32> to vector<1x32xf32>
    %145 = vector.extract_strided_slice %130 {offsets = [6, 0], sizes = [1, 32], strides = [1, 1]} : vector<8x32xf32> to vector<1x32xf32>
    %146 = arith.maximumf %144, %145 : vector<1x32xf32>
    %147 = vector.extract_strided_slice %130 {offsets = [7, 0], sizes = [1, 32], strides = [1, 1]} : vector<8x32xf32> to vector<1x32xf32>
    %148 = arith.maximumf %146, %147 : vector<1x32xf32>
    %149 = tpu.concatenate %133, %138, %143, %148 in 0 : vector<1x32xf32>, vector<1x32xf32>, vector<1x32xf32>, vector<1x32xf32> -> vector<4x32xf32>
    %150 = vector.extract_strided_slice %103 {offsets = [24, 0], sizes = [8, 32], strides = [1, 1]} : vector<64x32xf32> to vector<8x32xf32>
    %151 = vector.extract_strided_slice %103 {offsets = [32, 0], sizes = [8, 32], strides = [1, 1]} : vector<64x32xf32> to vector<8x32xf32>
    %152 = arith.maximumf %150, %151 : vector<8x32xf32>
    %153 = vector.extract_strided_slice %103 {offsets = [40, 0], sizes = [8, 32], strides = [1, 1]} : vector<64x32xf32> to vector<8x32xf32>
    %154 = arith.maximumf %152, %153 : vector<8x32xf32>
    %155 = vector.extract_strided_slice %154 {offsets = [0, 0], sizes = [1, 32], strides = [1, 1]} : vector<8x32xf32> to vector<1x32xf32>
    %156 = vector.extract_strided_slice %154 {offsets = [1, 0], sizes = [1, 32], strides = [1, 1]} : vector<8x32xf32> to vector<1x32xf32>
    %157 = arith.maximumf %155, %156 : vector<1x32xf32>
    %158 = vector.extract_strided_slice %154 {offsets = [1, 0], sizes = [1, 32], strides = [1, 1]} : vector<8x32xf32> to vector<1x32xf32>
    %159 = vector.extract_strided_slice %154 {offsets = [2, 0], sizes = [1, 32], strides = [1, 1]} : vector<8x32xf32> to vector<1x32xf32>
    %160 = arith.maximumf %158, %159 : vector<1x32xf32>
    %161 = vector.extract_strided_slice %154 {offsets = [3, 0], sizes = [1, 32], strides = [1, 1]} : vector<8x32xf32> to vector<1x32xf32>
    %162 = arith.maximumf %160, %161 : vector<1x32xf32>
    %163 = vector.extract_strided_slice %154 {offsets = [3, 0], sizes = [1, 32], strides = [1, 1]} : vector<8x32xf32> to vector<1x32xf32>
    %164 = vector.extract_strided_slice %154 {offsets = [4, 0], sizes = [1, 32], strides = [1, 1]} : vector<8x32xf32> to vector<1x32xf32>
    %165 = arith.maximumf %163, %164 : vector<1x32xf32>
    %166 = vector.extract_strided_slice %154 {offsets = [5, 0], sizes = [1, 32], strides = [1, 1]} : vector<8x32xf32> to vector<1x32xf32>
    %167 = arith.maximumf %165, %166 : vector<1x32xf32>
    %168 = vector.extract_strided_slice %154 {offsets = [5, 0], sizes = [1, 32], strides = [1, 1]} : vector<8x32xf32> to vector<1x32xf32>
    %169 = vector.extract_strided_slice %154 {offsets = [6, 0], sizes = [1, 32], strides = [1, 1]} : vector<8x32xf32> to vector<1x32xf32>
    %170 = arith.maximumf %168, %169 : vector<1x32xf32>
    %171 = vector.extract_strided_slice %154 {offsets = [7, 0], sizes = [1, 32], strides = [1, 1]} : vector<8x32xf32> to vector<1x32xf32>
    %172 = arith.maximumf %170, %171 : vector<1x32xf32>
    %173 = tpu.concatenate %157, %162, %167, %172 in 0 : vector<1x32xf32>, vector<1x32xf32>, vector<1x32xf32>, vector<1x32xf32> -> vector<4x32xf32>
    %174 = vector.extract_strided_slice %103 {offsets = [40, 0], sizes = [8, 32], strides = [1, 1]} : vector<64x32xf32> to vector<8x32xf32>
    %175 = vector.extract_strided_slice %103 {offsets = [48, 0], sizes = [8, 32], strides = [1, 1]} : vector<64x32xf32> to vector<8x32xf32>
    %176 = arith.maximumf %174, %175 : vector<8x32xf32>
    %177 = vector.extract_strided_slice %103 {offsets = [56, 0], sizes = [8, 32], strides = [1, 1]} : vector<64x32xf32> to vector<8x32xf32>
    %178 = arith.maximumf %176, %177 : vector<8x32xf32>
    %179 = vector.extract_strided_slice %178 {offsets = [0, 0], sizes = [1, 32], strides = [1, 1]} : vector<8x32xf32> to vector<1x32xf32>
    %180 = vector.extract_strided_slice %178 {offsets = [1, 0], sizes = [1, 32], strides = [1, 1]} : vector<8x32xf32> to vector<1x32xf32>
    %181 = arith.maximumf %179, %180 : vector<1x32xf32>
    %182 = vector.extract_strided_slice %178 {offsets = [1, 0], sizes = [1, 32], strides = [1, 1]} : vector<8x32xf32> to vector<1x32xf32>
    %183 = vector.extract_strided_slice %178 {offsets = [2, 0], sizes = [1, 32], strides = [1, 1]} : vector<8x32xf32> to vector<1x32xf32>
    %184 = arith.maximumf %182, %183 : vector<1x32xf32>
    %185 = vector.extract_strided_slice %178 {offsets = [3, 0], sizes = [1, 32], strides = [1, 1]} : vector<8x32xf32> to vector<1x32xf32>
    %186 = arith.maximumf %184, %185 : vector<1x32xf32>
    %187 = vector.extract_strided_slice %178 {offsets = [3, 0], sizes = [1, 32], strides = [1, 1]} : vector<8x32xf32> to vector<1x32xf32>
    %188 = vector.extract_strided_slice %178 {offsets = [4, 0], sizes = [1, 32], strides = [1, 1]} : vector<8x32xf32> to vector<1x32xf32>
    %189 = arith.maximumf %187, %188 : vector<1x32xf32>
    %190 = vector.extract_strided_slice %178 {offsets = [5, 0], sizes = [1, 32], strides = [1, 1]} : vector<8x32xf32> to vector<1x32xf32>
    %191 = arith.maximumf %189, %190 : vector<1x32xf32>
    %192 = vector.extract_strided_slice %178 {offsets = [5, 0], sizes = [1, 32], strides = [1, 1]} : vector<8x32xf32> to vector<1x32xf32>
    %193 = vector.extract_strided_slice %178 {offsets = [6, 0], sizes = [1, 32], strides = [1, 1]} : vector<8x32xf32> to vector<1x32xf32>
    %194 = arith.maximumf %192, %193 : vector<1x32xf32>
    %195 = vector.extract_strided_slice %178 {offsets = [7, 0], sizes = [1, 32], strides = [1, 1]} : vector<8x32xf32> to vector<1x32xf32>
    %196 = arith.maximumf %194, %195 : vector<1x32xf32>
    %197 = tpu.concatenate %181, %186, %191, %196 in 0 : vector<1x32xf32>, vector<1x32xf32>, vector<1x32xf32>, vector<1x32xf32> -> vector<4x32xf32>
    %198 = tpu.concatenate %125, %149, %173, %197 in 0 : vector<4x32xf32>, vector<4x32xf32>, vector<4x32xf32>, vector<4x32xf32> -> vector<16x32xf32>
    %199 = arith.addf %198, %5 : vector<16x32xf32>
    %200 = tpu.concatenate %102, %199 in 0 : vector<16x32xf32>, vector<16x32xf32> -> vector<32x32xf32>
    %c0_6 = arith.constant 0 : index
    %c0_7 = arith.constant 0 : index
    %201 = vector.load %arg3[%c0_6, %c0_7] : memref<1x32xf32, #tpu.memory_space<vmem>>, vector<1x32xf32>
    %c0_8 = arith.constant 0 : index
    %c0_9 = arith.constant 0 : index
    %202 = vector.load %arg4[%c0_8, %c0_9] : memref<1x32xf32, #tpu.memory_space<vmem>>, vector<1x32xf32>
    %c0_10 = arith.constant 0 : index
    %c0_11 = arith.constant 0 : index
    %203 = vector.load %arg5[%c0_10, %c0_11] : memref<32x96xf32, #tpu.memory_space<vmem>>, vector<32x96xf32>
    %c0_12 = arith.constant 0 : index
    %c0_13 = arith.constant 0 : index
    %204 = vector.load %arg6[%c0_12, %c0_13] : memref<32x32xf32, #tpu.memory_space<vmem>>, vector<32x32xf32>
    %c0_14 = arith.constant 0 : index
    %c0_15 = arith.constant 0 : index
    %205 = vector.load %arg7[%c0_14, %c0_15] : memref<1x32xf32, #tpu.memory_space<vmem>>, vector<1x32xf32>
    %c0_16 = arith.constant 0 : index
    %c0_17 = arith.constant 0 : index
    %206 = vector.load %arg8[%c0_16, %c0_17] : memref<1x32xf32, #tpu.memory_space<vmem>>, vector<1x32xf32>
    %c0_18 = arith.constant 0 : index
    %c0_19 = arith.constant 0 : index
    %207 = vector.load %arg9[%c0_18, %c0_19] : memref<1x32xf32, #tpu.memory_space<vmem>>, vector<1x32xf32>
    %c0_20 = arith.constant 0 : index
    %c0_21 = arith.constant 0 : index
    %208 = vector.load %arg10[%c0_20, %c0_21] : memref<32x64xf32, #tpu.memory_space<vmem>>, vector<32x64xf32>
    %c0_22 = arith.constant 0 : index
    %c0_23 = arith.constant 0 : index
    %209 = vector.load %arg11[%c0_22, %c0_23] : memref<1x64xf32, #tpu.memory_space<vmem>>, vector<1x64xf32>
    %c0_24 = arith.constant 0 : index
    %c0_25 = arith.constant 0 : index
    %210 = vector.load %arg12[%c0_24, %c0_25] : memref<64x32xf32, #tpu.memory_space<vmem>>, vector<64x32xf32>
    %c0_26 = arith.constant 0 : index
    %c0_27 = arith.constant 0 : index
    %211 = vector.load %arg13[%c0_26, %c0_27] : memref<1x32xf32, #tpu.memory_space<vmem>>, vector<1x32xf32>
    %cst_28 = arith.constant dense<0.000000e+00> : vector<32xf32>
    %212 = vector.multi_reduction <add>, %200, %cst_28 [1] : vector<32x32xf32> to vector<32xf32>
    %213 = vector.shape_cast %212 : vector<32xf32> to vector<32x1xf32>
    %cst_29 = arith.constant 3.200000e+01 : f32
    %214 = vector.broadcast %cst_29 : f32 to vector<32x1xf32>
    %215 = arith.divf %213, %214 : vector<32x1xf32>
    %216 = vector.broadcast %215 : vector<32x1xf32> to vector<32x32xf32>
    %217 = arith.subf %200, %216 : vector<32x32xf32>
    %218 = arith.mulf %217, %217 : vector<32x32xf32>
    %cst_30 = arith.constant dense<0.000000e+00> : vector<32xf32>
    %219 = vector.multi_reduction <add>, %218, %cst_30 [1] : vector<32x32xf32> to vector<32xf32>
    %220 = vector.shape_cast %219 : vector<32xf32> to vector<32x1xf32>
    %cst_31 = arith.constant 3.200000e+01 : f32
    %221 = vector.broadcast %cst_31 : f32 to vector<32x1xf32>
    %222 = arith.divf %220, %221 : vector<32x1xf32>
    %223 = vector.broadcast %215 : vector<32x1xf32> to vector<32x32xf32>
    %224 = arith.subf %200, %223 : vector<32x32xf32>
    %cst_32 = arith.constant 9.99999974E-6 : f32
    %225 = vector.broadcast %cst_32 : f32 to vector<32x1xf32>
    %226 = arith.addf %222, %225 : vector<32x1xf32>
    %227 = math.rsqrt %226 : vector<32x1xf32>
    %228 = vector.broadcast %227 : vector<32x1xf32> to vector<32x32xf32>
    %229 = arith.mulf %224, %228 : vector<32x32xf32>
    %230 = vector.broadcast %201 : vector<1x32xf32> to vector<32x32xf32>
    %231 = arith.mulf %229, %230 : vector<32x32xf32>
    %232 = vector.broadcast %202 : vector<1x32xf32> to vector<32x32xf32>
    %233 = arith.addf %231, %232 : vector<32x32xf32>
    %cst_33 = arith.constant dense<0.000000e+00> : vector<32x96xf32>
    %234 = tpu.matmul %233, %203, %cst_33 {dimension_numbers = #tpu.dot_dimension_numbers<[1], [0], [0], [1], [0, 0, 1, 1], [], []>} : vector<32x32xf32>, vector<32x96xf32>, vector<32x96xf32> -> vector<32x96xf32>
    %235 = vector.extract_strided_slice %234 {offsets = [0, 0], sizes = [16, 8], strides = [1, 1]} : vector<32x96xf32> to vector<16x8xf32>
    %236 = vector.extract_strided_slice %234 {offsets = [0, 32], sizes = [16, 8], strides = [1, 1]} : vector<32x96xf32> to vector<16x8xf32>
    %237 = vector.extract_strided_slice %234 {offsets = [0, 64], sizes = [16, 8], strides = [1, 1]} : vector<32x96xf32> to vector<16x8xf32>
    %238 = tpu.transpose %236, [1, 0] : vector<16x8xf32> -> vector<8x16xf32>
    %cst_34 = arith.constant dense<0.000000e+00> : vector<16x16xf32>
    %239 = tpu.matmul %235, %238, %cst_34 {dimension_numbers = #tpu.dot_dimension_numbers<[1], [0], [0], [1], [0, 0, 1, 1], [], []>} : vector<16x8xf32>, vector<8x16xf32>, vector<16x16xf32> -> vector<16x16xf32>
    %cst_35 = arith.constant 0.353553385 : f32
    %240 = vector.broadcast %cst_35 : f32 to vector<16x16xf32>
    %241 = arith.mulf %239, %240 : vector<16x16xf32>
    %cst_36 = arith.constant dense<0xFF800000> : vector<16xf32>
    %242 = vector.multi_reduction <maximumf>, %241, %cst_36 [1] : vector<16x16xf32> to vector<16xf32>
    %243 = vector.shape_cast %242 : vector<16xf32> to vector<16x1xf32>
    %244 = vector.broadcast %243 : vector<16x1xf32> to vector<16x16xf32>
    %245 = arith.subf %241, %244 : vector<16x16xf32>
    %246 = math.exp %245 : vector<16x16xf32>
    %cst_37 = arith.constant dense<0.000000e+00> : vector<16xf32>
    %247 = vector.multi_reduction <add>, %246, %cst_37 [1] : vector<16x16xf32> to vector<16xf32>
    %248 = vector.shape_cast %247 : vector<16xf32> to vector<16x1xf32>
    %249 = tpu.reciprocal %248 {approx = true} : vector<16x1xf32> -> vector<16x1xf32>
    %250 = vector.broadcast %249 : vector<16x1xf32> to vector<16x16xf32>
    %251 = arith.mulf %246, %250 : vector<16x16xf32>
    %cst_38 = arith.constant dense<0.000000e+00> : vector<16x8xf32>
    %252 = tpu.matmul %251, %237, %cst_38 {dimension_numbers = #tpu.dot_dimension_numbers<[1], [0], [0], [1], [0, 0, 1, 1], [], []>} : vector<16x16xf32>, vector<16x8xf32>, vector<16x8xf32> -> vector<16x8xf32>
    %253 = vector.extract_strided_slice %234 {offsets = [0, 8], sizes = [16, 8], strides = [1, 1]} : vector<32x96xf32> to vector<16x8xf32>
    %254 = vector.extract_strided_slice %234 {offsets = [0, 40], sizes = [16, 8], strides = [1, 1]} : vector<32x96xf32> to vector<16x8xf32>
    %255 = vector.extract_strided_slice %234 {offsets = [0, 72], sizes = [16, 8], strides = [1, 1]} : vector<32x96xf32> to vector<16x8xf32>
    %256 = tpu.transpose %254, [1, 0] : vector<16x8xf32> -> vector<8x16xf32>
    %cst_39 = arith.constant dense<0.000000e+00> : vector<16x16xf32>
    %257 = tpu.matmul %253, %256, %cst_39 {dimension_numbers = #tpu.dot_dimension_numbers<[1], [0], [0], [1], [0, 0, 1, 1], [], []>} : vector<16x8xf32>, vector<8x16xf32>, vector<16x16xf32> -> vector<16x16xf32>
    %cst_40 = arith.constant 0.353553385 : f32
    %258 = vector.broadcast %cst_40 : f32 to vector<16x16xf32>
    %259 = arith.mulf %257, %258 : vector<16x16xf32>
    %cst_41 = arith.constant dense<0xFF800000> : vector<16xf32>
    %260 = vector.multi_reduction <maximumf>, %259, %cst_41 [1] : vector<16x16xf32> to vector<16xf32>
    %261 = vector.shape_cast %260 : vector<16xf32> to vector<16x1xf32>
    %262 = vector.broadcast %261 : vector<16x1xf32> to vector<16x16xf32>
    %263 = arith.subf %259, %262 : vector<16x16xf32>
    %264 = math.exp %263 : vector<16x16xf32>
    %cst_42 = arith.constant dense<0.000000e+00> : vector<16xf32>
    %265 = vector.multi_reduction <add>, %264, %cst_42 [1] : vector<16x16xf32> to vector<16xf32>
    %266 = vector.shape_cast %265 : vector<16xf32> to vector<16x1xf32>
    %267 = tpu.reciprocal %266 {approx = true} : vector<16x1xf32> -> vector<16x1xf32>
    %268 = vector.broadcast %267 : vector<16x1xf32> to vector<16x16xf32>
    %269 = arith.mulf %264, %268 : vector<16x16xf32>
    %cst_43 = arith.constant dense<0.000000e+00> : vector<16x8xf32>
    %270 = tpu.matmul %269, %255, %cst_43 {dimension_numbers = #tpu.dot_dimension_numbers<[1], [0], [0], [1], [0, 0, 1, 1], [], []>} : vector<16x16xf32>, vector<16x8xf32>, vector<16x8xf32> -> vector<16x8xf32>
    %271 = vector.extract_strided_slice %234 {offsets = [0, 16], sizes = [16, 8], strides = [1, 1]} : vector<32x96xf32> to vector<16x8xf32>
    %272 = vector.extract_strided_slice %234 {offsets = [0, 48], sizes = [16, 8], strides = [1, 1]} : vector<32x96xf32> to vector<16x8xf32>
    %273 = vector.extract_strided_slice %234 {offsets = [0, 80], sizes = [16, 8], strides = [1, 1]} : vector<32x96xf32> to vector<16x8xf32>
    %274 = tpu.transpose %272, [1, 0] : vector<16x8xf32> -> vector<8x16xf32>
    %cst_44 = arith.constant dense<0.000000e+00> : vector<16x16xf32>
    %275 = tpu.matmul %271, %274, %cst_44 {dimension_numbers = #tpu.dot_dimension_numbers<[1], [0], [0], [1], [0, 0, 1, 1], [], []>} : vector<16x8xf32>, vector<8x16xf32>, vector<16x16xf32> -> vector<16x16xf32>
    %cst_45 = arith.constant 0.353553385 : f32
    %276 = vector.broadcast %cst_45 : f32 to vector<16x16xf32>
    %277 = arith.mulf %275, %276 : vector<16x16xf32>
    %cst_46 = arith.constant dense<0xFF800000> : vector<16xf32>
    %278 = vector.multi_reduction <maximumf>, %277, %cst_46 [1] : vector<16x16xf32> to vector<16xf32>
    %279 = vector.shape_cast %278 : vector<16xf32> to vector<16x1xf32>
    %280 = vector.broadcast %279 : vector<16x1xf32> to vector<16x16xf32>
    %281 = arith.subf %277, %280 : vector<16x16xf32>
    %282 = math.exp %281 : vector<16x16xf32>
    %cst_47 = arith.constant dense<0.000000e+00> : vector<16xf32>
    %283 = vector.multi_reduction <add>, %282, %cst_47 [1] : vector<16x16xf32> to vector<16xf32>
    %284 = vector.shape_cast %283 : vector<16xf32> to vector<16x1xf32>
    %285 = tpu.reciprocal %284 {approx = true} : vector<16x1xf32> -> vector<16x1xf32>
    %286 = vector.broadcast %285 : vector<16x1xf32> to vector<16x16xf32>
    %287 = arith.mulf %282, %286 : vector<16x16xf32>
    %cst_48 = arith.constant dense<0.000000e+00> : vector<16x8xf32>
    %288 = tpu.matmul %287, %273, %cst_48 {dimension_numbers = #tpu.dot_dimension_numbers<[1], [0], [0], [1], [0, 0, 1, 1], [], []>} : vector<16x16xf32>, vector<16x8xf32>, vector<16x8xf32> -> vector<16x8xf32>
    %289 = vector.extract_strided_slice %234 {offsets = [0, 24], sizes = [16, 8], strides = [1, 1]} : vector<32x96xf32> to vector<16x8xf32>
    %290 = vector.extract_strided_slice %234 {offsets = [0, 56], sizes = [16, 8], strides = [1, 1]} : vector<32x96xf32> to vector<16x8xf32>
    %291 = vector.extract_strided_slice %234 {offsets = [0, 88], sizes = [16, 8], strides = [1, 1]} : vector<32x96xf32> to vector<16x8xf32>
    %292 = tpu.transpose %290, [1, 0] : vector<16x8xf32> -> vector<8x16xf32>
    %cst_49 = arith.constant dense<0.000000e+00> : vector<16x16xf32>
    %293 = tpu.matmul %289, %292, %cst_49 {dimension_numbers = #tpu.dot_dimension_numbers<[1], [0], [0], [1], [0, 0, 1, 1], [], []>} : vector<16x8xf32>, vector<8x16xf32>, vector<16x16xf32> -> vector<16x16xf32>
    %cst_50 = arith.constant 0.353553385 : f32
    %294 = vector.broadcast %cst_50 : f32 to vector<16x16xf32>
    %295 = arith.mulf %293, %294 : vector<16x16xf32>
    %cst_51 = arith.constant dense<0xFF800000> : vector<16xf32>
    %296 = vector.multi_reduction <maximumf>, %295, %cst_51 [1] : vector<16x16xf32> to vector<16xf32>
    %297 = vector.shape_cast %296 : vector<16xf32> to vector<16x1xf32>
    %298 = vector.broadcast %297 : vector<16x1xf32> to vector<16x16xf32>
    %299 = arith.subf %295, %298 : vector<16x16xf32>
    %300 = math.exp %299 : vector<16x16xf32>
    %cst_52 = arith.constant dense<0.000000e+00> : vector<16xf32>
    %301 = vector.multi_reduction <add>, %300, %cst_52 [1] : vector<16x16xf32> to vector<16xf32>
    %302 = vector.shape_cast %301 : vector<16xf32> to vector<16x1xf32>
    %303 = tpu.reciprocal %302 {approx = true} : vector<16x1xf32> -> vector<16x1xf32>
    %304 = vector.broadcast %303 : vector<16x1xf32> to vector<16x16xf32>
    %305 = arith.mulf %300, %304 : vector<16x16xf32>
    %cst_53 = arith.constant dense<0.000000e+00> : vector<16x8xf32>
    %306 = tpu.matmul %305, %291, %cst_53 {dimension_numbers = #tpu.dot_dimension_numbers<[1], [0], [0], [1], [0, 0, 1, 1], [], []>} : vector<16x16xf32>, vector<16x8xf32>, vector<16x8xf32> -> vector<16x8xf32>
    %307 = tpu.concatenate %252, %270, %288, %306 in 1 : vector<16x8xf32>, vector<16x8xf32>, vector<16x8xf32>, vector<16x8xf32> -> vector<16x32xf32>
    %308 = vector.extract_strided_slice %234 {offsets = [16, 0], sizes = [16, 8], strides = [1, 1]} : vector<32x96xf32> to vector<16x8xf32>
    %309 = vector.extract_strided_slice %234 {offsets = [16, 32], sizes = [16, 8], strides = [1, 1]} : vector<32x96xf32> to vector<16x8xf32>
    %310 = vector.extract_strided_slice %234 {offsets = [16, 64], sizes = [16, 8], strides = [1, 1]} : vector<32x96xf32> to vector<16x8xf32>
    %311 = tpu.transpose %309, [1, 0] : vector<16x8xf32> -> vector<8x16xf32>
    %cst_54 = arith.constant dense<0.000000e+00> : vector<16x16xf32>
    %312 = tpu.matmul %308, %311, %cst_54 {dimension_numbers = #tpu.dot_dimension_numbers<[1], [0], [0], [1], [0, 0, 1, 1], [], []>} : vector<16x8xf32>, vector<8x16xf32>, vector<16x16xf32> -> vector<16x16xf32>
    %cst_55 = arith.constant 0.353553385 : f32
    %313 = vector.broadcast %cst_55 : f32 to vector<16x16xf32>
    %314 = arith.mulf %312, %313 : vector<16x16xf32>
    %cst_56 = arith.constant dense<0xFF800000> : vector<16xf32>
    %315 = vector.multi_reduction <maximumf>, %314, %cst_56 [1] : vector<16x16xf32> to vector<16xf32>
    %316 = vector.shape_cast %315 : vector<16xf32> to vector<16x1xf32>
    %317 = vector.broadcast %316 : vector<16x1xf32> to vector<16x16xf32>
    %318 = arith.subf %314, %317 : vector<16x16xf32>
    %319 = math.exp %318 : vector<16x16xf32>
    %cst_57 = arith.constant dense<0.000000e+00> : vector<16xf32>
    %320 = vector.multi_reduction <add>, %319, %cst_57 [1] : vector<16x16xf32> to vector<16xf32>
    %321 = vector.shape_cast %320 : vector<16xf32> to vector<16x1xf32>
    %322 = tpu.reciprocal %321 {approx = true} : vector<16x1xf32> -> vector<16x1xf32>
    %323 = vector.broadcast %322 : vector<16x1xf32> to vector<16x16xf32>
    %324 = arith.mulf %319, %323 : vector<16x16xf32>
    %cst_58 = arith.constant dense<0.000000e+00> : vector<16x8xf32>
    %325 = tpu.matmul %324, %310, %cst_58 {dimension_numbers = #tpu.dot_dimension_numbers<[1], [0], [0], [1], [0, 0, 1, 1], [], []>} : vector<16x16xf32>, vector<16x8xf32>, vector<16x8xf32> -> vector<16x8xf32>
    %326 = vector.extract_strided_slice %234 {offsets = [16, 8], sizes = [16, 8], strides = [1, 1]} : vector<32x96xf32> to vector<16x8xf32>
    %327 = vector.extract_strided_slice %234 {offsets = [16, 40], sizes = [16, 8], strides = [1, 1]} : vector<32x96xf32> to vector<16x8xf32>
    %328 = vector.extract_strided_slice %234 {offsets = [16, 72], sizes = [16, 8], strides = [1, 1]} : vector<32x96xf32> to vector<16x8xf32>
    %329 = tpu.transpose %327, [1, 0] : vector<16x8xf32> -> vector<8x16xf32>
    %cst_59 = arith.constant dense<0.000000e+00> : vector<16x16xf32>
    %330 = tpu.matmul %326, %329, %cst_59 {dimension_numbers = #tpu.dot_dimension_numbers<[1], [0], [0], [1], [0, 0, 1, 1], [], []>} : vector<16x8xf32>, vector<8x16xf32>, vector<16x16xf32> -> vector<16x16xf32>
    %cst_60 = arith.constant 0.353553385 : f32
    %331 = vector.broadcast %cst_60 : f32 to vector<16x16xf32>
    %332 = arith.mulf %330, %331 : vector<16x16xf32>
    %cst_61 = arith.constant dense<0xFF800000> : vector<16xf32>
    %333 = vector.multi_reduction <maximumf>, %332, %cst_61 [1] : vector<16x16xf32> to vector<16xf32>
    %334 = vector.shape_cast %333 : vector<16xf32> to vector<16x1xf32>
    %335 = vector.broadcast %334 : vector<16x1xf32> to vector<16x16xf32>
    %336 = arith.subf %332, %335 : vector<16x16xf32>
    %337 = math.exp %336 : vector<16x16xf32>
    %cst_62 = arith.constant dense<0.000000e+00> : vector<16xf32>
    %338 = vector.multi_reduction <add>, %337, %cst_62 [1] : vector<16x16xf32> to vector<16xf32>
    %339 = vector.shape_cast %338 : vector<16xf32> to vector<16x1xf32>
    %340 = tpu.reciprocal %339 {approx = true} : vector<16x1xf32> -> vector<16x1xf32>
    %341 = vector.broadcast %340 : vector<16x1xf32> to vector<16x16xf32>
    %342 = arith.mulf %337, %341 : vector<16x16xf32>
    %cst_63 = arith.constant dense<0.000000e+00> : vector<16x8xf32>
    %343 = tpu.matmul %342, %328, %cst_63 {dimension_numbers = #tpu.dot_dimension_numbers<[1], [0], [0], [1], [0, 0, 1, 1], [], []>} : vector<16x16xf32>, vector<16x8xf32>, vector<16x8xf32> -> vector<16x8xf32>
    %344 = vector.extract_strided_slice %234 {offsets = [16, 16], sizes = [16, 8], strides = [1, 1]} : vector<32x96xf32> to vector<16x8xf32>
    %345 = vector.extract_strided_slice %234 {offsets = [16, 48], sizes = [16, 8], strides = [1, 1]} : vector<32x96xf32> to vector<16x8xf32>
    %346 = vector.extract_strided_slice %234 {offsets = [16, 80], sizes = [16, 8], strides = [1, 1]} : vector<32x96xf32> to vector<16x8xf32>
    %347 = tpu.transpose %345, [1, 0] : vector<16x8xf32> -> vector<8x16xf32>
    %cst_64 = arith.constant dense<0.000000e+00> : vector<16x16xf32>
    %348 = tpu.matmul %344, %347, %cst_64 {dimension_numbers = #tpu.dot_dimension_numbers<[1], [0], [0], [1], [0, 0, 1, 1], [], []>} : vector<16x8xf32>, vector<8x16xf32>, vector<16x16xf32> -> vector<16x16xf32>
    %cst_65 = arith.constant 0.353553385 : f32
    %349 = vector.broadcast %cst_65 : f32 to vector<16x16xf32>
    %350 = arith.mulf %348, %349 : vector<16x16xf32>
    %cst_66 = arith.constant dense<0xFF800000> : vector<16xf32>
    %351 = vector.multi_reduction <maximumf>, %350, %cst_66 [1] : vector<16x16xf32> to vector<16xf32>
    %352 = vector.shape_cast %351 : vector<16xf32> to vector<16x1xf32>
    %353 = vector.broadcast %352 : vector<16x1xf32> to vector<16x16xf32>
    %354 = arith.subf %350, %353 : vector<16x16xf32>
    %355 = math.exp %354 : vector<16x16xf32>
    %cst_67 = arith.constant dense<0.000000e+00> : vector<16xf32>
    %356 = vector.multi_reduction <add>, %355, %cst_67 [1] : vector<16x16xf32> to vector<16xf32>
    %357 = vector.shape_cast %356 : vector<16xf32> to vector<16x1xf32>
    %358 = tpu.reciprocal %357 {approx = true} : vector<16x1xf32> -> vector<16x1xf32>
    %359 = vector.broadcast %358 : vector<16x1xf32> to vector<16x16xf32>
    %360 = arith.mulf %355, %359 : vector<16x16xf32>
    %cst_68 = arith.constant dense<0.000000e+00> : vector<16x8xf32>
    %361 = tpu.matmul %360, %346, %cst_68 {dimension_numbers = #tpu.dot_dimension_numbers<[1], [0], [0], [1], [0, 0, 1, 1], [], []>} : vector<16x16xf32>, vector<16x8xf32>, vector<16x8xf32> -> vector<16x8xf32>
    %362 = vector.extract_strided_slice %234 {offsets = [16, 24], sizes = [16, 8], strides = [1, 1]} : vector<32x96xf32> to vector<16x8xf32>
    %363 = vector.extract_strided_slice %234 {offsets = [16, 56], sizes = [16, 8], strides = [1, 1]} : vector<32x96xf32> to vector<16x8xf32>
    %364 = vector.extract_strided_slice %234 {offsets = [16, 88], sizes = [16, 8], strides = [1, 1]} : vector<32x96xf32> to vector<16x8xf32>
    %365 = tpu.transpose %363, [1, 0] : vector<16x8xf32> -> vector<8x16xf32>
    %cst_69 = arith.constant dense<0.000000e+00> : vector<16x16xf32>
    %366 = tpu.matmul %362, %365, %cst_69 {dimension_numbers = #tpu.dot_dimension_numbers<[1], [0], [0], [1], [0, 0, 1, 1], [], []>} : vector<16x8xf32>, vector<8x16xf32>, vector<16x16xf32> -> vector<16x16xf32>
    %cst_70 = arith.constant 0.353553385 : f32
    %367 = vector.broadcast %cst_70 : f32 to vector<16x16xf32>
    %368 = arith.mulf %366, %367 : vector<16x16xf32>
    %cst_71 = arith.constant dense<0xFF800000> : vector<16xf32>
    %369 = vector.multi_reduction <maximumf>, %368, %cst_71 [1] : vector<16x16xf32> to vector<16xf32>
    %370 = vector.shape_cast %369 : vector<16xf32> to vector<16x1xf32>
    %371 = vector.broadcast %370 : vector<16x1xf32> to vector<16x16xf32>
    %372 = arith.subf %368, %371 : vector<16x16xf32>
    %373 = math.exp %372 : vector<16x16xf32>
    %cst_72 = arith.constant dense<0.000000e+00> : vector<16xf32>
    %374 = vector.multi_reduction <add>, %373, %cst_72 [1] : vector<16x16xf32> to vector<16xf32>
    %375 = vector.shape_cast %374 : vector<16xf32> to vector<16x1xf32>
    %376 = tpu.reciprocal %375 {approx = true} : vector<16x1xf32> -> vector<16x1xf32>
    %377 = vector.broadcast %376 : vector<16x1xf32> to vector<16x16xf32>
    %378 = arith.mulf %373, %377 : vector<16x16xf32>
    %cst_73 = arith.constant dense<0.000000e+00> : vector<16x8xf32>
    %379 = tpu.matmul %378, %364, %cst_73 {dimension_numbers = #tpu.dot_dimension_numbers<[1], [0], [0], [1], [0, 0, 1, 1], [], []>} : vector<16x16xf32>, vector<16x8xf32>, vector<16x8xf32> -> vector<16x8xf32>
    %380 = tpu.concatenate %325, %343, %361, %379 in 1 : vector<16x8xf32>, vector<16x8xf32>, vector<16x8xf32>, vector<16x8xf32> -> vector<16x32xf32>
    %381 = tpu.concatenate %307, %380 in 0 : vector<16x32xf32>, vector<16x32xf32> -> vector<32x32xf32>
    %cst_74 = arith.constant dense<0.000000e+00> : vector<32x32xf32>
    %382 = tpu.matmul %381, %204, %cst_74 {dimension_numbers = #tpu.dot_dimension_numbers<[1], [0], [0], [1], [0, 0, 1, 1], [], []>} : vector<32x32xf32>, vector<32x32xf32>, vector<32x32xf32> -> vector<32x32xf32>
    %383 = vector.broadcast %205 : vector<1x32xf32> to vector<32x32xf32>
    %384 = arith.addf %382, %383 : vector<32x32xf32>
    %385 = arith.addf %200, %384 : vector<32x32xf32>
    %cst_75 = arith.constant dense<0.000000e+00> : vector<32xf32>
    %386 = vector.multi_reduction <add>, %385, %cst_75 [1] : vector<32x32xf32> to vector<32xf32>
    %387 = vector.shape_cast %386 : vector<32xf32> to vector<32x1xf32>
    %cst_76 = arith.constant 3.200000e+01 : f32
    %388 = vector.broadcast %cst_76 : f32 to vector<32x1xf32>
    %389 = arith.divf %387, %388 : vector<32x1xf32>
    %390 = vector.broadcast %389 : vector<32x1xf32> to vector<32x32xf32>
    %391 = arith.subf %385, %390 : vector<32x32xf32>
    %392 = arith.mulf %391, %391 : vector<32x32xf32>
    %cst_77 = arith.constant dense<0.000000e+00> : vector<32xf32>
    %393 = vector.multi_reduction <add>, %392, %cst_77 [1] : vector<32x32xf32> to vector<32xf32>
    %394 = vector.shape_cast %393 : vector<32xf32> to vector<32x1xf32>
    %cst_78 = arith.constant 3.200000e+01 : f32
    %395 = vector.broadcast %cst_78 : f32 to vector<32x1xf32>
    %396 = arith.divf %394, %395 : vector<32x1xf32>
    %397 = vector.broadcast %389 : vector<32x1xf32> to vector<32x32xf32>
    %398 = arith.subf %385, %397 : vector<32x32xf32>
    %cst_79 = arith.constant 9.99999974E-6 : f32
    %399 = vector.broadcast %cst_79 : f32 to vector<32x1xf32>
    %400 = arith.addf %396, %399 : vector<32x1xf32>
    %401 = math.rsqrt %400 : vector<32x1xf32>
    %402 = vector.broadcast %401 : vector<32x1xf32> to vector<32x32xf32>
    %403 = arith.mulf %398, %402 : vector<32x32xf32>
    %404 = vector.broadcast %206 : vector<1x32xf32> to vector<32x32xf32>
    %405 = arith.mulf %403, %404 : vector<32x32xf32>
    %406 = vector.broadcast %207 : vector<1x32xf32> to vector<32x32xf32>
    %407 = arith.addf %405, %406 : vector<32x32xf32>
    %cst_80 = arith.constant dense<0.000000e+00> : vector<32x64xf32>
    %408 = tpu.matmul %407, %208, %cst_80 {dimension_numbers = #tpu.dot_dimension_numbers<[1], [0], [0], [1], [0, 0, 1, 1], [], []>} : vector<32x32xf32>, vector<32x64xf32>, vector<32x64xf32> -> vector<32x64xf32>
    %409 = vector.broadcast %209 : vector<1x64xf32> to vector<32x64xf32>
    %410 = arith.addf %408, %409 : vector<32x64xf32>
    %cst_81 = arith.constant 5.000000e-01 : f32
    %411 = vector.broadcast %cst_81 : f32 to vector<32x64xf32>
    %412 = arith.mulf %411, %410 : vector<32x64xf32>
    %cst_82 = arith.constant 0.707106769 : f32
    %413 = vector.broadcast %cst_82 : f32 to vector<32x64xf32>
    %414 = arith.mulf %410, %413 : vector<32x64xf32>
    %415 = math.erf %414 : vector<32x64xf32>
    %cst_83 = arith.constant 1.000000e+00 : f32
    %416 = vector.broadcast %cst_83 : f32 to vector<32x64xf32>
    %417 = arith.addf %416, %415 : vector<32x64xf32>
    %418 = arith.mulf %412, %417 : vector<32x64xf32>
    %cst_84 = arith.constant dense<0.000000e+00> : vector<32x32xf32>
    %419 = tpu.matmul %418, %210, %cst_84 {dimension_numbers = #tpu.dot_dimension_numbers<[1], [0], [0], [1], [0, 0, 1, 1], [], []>} : vector<32x64xf32>, vector<64x32xf32>, vector<32x32xf32> -> vector<32x32xf32>
    %420 = arith.addf %407, %419 : vector<32x32xf32>
    %421 = vector.broadcast %211 : vector<1x32xf32> to vector<32x32xf32>
    %422 = arith.addf %420, %421 : vector<32x32xf32>
    %c0_85 = arith.constant 0 : index
    %c0_86 = arith.constant 0 : index
    %423 = vector.load %arg14[%c0_85, %c0_86] : memref<1x32xf32, #tpu.memory_space<vmem>>, vector<1x32xf32>
    %c0_87 = arith.constant 0 : index
    %c0_88 = arith.constant 0 : index
    %424 = vector.load %arg15[%c0_87, %c0_88] : memref<1x32xf32, #tpu.memory_space<vmem>>, vector<1x32xf32>
    %c0_89 = arith.constant 0 : index
    %c0_90 = arith.constant 0 : index
    %425 = vector.load %arg16[%c0_89, %c0_90] : memref<32x96xf32, #tpu.memory_space<vmem>>, vector<32x96xf32>
    %c0_91 = arith.constant 0 : index
    %c0_92 = arith.constant 0 : index
    %426 = vector.load %arg17[%c0_91, %c0_92] : memref<32x32xf32, #tpu.memory_space<vmem>>, vector<32x32xf32>
    %c0_93 = arith.constant 0 : index
    %c0_94 = arith.constant 0 : index
    %427 = vector.load %arg18[%c0_93, %c0_94] : memref<1x32xf32, #tpu.memory_space<vmem>>, vector<1x32xf32>
    %c0_95 = arith.constant 0 : index
    %c0_96 = arith.constant 0 : index
    %428 = vector.load %arg19[%c0_95, %c0_96] : memref<1x32xf32, #tpu.memory_space<vmem>>, vector<1x32xf32>
    %c0_97 = arith.constant 0 : index
    %c0_98 = arith.constant 0 : index
    %429 = vector.load %arg20[%c0_97, %c0_98] : memref<1x32xf32, #tpu.memory_space<vmem>>, vector<1x32xf32>
    %c0_99 = arith.constant 0 : index
    %c0_100 = arith.constant 0 : index
    %430 = vector.load %arg21[%c0_99, %c0_100] : memref<32x64xf32, #tpu.memory_space<vmem>>, vector<32x64xf32>
    %c0_101 = arith.constant 0 : index
    %c0_102 = arith.constant 0 : index
    %431 = vector.load %arg22[%c0_101, %c0_102] : memref<1x64xf32, #tpu.memory_space<vmem>>, vector<1x64xf32>
    %c0_103 = arith.constant 0 : index
    %c0_104 = arith.constant 0 : index
    %432 = vector.load %arg23[%c0_103, %c0_104] : memref<64x32xf32, #tpu.memory_space<vmem>>, vector<64x32xf32>
    %c0_105 = arith.constant 0 : index
    %c0_106 = arith.constant 0 : index
    %433 = vector.load %arg24[%c0_105, %c0_106] : memref<1x32xf32, #tpu.memory_space<vmem>>, vector<1x32xf32>
    %cst_107 = arith.constant dense<0.000000e+00> : vector<32xf32>
    %434 = vector.multi_reduction <add>, %422, %cst_107 [1] : vector<32x32xf32> to vector<32xf32>
    %435 = vector.shape_cast %434 : vector<32xf32> to vector<32x1xf32>
    %cst_108 = arith.constant 3.200000e+01 : f32
    %436 = vector.broadcast %cst_108 : f32 to vector<32x1xf32>
    %437 = arith.divf %435, %436 : vector<32x1xf32>
    %438 = vector.broadcast %437 : vector<32x1xf32> to vector<32x32xf32>
    %439 = arith.subf %422, %438 : vector<32x32xf32>
    %440 = arith.mulf %439, %439 : vector<32x32xf32>
    %cst_109 = arith.constant dense<0.000000e+00> : vector<32xf32>
    %441 = vector.multi_reduction <add>, %440, %cst_109 [1] : vector<32x32xf32> to vector<32xf32>
    %442 = vector.shape_cast %441 : vector<32xf32> to vector<32x1xf32>
    %cst_110 = arith.constant 3.200000e+01 : f32
    %443 = vector.broadcast %cst_110 : f32 to vector<32x1xf32>
    %444 = arith.divf %442, %443 : vector<32x1xf32>
    %445 = vector.broadcast %437 : vector<32x1xf32> to vector<32x32xf32>
    %446 = arith.subf %422, %445 : vector<32x32xf32>
    %cst_111 = arith.constant 9.99999974E-6 : f32
    %447 = vector.broadcast %cst_111 : f32 to vector<32x1xf32>
    %448 = arith.addf %444, %447 : vector<32x1xf32>
    %449 = math.rsqrt %448 : vector<32x1xf32>
    %450 = vector.broadcast %449 : vector<32x1xf32> to vector<32x32xf32>
    %451 = arith.mulf %446, %450 : vector<32x32xf32>
    %452 = vector.broadcast %423 : vector<1x32xf32> to vector<32x32xf32>
    %453 = arith.mulf %451, %452 : vector<32x32xf32>
    %454 = vector.broadcast %424 : vector<1x32xf32> to vector<32x32xf32>
    %455 = arith.addf %453, %454 : vector<32x32xf32>
    %cst_112 = arith.constant dense<0.000000e+00> : vector<32x96xf32>
    %456 = tpu.matmul %455, %425, %cst_112 {dimension_numbers = #tpu.dot_dimension_numbers<[1], [0], [0], [1], [0, 0, 1, 1], [], []>} : vector<32x32xf32>, vector<32x96xf32>, vector<32x96xf32> -> vector<32x96xf32>
    %457 = vector.extract_strided_slice %456 {offsets = [0, 0], sizes = [16, 8], strides = [1, 1]} : vector<32x96xf32> to vector<16x8xf32>
    %458 = vector.extract_strided_slice %456 {offsets = [0, 32], sizes = [16, 8], strides = [1, 1]} : vector<32x96xf32> to vector<16x8xf32>
    %459 = vector.extract_strided_slice %456 {offsets = [0, 64], sizes = [16, 8], strides = [1, 1]} : vector<32x96xf32> to vector<16x8xf32>
    %460 = tpu.transpose %458, [1, 0] : vector<16x8xf32> -> vector<8x16xf32>
    %cst_113 = arith.constant dense<0.000000e+00> : vector<16x16xf32>
    %461 = tpu.matmul %457, %460, %cst_113 {dimension_numbers = #tpu.dot_dimension_numbers<[1], [0], [0], [1], [0, 0, 1, 1], [], []>} : vector<16x8xf32>, vector<8x16xf32>, vector<16x16xf32> -> vector<16x16xf32>
    %cst_114 = arith.constant 0.353553385 : f32
    %462 = vector.broadcast %cst_114 : f32 to vector<16x16xf32>
    %463 = arith.mulf %461, %462 : vector<16x16xf32>
    %cst_115 = arith.constant dense<0xFF800000> : vector<16xf32>
    %464 = vector.multi_reduction <maximumf>, %463, %cst_115 [1] : vector<16x16xf32> to vector<16xf32>
    %465 = vector.shape_cast %464 : vector<16xf32> to vector<16x1xf32>
    %466 = vector.broadcast %465 : vector<16x1xf32> to vector<16x16xf32>
    %467 = arith.subf %463, %466 : vector<16x16xf32>
    %468 = math.exp %467 : vector<16x16xf32>
    %cst_116 = arith.constant dense<0.000000e+00> : vector<16xf32>
    %469 = vector.multi_reduction <add>, %468, %cst_116 [1] : vector<16x16xf32> to vector<16xf32>
    %470 = vector.shape_cast %469 : vector<16xf32> to vector<16x1xf32>
    %471 = tpu.reciprocal %470 {approx = true} : vector<16x1xf32> -> vector<16x1xf32>
    %472 = vector.broadcast %471 : vector<16x1xf32> to vector<16x16xf32>
    %473 = arith.mulf %468, %472 : vector<16x16xf32>
    %cst_117 = arith.constant dense<0.000000e+00> : vector<16x8xf32>
    %474 = tpu.matmul %473, %459, %cst_117 {dimension_numbers = #tpu.dot_dimension_numbers<[1], [0], [0], [1], [0, 0, 1, 1], [], []>} : vector<16x16xf32>, vector<16x8xf32>, vector<16x8xf32> -> vector<16x8xf32>
    %475 = vector.extract_strided_slice %456 {offsets = [0, 8], sizes = [16, 8], strides = [1, 1]} : vector<32x96xf32> to vector<16x8xf32>
    %476 = vector.extract_strided_slice %456 {offsets = [0, 40], sizes = [16, 8], strides = [1, 1]} : vector<32x96xf32> to vector<16x8xf32>
    %477 = vector.extract_strided_slice %456 {offsets = [0, 72], sizes = [16, 8], strides = [1, 1]} : vector<32x96xf32> to vector<16x8xf32>
    %478 = tpu.transpose %476, [1, 0] : vector<16x8xf32> -> vector<8x16xf32>
    %cst_118 = arith.constant dense<0.000000e+00> : vector<16x16xf32>
    %479 = tpu.matmul %475, %478, %cst_118 {dimension_numbers = #tpu.dot_dimension_numbers<[1], [0], [0], [1], [0, 0, 1, 1], [], []>} : vector<16x8xf32>, vector<8x16xf32>, vector<16x16xf32> -> vector<16x16xf32>
    %cst_119 = arith.constant 0.353553385 : f32
    %480 = vector.broadcast %cst_119 : f32 to vector<16x16xf32>
    %481 = arith.mulf %479, %480 : vector<16x16xf32>
    %cst_120 = arith.constant dense<0xFF800000> : vector<16xf32>
    %482 = vector.multi_reduction <maximumf>, %481, %cst_120 [1] : vector<16x16xf32> to vector<16xf32>
    %483 = vector.shape_cast %482 : vector<16xf32> to vector<16x1xf32>
    %484 = vector.broadcast %483 : vector<16x1xf32> to vector<16x16xf32>
    %485 = arith.subf %481, %484 : vector<16x16xf32>
    %486 = math.exp %485 : vector<16x16xf32>
    %cst_121 = arith.constant dense<0.000000e+00> : vector<16xf32>
    %487 = vector.multi_reduction <add>, %486, %cst_121 [1] : vector<16x16xf32> to vector<16xf32>
    %488 = vector.shape_cast %487 : vector<16xf32> to vector<16x1xf32>
    %489 = tpu.reciprocal %488 {approx = true} : vector<16x1xf32> -> vector<16x1xf32>
    %490 = vector.broadcast %489 : vector<16x1xf32> to vector<16x16xf32>
    %491 = arith.mulf %486, %490 : vector<16x16xf32>
    %cst_122 = arith.constant dense<0.000000e+00> : vector<16x8xf32>
    %492 = tpu.matmul %491, %477, %cst_122 {dimension_numbers = #tpu.dot_dimension_numbers<[1], [0], [0], [1], [0, 0, 1, 1], [], []>} : vector<16x16xf32>, vector<16x8xf32>, vector<16x8xf32> -> vector<16x8xf32>
    %493 = vector.extract_strided_slice %456 {offsets = [0, 16], sizes = [16, 8], strides = [1, 1]} : vector<32x96xf32> to vector<16x8xf32>
    %494 = vector.extract_strided_slice %456 {offsets = [0, 48], sizes = [16, 8], strides = [1, 1]} : vector<32x96xf32> to vector<16x8xf32>
    %495 = vector.extract_strided_slice %456 {offsets = [0, 80], sizes = [16, 8], strides = [1, 1]} : vector<32x96xf32> to vector<16x8xf32>
    %496 = tpu.transpose %494, [1, 0] : vector<16x8xf32> -> vector<8x16xf32>
    %cst_123 = arith.constant dense<0.000000e+00> : vector<16x16xf32>
    %497 = tpu.matmul %493, %496, %cst_123 {dimension_numbers = #tpu.dot_dimension_numbers<[1], [0], [0], [1], [0, 0, 1, 1], [], []>} : vector<16x8xf32>, vector<8x16xf32>, vector<16x16xf32> -> vector<16x16xf32>
    %cst_124 = arith.constant 0.353553385 : f32
    %498 = vector.broadcast %cst_124 : f32 to vector<16x16xf32>
    %499 = arith.mulf %497, %498 : vector<16x16xf32>
    %cst_125 = arith.constant dense<0xFF800000> : vector<16xf32>
    %500 = vector.multi_reduction <maximumf>, %499, %cst_125 [1] : vector<16x16xf32> to vector<16xf32>
    %501 = vector.shape_cast %500 : vector<16xf32> to vector<16x1xf32>
    %502 = vector.broadcast %501 : vector<16x1xf32> to vector<16x16xf32>
    %503 = arith.subf %499, %502 : vector<16x16xf32>
    %504 = math.exp %503 : vector<16x16xf32>
    %cst_126 = arith.constant dense<0.000000e+00> : vector<16xf32>
    %505 = vector.multi_reduction <add>, %504, %cst_126 [1] : vector<16x16xf32> to vector<16xf32>
    %506 = vector.shape_cast %505 : vector<16xf32> to vector<16x1xf32>
    %507 = tpu.reciprocal %506 {approx = true} : vector<16x1xf32> -> vector<16x1xf32>
    %508 = vector.broadcast %507 : vector<16x1xf32> to vector<16x16xf32>
    %509 = arith.mulf %504, %508 : vector<16x16xf32>
    %cst_127 = arith.constant dense<0.000000e+00> : vector<16x8xf32>
    %510 = tpu.matmul %509, %495, %cst_127 {dimension_numbers = #tpu.dot_dimension_numbers<[1], [0], [0], [1], [0, 0, 1, 1], [], []>} : vector<16x16xf32>, vector<16x8xf32>, vector<16x8xf32> -> vector<16x8xf32>
    %511 = vector.extract_strided_slice %456 {offsets = [0, 24], sizes = [16, 8], strides = [1, 1]} : vector<32x96xf32> to vector<16x8xf32>
    %512 = vector.extract_strided_slice %456 {offsets = [0, 56], sizes = [16, 8], strides = [1, 1]} : vector<32x96xf32> to vector<16x8xf32>
    %513 = vector.extract_strided_slice %456 {offsets = [0, 88], sizes = [16, 8], strides = [1, 1]} : vector<32x96xf32> to vector<16x8xf32>
    %514 = tpu.transpose %512, [1, 0] : vector<16x8xf32> -> vector<8x16xf32>
    %cst_128 = arith.constant dense<0.000000e+00> : vector<16x16xf32>
    %515 = tpu.matmul %511, %514, %cst_128 {dimension_numbers = #tpu.dot_dimension_numbers<[1], [0], [0], [1], [0, 0, 1, 1], [], []>} : vector<16x8xf32>, vector<8x16xf32>, vector<16x16xf32> -> vector<16x16xf32>
    %cst_129 = arith.constant 0.353553385 : f32
    %516 = vector.broadcast %cst_129 : f32 to vector<16x16xf32>
    %517 = arith.mulf %515, %516 : vector<16x16xf32>
    %cst_130 = arith.constant dense<0xFF800000> : vector<16xf32>
    %518 = vector.multi_reduction <maximumf>, %517, %cst_130 [1] : vector<16x16xf32> to vector<16xf32>
    %519 = vector.shape_cast %518 : vector<16xf32> to vector<16x1xf32>
    %520 = vector.broadcast %519 : vector<16x1xf32> to vector<16x16xf32>
    %521 = arith.subf %517, %520 : vector<16x16xf32>
    %522 = math.exp %521 : vector<16x16xf32>
    %cst_131 = arith.constant dense<0.000000e+00> : vector<16xf32>
    %523 = vector.multi_reduction <add>, %522, %cst_131 [1] : vector<16x16xf32> to vector<16xf32>
    %524 = vector.shape_cast %523 : vector<16xf32> to vector<16x1xf32>
    %525 = tpu.reciprocal %524 {approx = true} : vector<16x1xf32> -> vector<16x1xf32>
    %526 = vector.broadcast %525 : vector<16x1xf32> to vector<16x16xf32>
    %527 = arith.mulf %522, %526 : vector<16x16xf32>
    %cst_132 = arith.constant dense<0.000000e+00> : vector<16x8xf32>
    %528 = tpu.matmul %527, %513, %cst_132 {dimension_numbers = #tpu.dot_dimension_numbers<[1], [0], [0], [1], [0, 0, 1, 1], [], []>} : vector<16x16xf32>, vector<16x8xf32>, vector<16x8xf32> -> vector<16x8xf32>
    %529 = tpu.concatenate %474, %492, %510, %528 in 1 : vector<16x8xf32>, vector<16x8xf32>, vector<16x8xf32>, vector<16x8xf32> -> vector<16x32xf32>
    %530 = vector.extract_strided_slice %456 {offsets = [16, 0], sizes = [16, 8], strides = [1, 1]} : vector<32x96xf32> to vector<16x8xf32>
    %531 = vector.extract_strided_slice %456 {offsets = [16, 32], sizes = [16, 8], strides = [1, 1]} : vector<32x96xf32> to vector<16x8xf32>
    %532 = vector.extract_strided_slice %456 {offsets = [16, 64], sizes = [16, 8], strides = [1, 1]} : vector<32x96xf32> to vector<16x8xf32>
    %533 = tpu.transpose %531, [1, 0] : vector<16x8xf32> -> vector<8x16xf32>
    %cst_133 = arith.constant dense<0.000000e+00> : vector<16x16xf32>
    %534 = tpu.matmul %530, %533, %cst_133 {dimension_numbers = #tpu.dot_dimension_numbers<[1], [0], [0], [1], [0, 0, 1, 1], [], []>} : vector<16x8xf32>, vector<8x16xf32>, vector<16x16xf32> -> vector<16x16xf32>
    %cst_134 = arith.constant 0.353553385 : f32
    %535 = vector.broadcast %cst_134 : f32 to vector<16x16xf32>
    %536 = arith.mulf %534, %535 : vector<16x16xf32>
    %cst_135 = arith.constant dense<0xFF800000> : vector<16xf32>
    %537 = vector.multi_reduction <maximumf>, %536, %cst_135 [1] : vector<16x16xf32> to vector<16xf32>
    %538 = vector.shape_cast %537 : vector<16xf32> to vector<16x1xf32>
    %539 = vector.broadcast %538 : vector<16x1xf32> to vector<16x16xf32>
    %540 = arith.subf %536, %539 : vector<16x16xf32>
    %541 = math.exp %540 : vector<16x16xf32>
    %cst_136 = arith.constant dense<0.000000e+00> : vector<16xf32>
    %542 = vector.multi_reduction <add>, %541, %cst_136 [1] : vector<16x16xf32> to vector<16xf32>
    %543 = vector.shape_cast %542 : vector<16xf32> to vector<16x1xf32>
    %544 = tpu.reciprocal %543 {approx = true} : vector<16x1xf32> -> vector<16x1xf32>
    %545 = vector.broadcast %544 : vector<16x1xf32> to vector<16x16xf32>
    %546 = arith.mulf %541, %545 : vector<16x16xf32>
    %cst_137 = arith.constant dense<0.000000e+00> : vector<16x8xf32>
    %547 = tpu.matmul %546, %532, %cst_137 {dimension_numbers = #tpu.dot_dimension_numbers<[1], [0], [0], [1], [0, 0, 1, 1], [], []>} : vector<16x16xf32>, vector<16x8xf32>, vector<16x8xf32> -> vector<16x8xf32>
    %548 = vector.extract_strided_slice %456 {offsets = [16, 8], sizes = [16, 8], strides = [1, 1]} : vector<32x96xf32> to vector<16x8xf32>
    %549 = vector.extract_strided_slice %456 {offsets = [16, 40], sizes = [16, 8], strides = [1, 1]} : vector<32x96xf32> to vector<16x8xf32>
    %550 = vector.extract_strided_slice %456 {offsets = [16, 72], sizes = [16, 8], strides = [1, 1]} : vector<32x96xf32> to vector<16x8xf32>
    %551 = tpu.transpose %549, [1, 0] : vector<16x8xf32> -> vector<8x16xf32>
    %cst_138 = arith.constant dense<0.000000e+00> : vector<16x16xf32>
    %552 = tpu.matmul %548, %551, %cst_138 {dimension_numbers = #tpu.dot_dimension_numbers<[1], [0], [0], [1], [0, 0, 1, 1], [], []>} : vector<16x8xf32>, vector<8x16xf32>, vector<16x16xf32> -> vector<16x16xf32>
    %cst_139 = arith.constant 0.353553385 : f32
    %553 = vector.broadcast %cst_139 : f32 to vector<16x16xf32>
    %554 = arith.mulf %552, %553 : vector<16x16xf32>
    %cst_140 = arith.constant dense<0xFF800000> : vector<16xf32>
    %555 = vector.multi_reduction <maximumf>, %554, %cst_140 [1] : vector<16x16xf32> to vector<16xf32>
    %556 = vector.shape_cast %555 : vector<16xf32> to vector<16x1xf32>
    %557 = vector.broadcast %556 : vector<16x1xf32> to vector<16x16xf32>
    %558 = arith.subf %554, %557 : vector<16x16xf32>
    %559 = math.exp %558 : vector<16x16xf32>
    %cst_141 = arith.constant dense<0.000000e+00> : vector<16xf32>
    %560 = vector.multi_reduction <add>, %559, %cst_141 [1] : vector<16x16xf32> to vector<16xf32>
    %561 = vector.shape_cast %560 : vector<16xf32> to vector<16x1xf32>
    %562 = tpu.reciprocal %561 {approx = true} : vector<16x1xf32> -> vector<16x1xf32>
    %563 = vector.broadcast %562 : vector<16x1xf32> to vector<16x16xf32>
    %564 = arith.mulf %559, %563 : vector<16x16xf32>
    %cst_142 = arith.constant dense<0.000000e+00> : vector<16x8xf32>
    %565 = tpu.matmul %564, %550, %cst_142 {dimension_numbers = #tpu.dot_dimension_numbers<[1], [0], [0], [1], [0, 0, 1, 1], [], []>} : vector<16x16xf32>, vector<16x8xf32>, vector<16x8xf32> -> vector<16x8xf32>
    %566 = vector.extract_strided_slice %456 {offsets = [16, 16], sizes = [16, 8], strides = [1, 1]} : vector<32x96xf32> to vector<16x8xf32>
    %567 = vector.extract_strided_slice %456 {offsets = [16, 48], sizes = [16, 8], strides = [1, 1]} : vector<32x96xf32> to vector<16x8xf32>
    %568 = vector.extract_strided_slice %456 {offsets = [16, 80], sizes = [16, 8], strides = [1, 1]} : vector<32x96xf32> to vector<16x8xf32>
    %569 = tpu.transpose %567, [1, 0] : vector<16x8xf32> -> vector<8x16xf32>
    %cst_143 = arith.constant dense<0.000000e+00> : vector<16x16xf32>
    %570 = tpu.matmul %566, %569, %cst_143 {dimension_numbers = #tpu.dot_dimension_numbers<[1], [0], [0], [1], [0, 0, 1, 1], [], []>} : vector<16x8xf32>, vector<8x16xf32>, vector<16x16xf32> -> vector<16x16xf32>
    %cst_144 = arith.constant 0.353553385 : f32
    %571 = vector.broadcast %cst_144 : f32 to vector<16x16xf32>
    %572 = arith.mulf %570, %571 : vector<16x16xf32>
    %cst_145 = arith.constant dense<0xFF800000> : vector<16xf32>
    %573 = vector.multi_reduction <maximumf>, %572, %cst_145 [1] : vector<16x16xf32> to vector<16xf32>
    %574 = vector.shape_cast %573 : vector<16xf32> to vector<16x1xf32>
    %575 = vector.broadcast %574 : vector<16x1xf32> to vector<16x16xf32>
    %576 = arith.subf %572, %575 : vector<16x16xf32>
    %577 = math.exp %576 : vector<16x16xf32>
    %cst_146 = arith.constant dense<0.000000e+00> : vector<16xf32>
    %578 = vector.multi_reduction <add>, %577, %cst_146 [1] : vector<16x16xf32> to vector<16xf32>
    %579 = vector.shape_cast %578 : vector<16xf32> to vector<16x1xf32>
    %580 = tpu.reciprocal %579 {approx = true} : vector<16x1xf32> -> vector<16x1xf32>
    %581 = vector.broadcast %580 : vector<16x1xf32> to vector<16x16xf32>
    %582 = arith.mulf %577, %581 : vector<16x16xf32>
    %cst_147 = arith.constant dense<0.000000e+00> : vector<16x8xf32>
    %583 = tpu.matmul %582, %568, %cst_147 {dimension_numbers = #tpu.dot_dimension_numbers<[1], [0], [0], [1], [0, 0, 1, 1], [], []>} : vector<16x16xf32>, vector<16x8xf32>, vector<16x8xf32> -> vector<16x8xf32>
    %584 = vector.extract_strided_slice %456 {offsets = [16, 24], sizes = [16, 8], strides = [1, 1]} : vector<32x96xf32> to vector<16x8xf32>
    %585 = vector.extract_strided_slice %456 {offsets = [16, 56], sizes = [16, 8], strides = [1, 1]} : vector<32x96xf32> to vector<16x8xf32>
    %586 = vector.extract_strided_slice %456 {offsets = [16, 88], sizes = [16, 8], strides = [1, 1]} : vector<32x96xf32> to vector<16x8xf32>
    %587 = tpu.transpose %585, [1, 0] : vector<16x8xf32> -> vector<8x16xf32>
    %cst_148 = arith.constant dense<0.000000e+00> : vector<16x16xf32>
    %588 = tpu.matmul %584, %587, %cst_148 {dimension_numbers = #tpu.dot_dimension_numbers<[1], [0], [0], [1], [0, 0, 1, 1], [], []>} : vector<16x8xf32>, vector<8x16xf32>, vector<16x16xf32> -> vector<16x16xf32>
    %cst_149 = arith.constant 0.353553385 : f32
    %589 = vector.broadcast %cst_149 : f32 to vector<16x16xf32>
    %590 = arith.mulf %588, %589 : vector<16x16xf32>
    %cst_150 = arith.constant dense<0xFF800000> : vector<16xf32>
    %591 = vector.multi_reduction <maximumf>, %590, %cst_150 [1] : vector<16x16xf32> to vector<16xf32>
    %592 = vector.shape_cast %591 : vector<16xf32> to vector<16x1xf32>
    %593 = vector.broadcast %592 : vector<16x1xf32> to vector<16x16xf32>
    %594 = arith.subf %590, %593 : vector<16x16xf32>
    %595 = math.exp %594 : vector<16x16xf32>
    %cst_151 = arith.constant dense<0.000000e+00> : vector<16xf32>
    %596 = vector.multi_reduction <add>, %595, %cst_151 [1] : vector<16x16xf32> to vector<16xf32>
    %597 = vector.shape_cast %596 : vector<16xf32> to vector<16x1xf32>
    %598 = tpu.reciprocal %597 {approx = true} : vector<16x1xf32> -> vector<16x1xf32>
    %599 = vector.broadcast %598 : vector<16x1xf32> to vector<16x16xf32>
    %600 = arith.mulf %595, %599 : vector<16x16xf32>
    %cst_152 = arith.constant dense<0.000000e+00> : vector<16x8xf32>
    %601 = tpu.matmul %600, %586, %cst_152 {dimension_numbers = #tpu.dot_dimension_numbers<[1], [0], [0], [1], [0, 0, 1, 1], [], []>} : vector<16x16xf32>, vector<16x8xf32>, vector<16x8xf32> -> vector<16x8xf32>
    %602 = tpu.concatenate %547, %565, %583, %601 in 1 : vector<16x8xf32>, vector<16x8xf32>, vector<16x8xf32>, vector<16x8xf32> -> vector<16x32xf32>
    %603 = tpu.concatenate %529, %602 in 0 : vector<16x32xf32>, vector<16x32xf32> -> vector<32x32xf32>
    %cst_153 = arith.constant dense<0.000000e+00> : vector<32x32xf32>
    %604 = tpu.matmul %603, %426, %cst_153 {dimension_numbers = #tpu.dot_dimension_numbers<[1], [0], [0], [1], [0, 0, 1, 1], [], []>} : vector<32x32xf32>, vector<32x32xf32>, vector<32x32xf32> -> vector<32x32xf32>
    %605 = vector.broadcast %427 : vector<1x32xf32> to vector<32x32xf32>
    %606 = arith.addf %604, %605 : vector<32x32xf32>
    %607 = arith.addf %422, %606 : vector<32x32xf32>
    %cst_154 = arith.constant dense<0.000000e+00> : vector<32xf32>
    %608 = vector.multi_reduction <add>, %607, %cst_154 [1] : vector<32x32xf32> to vector<32xf32>
    %609 = vector.shape_cast %608 : vector<32xf32> to vector<32x1xf32>
    %cst_155 = arith.constant 3.200000e+01 : f32
    %610 = vector.broadcast %cst_155 : f32 to vector<32x1xf32>
    %611 = arith.divf %609, %610 : vector<32x1xf32>
    %612 = vector.broadcast %611 : vector<32x1xf32> to vector<32x32xf32>
    %613 = arith.subf %607, %612 : vector<32x32xf32>
    %614 = arith.mulf %613, %613 : vector<32x32xf32>
    %cst_156 = arith.constant dense<0.000000e+00> : vector<32xf32>
    %615 = vector.multi_reduction <add>, %614, %cst_156 [1] : vector<32x32xf32> to vector<32xf32>
    %616 = vector.shape_cast %615 : vector<32xf32> to vector<32x1xf32>
    %cst_157 = arith.constant 3.200000e+01 : f32
    %617 = vector.broadcast %cst_157 : f32 to vector<32x1xf32>
    %618 = arith.divf %616, %617 : vector<32x1xf32>
    %619 = vector.broadcast %611 : vector<32x1xf32> to vector<32x32xf32>
    %620 = arith.subf %607, %619 : vector<32x32xf32>
    %cst_158 = arith.constant 9.99999974E-6 : f32
    %621 = vector.broadcast %cst_158 : f32 to vector<32x1xf32>
    %622 = arith.addf %618, %621 : vector<32x1xf32>
    %623 = math.rsqrt %622 : vector<32x1xf32>
    %624 = vector.broadcast %623 : vector<32x1xf32> to vector<32x32xf32>
    %625 = arith.mulf %620, %624 : vector<32x32xf32>
    %626 = vector.broadcast %428 : vector<1x32xf32> to vector<32x32xf32>
    %627 = arith.mulf %625, %626 : vector<32x32xf32>
    %628 = vector.broadcast %429 : vector<1x32xf32> to vector<32x32xf32>
    %629 = arith.addf %627, %628 : vector<32x32xf32>
    %cst_159 = arith.constant dense<0.000000e+00> : vector<32x64xf32>
    %630 = tpu.matmul %629, %430, %cst_159 {dimension_numbers = #tpu.dot_dimension_numbers<[1], [0], [0], [1], [0, 0, 1, 1], [], []>} : vector<32x32xf32>, vector<32x64xf32>, vector<32x64xf32> -> vector<32x64xf32>
    %631 = vector.broadcast %431 : vector<1x64xf32> to vector<32x64xf32>
    %632 = arith.addf %630, %631 : vector<32x64xf32>
    %cst_160 = arith.constant 5.000000e-01 : f32
    %633 = vector.broadcast %cst_160 : f32 to vector<32x64xf32>
    %634 = arith.mulf %633, %632 : vector<32x64xf32>
    %cst_161 = arith.constant 0.707106769 : f32
    %635 = vector.broadcast %cst_161 : f32 to vector<32x64xf32>
    %636 = arith.mulf %632, %635 : vector<32x64xf32>
    %637 = math.erf %636 : vector<32x64xf32>
    %cst_162 = arith.constant 1.000000e+00 : f32
    %638 = vector.broadcast %cst_162 : f32 to vector<32x64xf32>
    %639 = arith.addf %638, %637 : vector<32x64xf32>
    %640 = arith.mulf %634, %639 : vector<32x64xf32>
    %cst_163 = arith.constant dense<0.000000e+00> : vector<32x32xf32>
    %641 = tpu.matmul %640, %432, %cst_163 {dimension_numbers = #tpu.dot_dimension_numbers<[1], [0], [0], [1], [0, 0, 1, 1], [], []>} : vector<32x64xf32>, vector<64x32xf32>, vector<32x32xf32> -> vector<32x32xf32>
    %642 = arith.addf %629, %641 : vector<32x32xf32>
    %643 = vector.broadcast %433 : vector<1x32xf32> to vector<32x32xf32>
    %644 = arith.addf %642, %643 : vector<32x32xf32>
    %c0_164 = arith.constant 0 : index
    %c0_165 = arith.constant 0 : index
    %645 = vector.load %arg25[%c0_164, %c0_165] : memref<1x32xf32, #tpu.memory_space<vmem>>, vector<1x32xf32>
    %c0_166 = arith.constant 0 : index
    %c0_167 = arith.constant 0 : index
    %646 = vector.load %arg26[%c0_166, %c0_167] : memref<1x32xf32, #tpu.memory_space<vmem>>, vector<1x32xf32>
    %cst_168 = arith.constant dense<0.000000e+00> : vector<32xf32>
    %647 = vector.multi_reduction <add>, %644, %cst_168 [1] : vector<32x32xf32> to vector<32xf32>
    %648 = vector.shape_cast %647 : vector<32xf32> to vector<32x1xf32>
    %cst_169 = arith.constant 3.200000e+01 : f32
    %649 = vector.broadcast %cst_169 : f32 to vector<32x1xf32>
    %650 = arith.divf %648, %649 : vector<32x1xf32>
    %651 = vector.broadcast %650 : vector<32x1xf32> to vector<32x32xf32>
    %652 = arith.subf %644, %651 : vector<32x32xf32>
    %653 = arith.mulf %652, %652 : vector<32x32xf32>
    %cst_170 = arith.constant dense<0.000000e+00> : vector<32xf32>
    %654 = vector.multi_reduction <add>, %653, %cst_170 [1] : vector<32x32xf32> to vector<32xf32>
    %655 = vector.shape_cast %654 : vector<32xf32> to vector<32x1xf32>
    %cst_171 = arith.constant 3.200000e+01 : f32
    %656 = vector.broadcast %cst_171 : f32 to vector<32x1xf32>
    %657 = arith.divf %655, %656 : vector<32x1xf32>
    %658 = vector.broadcast %650 : vector<32x1xf32> to vector<32x32xf32>
    %659 = arith.subf %644, %658 : vector<32x32xf32>
    %cst_172 = arith.constant 9.99999974E-6 : f32
    %660 = vector.broadcast %cst_172 : f32 to vector<32x1xf32>
    %661 = arith.addf %657, %660 : vector<32x1xf32>
    %662 = math.rsqrt %661 : vector<32x1xf32>
    %663 = vector.broadcast %662 : vector<32x1xf32> to vector<32x32xf32>
    %664 = arith.mulf %659, %663 : vector<32x32xf32>
    %665 = vector.broadcast %645 : vector<1x32xf32> to vector<32x32xf32>
    %666 = arith.mulf %664, %665 : vector<32x32xf32>
    %667 = vector.broadcast %646 : vector<1x32xf32> to vector<32x32xf32>
    %668 = arith.addf %666, %667 : vector<32x32xf32>
    %c0_173 = arith.constant 0 : index
    %c0_174 = arith.constant 0 : index
    %669 = vector.load %arg27[%c0_173, %c0_174] : memref<1x32xf32, #tpu.memory_space<vmem>>, vector<1x32xf32>
    %670 = vector.broadcast %669 : vector<1x32xf32> to vector<32x32xf32>
    %671 = arith.mulf %668, %670 : vector<32x32xf32>
    %cst_175 = arith.constant dense<0.000000e+00> : vector<32xf32>
    %672 = vector.multi_reduction <add>, %671, %cst_175 [1] : vector<32x32xf32> to vector<32xf32>
    %673 = vector.shape_cast %672 : vector<32xf32> to vector<32x1xf32>
    %c0_176 = arith.constant 0 : index
    %c0_177 = arith.constant 0 : index
    %674 = vector.load %arg28[%c0_176, %c0_177] : memref<1x1xf32, #tpu.memory_space<vmem>>, vector<1x1xf32>
    %675 = vector.broadcast %674 : vector<1x1xf32> to vector<32x1xf32>
    %676 = arith.addf %673, %675 : vector<32x1xf32>
    %677 = vector.extract_strided_slice %676 {offsets = [0, 0], sizes = [16, 1], strides = [1, 1]} : vector<32x1xf32> to vector<16x1xf32>
    %cst_178 = arith.constant dense<0xFF800000> : vector<1xf32>
    %678 = vector.multi_reduction <maximumf>, %677, %cst_178 [0] : vector<16x1xf32> to vector<1xf32>
    %679 = vector.shape_cast %678 : vector<1xf32> to vector<1x1xf32>
    %680 = vector.broadcast %679 : vector<1x1xf32> to vector<16x1xf32>
    %681 = arith.subf %677, %680 : vector<16x1xf32>
    %682 = math.exp %681 : vector<16x1xf32>
    %cst_179 = arith.constant dense<0.000000e+00> : vector<1xf32>
    %683 = vector.multi_reduction <add>, %682, %cst_179 [0] : vector<16x1xf32> to vector<1xf32>
    %684 = vector.shape_cast %683 : vector<1xf32> to vector<1x1xf32>
    %685 = tpu.reciprocal %684 {approx = true} : vector<1x1xf32> -> vector<1x1xf32>
    %686 = vector.broadcast %685 : vector<1x1xf32> to vector<16x1xf32>
    %687 = arith.mulf %682, %686 : vector<16x1xf32>
    %688 = vector.extract_strided_slice %668 {offsets = [0, 0], sizes = [16, 32], strides = [1, 1]} : vector<32x32xf32> to vector<16x32xf32>
    %689 = vector.broadcast %687 : vector<16x1xf32> to vector<16x32xf32>
    %690 = arith.mulf %688, %689 : vector<16x32xf32>
    %cst_180 = arith.constant dense<0.000000e+00> : vector<32xf32>
    %691 = vector.multi_reduction <add>, %690, %cst_180 [0] : vector<16x32xf32> to vector<32xf32>
    %692 = vector.shape_cast %691 : vector<32xf32> to vector<1x32xf32>
    %693 = vector.extract_strided_slice %676 {offsets = [16, 0], sizes = [16, 1], strides = [1, 1]} : vector<32x1xf32> to vector<16x1xf32>
    %cst_181 = arith.constant dense<0xFF800000> : vector<1xf32>
    %694 = vector.multi_reduction <maximumf>, %693, %cst_181 [0] : vector<16x1xf32> to vector<1xf32>
    %695 = vector.shape_cast %694 : vector<1xf32> to vector<1x1xf32>
    %696 = vector.broadcast %695 : vector<1x1xf32> to vector<16x1xf32>
    %697 = arith.subf %693, %696 : vector<16x1xf32>
    %698 = math.exp %697 : vector<16x1xf32>
    %cst_182 = arith.constant dense<0.000000e+00> : vector<1xf32>
    %699 = vector.multi_reduction <add>, %698, %cst_182 [0] : vector<16x1xf32> to vector<1xf32>
    %700 = vector.shape_cast %699 : vector<1xf32> to vector<1x1xf32>
    %701 = tpu.reciprocal %700 {approx = true} : vector<1x1xf32> -> vector<1x1xf32>
    %702 = vector.broadcast %701 : vector<1x1xf32> to vector<16x1xf32>
    %703 = arith.mulf %698, %702 : vector<16x1xf32>
    %704 = vector.extract_strided_slice %668 {offsets = [16, 0], sizes = [16, 32], strides = [1, 1]} : vector<32x32xf32> to vector<16x32xf32>
    %705 = vector.broadcast %703 : vector<16x1xf32> to vector<16x32xf32>
    %706 = arith.mulf %704, %705 : vector<16x32xf32>
    %cst_183 = arith.constant dense<0.000000e+00> : vector<32xf32>
    %707 = vector.multi_reduction <add>, %706, %cst_183 [0] : vector<16x32xf32> to vector<32xf32>
    %708 = vector.shape_cast %707 : vector<32xf32> to vector<1x32xf32>
    %709 = tpu.concatenate %692, %708 in 0 : vector<1x32xf32>, vector<1x32xf32> -> vector<2x32xf32>
    %c0_184 = arith.constant 0 : index
    %c0_185 = arith.constant 0 : index
    %710 = vector.load %arg29[%c0_184, %c0_185] : memref<32x10xf32, #tpu.memory_space<vmem>>, vector<32x10xf32>
    %cst_186 = arith.constant dense<0.000000e+00> : vector<2x10xf32>
    %711 = tpu.matmul %709, %710, %cst_186 {dimension_numbers = #tpu.dot_dimension_numbers<[1], [0], [0], [1], [0, 0, 1, 1], [], []>} : vector<2x32xf32>, vector<32x10xf32>, vector<2x10xf32> -> vector<2x10xf32>
    %c0_187 = arith.constant 0 : index
    %c0_188 = arith.constant 0 : index
    %712 = vector.load %arg30[%c0_187, %c0_188] : memref<1x10xf32, #tpu.memory_space<vmem>>, vector<1x10xf32>
    %713 = vector.broadcast %712 : vector<1x10xf32> to vector<2x10xf32>
    %714 = arith.addf %711, %713 : vector<2x10xf32>
    %c0_189 = arith.constant 0 : index
    %c0_190 = arith.constant 0 : index
    %715 = vector.load %arg31[%c0_189, %c0_190] : memref<2x10xf32, #tpu.memory_space<vmem>>, vector<2x10xf32>
    tpu.vector_store %arg31[%c0_189, %c0_190], %714 {strides = array<i32>} : memref<2x10xf32, #tpu.memory_space<vmem>>, vector<2x10xf32>,
    return
  }
}

</mosaic_0001>

<bundles_post_ra>
// kernel: cct_forward.1
= control target key start
LH: loop header
LB: loop body
LE: loop exit
PB: predicated region body
PF: predicated region fallthrough
CT: control target
= control target key end

     0   :  { %s6906_s6 = smov 1   ;;  %s6907_s10 = smov 2   ;;  %s7912_s0 = inlined_call_operand.smem [shape: u32[32], index: -1, kind: input, shape index: {}] }
   0x1   :  { %s6964_s5 = sld [smem:[%s7912_s0]]   ;;  %s6908_s14 = smov 3  }
   0x2   :  { %s6969_s9 = sld [smem:[%s7912_s0 + %s6906_s6]]   ;;  %s6909_s18 = smov 4  }
   0x3   :  { %s6974_s13 = sld [smem:[%s7912_s0 + %s6907_s10]]   ;;  %s6910_s22 = smov 5  }
   0x4   :  { %s6979_s17 = sld [smem:[%s7912_s0 + %s6908_s14]]   ;;  %s6911_s26 = smov 6  }
   0x5   :  { %s6984_s21 = sld [smem:[%s7912_s0 + %s6909_s18]]   ;;  %s6912_s30 = smov 7  }
   0x6   :  { %s6989_s25 = sld [smem:[%s7912_s0 + %s6910_s22]]   ;;  %s6913_s4 = smov 8  }
   0x7   :  { %s6994_s29 = sld [smem:[%s7912_s0 + %s6911_s26]]   ;;  %s6914_s10 = smov 9  }
   0x8   :  { %s6999_s3 = sld [smem:[%s7912_s0 + %s6912_s30]]   ;;  %s6915_s15 = smov 10  }
   0x9   :  { %s7004_s8 = sld [smem:[%s7912_s0 + %s6913_s4]]   ;;  %s6916_s20 = smov 11  }
   0xa   :  { %s7009_s14 = sld [smem:[%s7912_s0 + %s6914_s10]]   ;;  %s6917_s26 = smov 12  }
   0xb   :  { %s7014_s19 = sld [smem:[%s7912_s0 + %s6915_s15]]   ;;  %s6918_s1 = smov 13  }
   0xc   :  { %s7019_s24 = sld [smem:[%s7912_s0 + %s6916_s20]]   ;;  %s6919_s7 = smov 14  }
   0xd   :  { %s7024_s30 = sld [smem:[%s7912_s0 + %s6917_s26]]   ;;  %s6920_s15 = smov 15  }
   0xe   :  { %s7029_s6 = sld [smem:[%s7912_s0 + %s6918_s1]]   ;;  %s6921_s22 = smov 16  }
   0xf   :  { %s7034_s12 = sld [smem:[%s7912_s0 + %s6919_s7]]   ;;  %s6922_s28 = smov 17  }
  0x10   :  { %s7039_s20 = sld [smem:[%s7912_s0 + %s6920_s15]]   ;;  %s6923_s7 = smov 18  }
  0x11   :  { %s7044_s27 = sld [smem:[%s7912_s0 + %s6921_s22]]   ;;  %s6924_s15 = smov 19  }
  0x12   :  { %s7049_s4 = sld [smem:[%s7912_s0 + %s6922_s28]]   ;;  %s6925_s22 = smov 20  }
  0x13   :  { %s6926_s28 = smov 21   ;;  %s6934_s1 = smov 29  }
  0x14   :  { %s6935_s10 = smov 30   ;;  %s6936_s16 = smov 31  }
  0x15   :  { %7917 = sst [smem:[#allocation6_spill]] %s7034_s12 }
  0x16   :  { %7918 = sst [smem:[#allocation7_spill]] %s7039_s20 }
  0x17   :  { %7919 = sst [smem:[#allocation8_spill]] %s7044_s27 }
  0x18   :  { %7920 = sst [smem:[#allocation9_spill]] %s7049_s4 }
  0x19   :  { %s7054_s12 = sld [smem:[%s7912_s0 + %s6923_s7]]   ;;  %s6927_s7 = smov 22  }
  0x1a   :  { %s7059_s20 = sld [smem:[%s7912_s0 + %s6924_s15]]   ;;  %s6928_s15 = smov 23  }
  0x1b   :  { %s7064_s27 = sld [smem:[%s7912_s0 + %s6925_s22]]   ;;  %s6929_s22 = smov 24  }
  0x1c   :  { %s7069_s4 = sld [smem:[%s7912_s0 + %s6926_s28]]   ;;  %s6930_s28 = smov 25  }
  0x1f   :  { %7921 = sst [smem:[#allocation10_spill]] %s7054_s12 }
  0x20   :  { %7922 = sst [smem:[#allocation11_spill]] %s7059_s20 }
  0x21   :  { %7923 = sst [smem:[#allocation12_spill]] %s7064_s27 }
  0x22   :  { %7924 = sst [smem:[#allocation13_spill]] %s7069_s4 }
  0x23   :  { %s7074_s12 = sld [smem:[%s7912_s0 + %s6927_s7]]   ;;  %s6931_s7 = smov 26  }
  0x24   :  { %s7079_s20 = sld [smem:[%s7912_s0 + %s6928_s15]]   ;;  %s6932_s15 = smov 27  }
  0x25   :  { %s7084_s27 = sld [smem:[%s7912_s0 + %s6929_s22]]   ;;  %s6933_s22 = smov 28  }
  0x26   :  { %s7089_s4 = sld [smem:[%s7912_s0 + %s6930_s28]]  }
  0x29   :  { %7925 = sst [smem:[#allocation14_spill]] %s7074_s12 }
  0x2a   :  { %7926 = sst [smem:[#allocation15_spill]] %s7079_s20 }
  0x2b   :  { %7927 = sst [smem:[#allocation16_spill]] %s7084_s27 }
  0x2c   :  { %7928 = sst [smem:[#allocation17_spill]] %s7089_s4 }
  0x2d   :  { %s7094_s12 = sld [smem:[%s7912_s0 + %s6931_s7]]  }
  0x2e   :  { %s7099_s20 = sld [smem:[%s7912_s0 + %s6932_s15]]  }
  0x2f   :  { %s5428_s27 = sld [smem:[%s7912_s0 + %s6933_s22]]  }
  0x30   :  { %s7107_s4 = sld [smem:[%s7912_s0 + %s6934_s1]]  }
  0x33   :  { %7929 = sst [smem:[#allocation18_spill]] %s7094_s12 }
  0x34   :  { %7930 = sst [smem:[#allocation19_spill]] %s7099_s20 }
  0x35   :  { %s7112_s12 = sld [smem:[%s7912_s0 + %s6935_s10]]   ;;  %v68_v0 = vstv %s5428_s27 }
  0x36   :  { %s7117_s20 = sld [smem:[%s7912_s0 + %s6936_s16]]   ;;  %69 = vst [vmem:[#allocation2] sm:$0x1] %v68_v0 }
  0x37   :  { %v149_v1 = vld [vmem:[%s6969_s9] sm:$0xff]  ;;  %v150_v2 = vld [vmem:[%s6969_s9 + $0x8] sm:$0xff]  ;;  %v151_v3 = vld [vmem:[%s6969_s9 + $0x10] sm:$0xff]  ;;  %vm154_vm0 = vcmask 293888   ;;  %vm203_vm1 = vcmask 1043456  }
  0x38   :  { %v6220_v4 = vpack.c.bf16 %v150_v2, %v149_v1  ;;  %v152_v5 = vld [vmem:[%s6969_s9 + $0x18] sm:$0xff]  ;;  %v133_v6 = vld [vmem:[%s6964_s5] sm:$0xff] }
  0x39   :  { %v6224_v7 = vpack.c.bf16 %v152_v5, %v151_v3  ;;  %5833 = vmatprep.mubr.msk.f32.mxu0 %vm154_vm0, %v133_v6  ;;  %v153_v8 = vld [vmem:[%s6969_s9 + $0x20] sm:$0xf] }
  0x3a   :  { %6221 = vmatprep.subr.bf16.mxu0 %v6220_v4 }
  0x3b   :  { %6223 = vmatpush3.bf16.msra.mxu0 %v6220_v4 }
  0x3c   :  { %6225 = vmatprep.subr.bf16.mxu0 %v6224_v7 }
  0x3d   :  { %70 = vsyncpa [#allocation4], 0  ;;  %v134_v9 = vld [vmem:[%s6964_s5 + $0x8] sm:$0xff]  ;;  %v135_v10 = vld [vmem:[%s6964_s5 + $0x10] sm:$0xff]  ;;  %vm383_vm2 = vcmask 1040384   ;;  %vm385_vm3 = vcmask 1041408  }
  0x3e   :  { %v136_v11 = vld [vmem:[%s6964_s5 + $0x18] sm:$0xff]  ;;  %v137_v12 = vld [vmem:[%s6964_s5 + $0x20] sm:$0xff]  ;;  %v138_v13 = vld [vmem:[%s6964_s5 + $0x28] sm:$0xff]  ;;  %vm387_vm4 = vcmask 1042432   ;;  %vm554_vm5 = vcmask 261120   ;;  %vm731_vm6 = vcmask 64512  }
  0x3f   :  { %6227 = vmatpush3.bf16.msra.mxu0 %v6224_v7  ;;  %v139_v14 = vld [vmem:[%s6964_s5 + $0x30] sm:$0xff]  ;;  %v140_v15 = vld [vmem:[%s6964_s5 + $0x38] sm:$0xff]  ;;  %v141_v16 = vld [vmem:[%s6964_s5 + $0x40] sm:$0xff]  ;;  %s6937_s0 = smov 96   ;;  %s6939_s9 = smov 120   ;;  %vm817_vm8 = vcmask 130048  }
  0x40   :  { %5831 = vmatprep.subr.msk.mxu0 %vm203_vm1, %v153_v8  ;;  %v142_v17 = vld [vmem:[%s6964_s5 + $0x48] sm:$0xff]  ;;  %v143_v18 = vld [vmem:[%s6964_s5 + $0x50] sm:$0xff]  ;;  %v144_v19 = vld [vmem:[%s6964_s5 + $0x58] sm:$0xff]  ;;  %s6944_s27 = smov 48   ;;  %s6945_s22 = smov 104   ;;  %vm1561_vm9 = vcmask 195584  }
  0x41   :  { %v145_v20 = vld [vmem:[%s6964_s5 + $0x60] sm:$0xff]  ;;  %v146_v21 = vld [vmem:[%s6964_s5 + $0x68] sm:$0xff]  ;;  %v147_v22 = vld [vmem:[%s6964_s5 + $0x70] sm:$0xff]  ;;  %s6946_s23 = smov 72   ;;  %s6947_s26 = smov 40   ;;  %vm2702_vm10 = vcmask 523264  }
  0x42   :  { %v148_v23 = vld [vmem:[%s6964_s5 + $0x78] sm:$0xff]  ;;  %s6938_s5 = smov 88   ;;  %vm7242_vm7 = vmpackc.low %vm731_vm6, %vm731_vm6  ;;  %s6948_s1 = smov 8   ;;  %vm5203_vm11 = vcmask 7168   ;;  %vm6953_vm12 = vmmov 0   ;;  %vm5385_vm13 = vcmask 74752  }
  0x43   :  { %5832 = vmatpush3.msk.msra.mxu0 %vm203_vm1, %v153_v8  ;;  %s6949_s28 = smov 16   ;;  %s6950_s2 = smov 24  }
  0x44   :  { %5834 = vmatmul.mubr.msk.f32.vlgmr.msra.gmra.mrb[0].mxu0 %vm154_vm0, %v134_v9  ;;  %s7941_s10 = sld [smem:[#allocation15_spill]]  ;;  %s7942_s7 = sld [smem:[#allocation14_spill]] }
  0x45   :  { %5836 = vmatprep.mubr.msk.f32.mxu0 %vm154_vm0, %v135_v10  ;;  %s7943_s11 = sld [smem:[#allocation16_spill]]  ;;  %s7944_s16 = sld [smem:[#allocation17_spill]] }
  0x46   :  { %s7945_s15 = sld [smem:[#allocation18_spill]]  ;;  %s7946_s18 = sld [smem:[#allocation19_spill]] }
  0x48   :  { %5837 = vmatmul.mubr.msk.f32.gmra.mrb[2].mxu0 %vm154_vm0, %v136_v11 }
  0x49   :  { %5839 = vmatprep.mubr.msk.f32.mxu0 %vm154_vm0, %v137_v12 }
  0x4c   :  { %5840 = vmatmul.mubr.msk.f32.gmra.mrb[4].mxu0 %vm154_vm0, %v138_v13 }
  0x4d   :  { %5842 = vmatprep.mubr.msk.f32.mxu0 %vm154_vm0, %v139_v14 }
  0x50   :  { %5843 = vmatmul.mubr.msk.f32.gmra.mrb[6].mxu0 %vm154_vm0, %v140_v15 }
  0x51   :  { %5845 = vmatprep.mubr.msk.f32.mxu0 %vm154_vm0, %v141_v16 }
  0x54   :  { %5846 = vmatmul.mubr.msk.f32.gmra.mrb[8].mxu0 %vm154_vm0, %v142_v17 }
  0x55   :  { %5848 = vmatprep.mubr.msk.f32.mxu0 %vm154_vm0, %v143_v18 }
  0x58   :  { %5849 = vmatmul.mubr.msk.f32.gmra.mrb[10].mxu0 %vm154_vm0, %v144_v19 }
  0x59   :  { %5851 = vmatprep.mubr.msk.f32.mxu0 %vm154_vm0, %v145_v20 }
  0x5c   :  { %5852 = vmatmul.mubr.msk.f32.gmra.mrb[12].mxu0 %vm154_vm0, %v146_v21 }
  0x5d   :  { %5854 = vmatprep.mubr.msk.f32.mxu0 %vm154_vm0, %v147_v22 }
  0x60   :  { %5855 = vmatmul.mubr.msk.f32.gmra.mrb[14].mxu0 %vm154_vm0, %v148_v23  ;;  %v368_v23 = vld [vmem:[%s6974_s13] sm:$0xff] }
 0x117   :  { %v5835_v24 = vpop.f32.mrb[0].mxu0 }
 0x118   :  { %v353_v25 = vmax.f32 %v5835_v24, 0.0  ;;  %v273_v26 = vpop.f32.mrb[1].mxu0 }
 0x119   :  { %v352_v27 = vmax.f32 %v273_v26, 0.0 }
 0x11b   :  { %v370_v28 = vmax.f32 %v352_v27, %v353_v25  ;;  %v5838_v29 = vpop.f32.mrb[2].mxu0 }
 0x11c   :  { %v283_v30 = vpop.f32.mrb[3].mxu0  ;;  %v355_v34 = vmax.f32 %v5838_v29, 0.0 }
 0x11d   :  { %v372_v31 = vrot.slane %v370_v28, 1  ;;  %v354_v32 = vmax.f32 %v283_v30, 0.0  ;;  %v375_v38 = vrot.slane %v370_v28, 2 }
 0x11f   :  { %v374_v33 = vmax.f32 %v370_v28, %v372_v31  ;;  %v389_v35 = vmax.f32 %v353_v25, %v354_v32  ;;  %v5841_v36 = vpop.f32.mrb[4].mxu0 }
 0x120   :  { %v293_v37 = vpop.f32.mrb[5].mxu0  ;;  %v357_v44 = vmax.f32 %v5841_v36, 0.0 }
 0x121   :  { %v390_v39 = vmax.f32 %v389_v35, %v355_v34  ;;  %v356_v40 = vmax.f32 %v293_v37, 0.0  ;;  %v377_v41 = vmax.f32 %v374_v33, %v375_v38 }
 0x123   :  { %v392_v42 = vrot.slane %v390_v39, 1  ;;  %v5844_v43 = vpop.f32.mrb[6].mxu0  ;;  %v406_v45 = vmax.f32 %v355_v34, %v356_v40  ;;  %v395_v48 = vrot.slane %v390_v39, 2  ;;  %v379_v51 = vrot.slane %v377_v41, 1 }
 0x124   :  { %v303_v46 = vpop.f32.mrb[7].mxu0  ;;  %v359_v53 = vmax.f32 %v5844_v43, 0.0  ;;  %v384_v56 = vsel %vm383_vm2, %v374_v33, %v377_v41  ;;  %v381_v2 = vrot.slane %v377_v41, 2 }
 0x125   :  { %v394_v47 = vmax.f32 %v390_v39, %v392_v42  ;;  %v358_v49 = vmax.f32 %v303_v46, 0.0  ;;  %v407_v50 = vmax.f32 %v406_v45, %v357_v44  ;;  %v386_v7 = vsel %vm385_vm3, %v384_v56, %v379_v51 }
 0x126   :  { %v388_v18 = vsel %vm387_vm4, %v386_v7, %v381_v2 }
 0x127   :  { %v397_v52 = vmax.f32 %v394_v47, %v395_v48  ;;  %v423_v54 = vmax.f32 %v357_v44, %v358_v49  ;;  %v5847_v55 = vpop.f32.mrb[8].mxu0  ;;  %v409_v57 = vrot.slane %v407_v50, 1  ;;  %v412_v1 = vrot.slane %v407_v50, 2 }
 0x128   :  { %v361_v58 = vmax.f32 %v5847_v55, 0.0  ;;  %v313_v59 = vpop.f32.mrb[9].mxu0 }
 0x129   :  { %v399_v60 = vrot.slane %v397_v52, 1  ;;  %v403_v61 = vsel %vm383_vm2, %v394_v47, %v397_v52  ;;  %v424_v62 = vmax.f32 %v423_v54, %v359_v53  ;;  %v360_v63 = vmax.f32 %v313_v59, 0.0 }
 0x12a   :  { %v411_v0 = vmax.f32 %v407_v50, %v409_v57  ;;  %v401_v3 = vrot.slane %v397_v52, 2  ;;  %v369_v50 = vld [vmem:[%s6974_s13 + $0x8] sm:$0xff]  ;;  %s6940_s13 = smov 64  }
 0x12b   :  { %v426_v4 = vrot.slane %v424_v62, 1  ;;  %v450_v5 = vmax.f32 %v360_v63, %v361_v58  ;;  %v5850_v6 = vpop.f32.mrb[10].mxu0  ;;  %v404_v8 = vsel %vm385_vm3, %v403_v61, %v399_v60  ;;  %v429_v10 = vrot.slane %v424_v62, 2 }
 0x12c   :  { %v414_v9 = vmax.f32 %v411_v0, %v412_v1  ;;  %v363_v11 = vmax.f32 %v5850_v6, 0.0  ;;  %v323_v12 = vpop.f32.mrb[11].mxu0  ;;  %v405_v13 = vsel %vm387_vm4, %v404_v8, %v401_v3 }
 0x12d   :  { %v428_v14 = vmax.f32 %v424_v62, %v426_v4  ;;  %v452_v15 = vrot.slane %v450_v5, 1  ;;  %v455_v16 = vrot.slane %v450_v5, 2  ;;  %v362_v17 = vmax.f32 %v323_v12, 0.0 }
 0x12e   :  { %v441_v19 = vrot.slane %v405_v13, 4  ;;  %v416_v24 = vrot.slane %v414_v9, 1  ;;  %v420_v27 = vsel %vm383_vm2, %v411_v0, %v414_v9  ;;  %v418_v34 = vrot.slane %v414_v9, 2 }
 0x12f   :  { %v431_v20 = vmax.f32 %v428_v14, %v429_v10  ;;  %v454_v21 = vmax.f32 %v450_v5, %v452_v15  ;;  %v466_v22 = vmax.f32 %v361_v58, %v362_v17  ;;  %v5853_v25 = vpop.f32.mrb[12].mxu0 }
 0x130   :  { %v446_v26 = vsel %vm203_vm1, %v388_v18, %v441_v19  ;;  %v333_v28 = vpop.f32.mrb[13].mxu0  ;;  %v421_v39 = vsel %vm385_vm3, %v420_v27, %v416_v24  ;;  %v365_v40 = vmax.f32 %v5853_v25, 0.0 }
 0x131   :  { %v433_v29 = vrot.slane %v431_v20, 1  ;;  %v437_v30 = vsel %vm383_vm2, %v428_v14, %v431_v20  ;;  %v457_v31 = vmax.f32 %v454_v21, %v455_v16  ;;  %v467_v32 = vmax.f32 %v466_v22, %v363_v11 }
 0x132   :  { %v7168_v33 = vadd.f32 %v446_v26, %v368_v23  ;;  %v435_v35 = vrot.slane %v431_v20, 2  ;;  %v364_v36 = vmax.f32 %v333_v28, 0.0  ;;  %v422_v56 = vsel %vm387_vm4, %v421_v39, %v418_v34 }
 0x133   :  { %v469_v37 = vrot.slane %v467_v32, 1  ;;  %v472_v38 = vrot.slane %v467_v32, 2  ;;  %v5856_v41 = vpop.f32.mrb[14].mxu0  ;;  %v459_v42 = vrot.slane %v457_v31, 1  ;;  %v438_v44 = vsel %vm385_vm3, %v437_v30, %v433_v29 }
 0x134   :  { %v555_v43 = vsel %vm554_vm5, %v7168_v33, 0.0  ;;  %v483_v45 = vmax.f32 %v363_v11, %v364_v36  ;;  %v343_v46 = vpop.f32.mrb[15].mxu0  ;;  %v463_v47 = vsel %vm383_vm2, %v454_v21, %v457_v31  ;;  %v439_v49 = vsel %vm387_vm4, %v438_v44, %v435_v35 }
 0x135   :  { %v471_v48 = vmax.f32 %v467_v32, %v469_v37  ;;  %556 = vadd.xlane.f32.xlu0 %v555_v43  ;;  %v444_v51 = vrot.slane %v439_v49, 4  ;;  %v367_v53 = vmax.f32 %v5856_v41, 0.0  ;;  %v366_v54 = vmax.f32 %v343_v46, 0.0  ;;  %v530_v49 = vld [vmem:[%s6989_s25 + $0x8] sm:$0xff] }
 0x136   :  { %v484_v52 = vmax.f32 %v483_v45, %v365_v40  ;;  %v461_v58 = vrot.slane %v457_v31, 2  ;;  %v464_v59 = vsel %vm385_vm3, %v463_v47, %v459_v42 }
 0x137   :  { %v474_v55 = vmax.f32 %v471_v48, %v472_v38  ;;  %v447_v57 = vsel %vm203_vm1, %v422_v56, %v444_v51  ;;  %v500_v60 = vmax.f32 %v365_v40, %v366_v54  ;;  %v531_v51 = vld [vmem:[%s6989_s25 + $0x10] sm:$0xff] }
 0x138   :  { %v7181_v63 = vadd.f32 %v447_v57, %v369_v50  ;;  %v465_v4 = vsel %vm387_vm4, %v464_v59, %v461_v58  ;;  %v486_v11 = vrot.slane %v484_v52, 1  ;;  %v489_v15 = vrot.slane %v484_v52, 2 }
 0x139   :  { %v476_v61 = vrot.slane %v474_v55, 1  ;;  %v480_v62 = vsel %vm383_vm2, %v471_v48, %v474_v55  ;;  %v478_v0 = vrot.slane %v474_v55, 2  ;;  %v501_v1 = vmax.f32 %v500_v60, %v367_v53  ;;  %v529_v48 = vld [vmem:[%s6989_s25] sm:$0xff] }
 0x13a   :  { %v558_v2 = vsel %vm554_vm5, %v7181_v63, 0.0  ;;  %v488_v14 = vmax.f32 %v484_v52, %v486_v11  ;;  %v532_v52 = vld [vmem:[%s6989_s25 + $0x18] sm:$0xff]  ;;  %s6943_s25 = smov 80  }
 0x13b   :  { %v481_v3 = vsel %vm385_vm3, %v480_v62, %v476_v61  ;;  %559 = vadd.xlane.f32.xlu0 %v558_v2  ;;  %v503_v7 = vrot.slane %v501_v1, 1  ;;  %v506_v13 = vrot.slane %v501_v1, 2  ;;  %v6232_v53 = vpack.c.bf16 %v532_v52, %v531_v51 }
 0x13c   :  { %v482_v5 = vsel %vm387_vm4, %v481_v3, %v478_v0  ;;  %v491_v17 = vmax.f32 %v488_v14, %v489_v15  ;;  %v5449_v3 = vld [vmem:[%s6979_s17] ss:$0 sm:$0xff]  ;;  %s6941_s17 = smov 56  }
 0x13d   :  { %v518_v6 = vrot.slane %v482_v5, 4  ;;  %v505_v12 = vmax.f32 %v501_v1, %v503_v7  ;;  %v5450_v7 = vld [vmem:[%s6984_s21] ss:$0 sm:$0xff]  ;;  %s6942_s21 = smov 112  }
 0x13e   :  { %v493_v21 = vrot.slane %v491_v17, 1  ;;  %v497_v24 = vsel %vm383_vm2, %v488_v14, %v491_v17 }
 0x13f   :  { %v523_v8 = vsel %vm203_vm1, %v465_v4, %v518_v6  ;;  %v508_v16 = vmax.f32 %v505_v12, %v506_v13 }
 0x140   :  { %v7189_v9 = vadd.f32 %v523_v8, %v368_v23  ;;  %v495_v23 = vrot.slane %v491_v17, 2  ;;  %v498_v26 = vsel %vm385_vm3, %v497_v24, %v493_v21 }
 0x141   :  { %v510_v18 = vrot.slane %v508_v16, 1  ;;  %v514_v19 = vsel %vm383_vm2, %v505_v12, %v508_v16  ;;  %v512_v20 = vrot.slane %v508_v16, 2 }
 0x142   :  { %v561_v10 = vsel %vm554_vm5, %v7189_v9, 0.0  ;;  %v499_v28 = vsel %vm387_vm4, %v498_v26, %v495_v23 }
 0x143   :  { %562 = vadd.xlane.f32.xlu0 %v561_v10  ;;  %v515_v22 = vsel %vm385_vm3, %v514_v19, %v510_v18 }
 0x144   :  { %v516_v25 = vsel %vm387_vm4, %v515_v22, %v512_v20 }
 0x145   :  { %v521_v27 = vrot.slane %v516_v25, 4 }
 0x147   :  { %v524_v29 = vsel %vm203_vm1, %v499_v28, %v521_v27 }
 0x148   :  { %v7200_v30 = vadd.f32 %v524_v29, %v369_v50  ;;  %v6228_v50 = vpack.c.bf16 %v530_v49, %v529_v48 }
 0x14a   :  { %v564_v44 = vsel %vm554_vm5, %v7200_v30, 0.0  ;;  %6229 = vmatprep.subr.bf16.mxu1 %v6228_v50 }
 0x14b   :  { %6231 = vmatpush3.bf16.msra.mxu1 %v6228_v50 }
 0x14c   :  { %6233 = vmatprep.subr.bf16.mxu1 %v6232_v53 }
 0x14f   :  { %6235 = vmatpush3.bf16.msra.mxu1 %v6232_v53 }
 0x1c2   :  { %v557_v31 = vpop.xlane.xlu0 %556 }
 0x1c3   :  { %v568_v32 = vmul.f32 0.03125, %v557_v31 }
 0x1c5   :  { %v572_v34 = vsub.f32 %v7168_v33, %v568_v32 }
 0x1c7   :  { %v576_v35 = vmul.f32 %v572_v34, %v572_v34 }
 0x1c8   :  { %v560_v37 = vpop.xlane.xlu0 %559 }
 0x1c9   :  { %v580_v36 = vsel %vm554_vm5, %v576_v35, 0.0  ;;  %v569_v38 = vmul.f32 0.03125, %v560_v37 }
 0x1ca   :  { %581 = vadd.xlane.f32.xlu1 %v580_v36 }
 0x1cb   :  { %v573_v39 = vsub.f32 %v7181_v63, %v569_v38 }
 0x1cd   :  { %v577_v40 = vmul.f32 %v573_v39, %v573_v39 }
 0x1cf   :  { %v583_v41 = vsel %vm554_vm5, %v577_v40, 0.0 }
 0x1d0   :  { %v563_v42 = vpop.xlane.xlu0 %562  ;;  %584 = vadd.xlane.f32.xlu1 %v583_v41 }
 0x1d1   :  { %v570_v43 = vmul.f32 0.03125, %v563_v42 }
 0x1d3   :  { %v574_v45 = vsub.f32 %v7189_v9, %v570_v43 }
 0x1d4   :  { %565 = vadd.xlane.f32.xlu1 %v564_v44 }
 0x1d5   :  { %v578_v46 = vmul.f32 %v574_v45, %v574_v45 }
 0x1d7   :  { %v586_v47 = vsel %vm554_vm5, %v578_v46, 0.0 }
 0x1d8   :  { %587 = vadd.xlane.f32.xlu0 %v586_v47 }
 0x257   :  { %v582_v54 = vpop.xlane.xlu1 %581 }
 0x258   :  { %v592_v55 = vmul.f32 0.03125, %v582_v54 }
 0x25a   :  { %v596_v56 = vadd.f32 1e-05, %v592_v55 }
 0x25c   :  { %6686 = vrsqrt.f32 %v596_v56 }
 0x25d   :  { %v585_v57 = vpop.xlane.xlu1 %584 }
 0x25e   :  { %v593_v58 = vmul.f32 0.03125, %v585_v57 }
 0x260   :  { %v597_v59 = vadd.f32 1e-05, %v593_v58 }
 0x261   :  { %v566_v60 = vpop.xlane.xlu1 %565 }
 0x262   :  { %6688 = vrsqrt.f32 %v597_v59  ;;  %v571_v61 = vmul.f32 0.03125, %v566_v60 }
 0x264   :  { %v575_v62 = vsub.f32 %v7200_v30, %v571_v61 }
 0x265   :  { %v588_v0 = vpop.xlane.xlu0 %587 }
 0x266   :  { %v6687_v1 = vpop.eup %6686  ;;  %v594_v2 = vmul.f32 0.03125, %v588_v0  ;;  %v579_v4 = vmul.f32 %v575_v62, %v575_v62 }
 0x267   :  { %v604_v5 = vmul.f32 %v6687_v1, %v572_v34 }
 0x268   :  { %v598_v6 = vadd.f32 1e-05, %v594_v2  ;;  %v589_v8 = vsel %vm554_vm5, %v579_v4, 0.0 }
 0x269   :  { %v614_v10 = vmul.f32 %v5449_v3, %v604_v5  ;;  %590 = vadd.xlane.f32.xlu1 %v589_v8 }
 0x26a   :  { %6690 = vrsqrt.f32 %v598_v6 }
 0x26b   :  { %v624_v11 = vadd.f32 %v5450_v7, %v614_v10 }
 0x26c   :  { %v6689_v12 = vpop.eup %6688 }
 0x26d   :  { %5865 = vmatprep.mubr.msk.f32.mxu1 %vm554_vm5, %v624_v11  ;;  %v605_v13 = vmul.f32 %v6689_v12, %v573_v39 }
 0x26f   :  { %v615_v14 = vmul.f32 %v5449_v3, %v605_v13 }
 0x271   :  { %v625_v15 = vadd.f32 %v5450_v7, %v615_v14 }
 0x273   :  { %5866 = vmatmul.mubr.msk.f32.vlgmr.msra.gmra.mrb[0].mxu1 %vm554_vm5, %v625_v15 }
 0x274   :  { %v6691_v16 = vpop.eup %6690 }
 0x275   :  { %v606_v17 = vmul.f32 %v6691_v16, %v574_v45 }
 0x277   :  { %v616_v18 = vmul.f32 %v5449_v3, %v606_v17 }
 0x279   :  { %v626_v19 = vadd.f32 %v5450_v7, %v616_v18 }
 0x27b   :  { %5868 = vmatprep.mubr.msk.f32.mxu1 %vm554_vm5, %v626_v19 }
 0x2f6   :  { %v591_v20 = vpop.xlane.xlu1 %590 }
 0x2f7   :  { %v595_v21 = vmul.f32 0.03125, %v591_v20 }
 0x2f9   :  { %v599_v22 = vadd.f32 1e-05, %v595_v21 }
 0x2fb   :  { %6692 = vrsqrt.f32 %v599_v22 }
 0x305   :  { %v6693_v23 = vpop.eup %6692 }
 0x306   :  { %v607_v24 = vmul.f32 %v6693_v23, %v575_v62 }
 0x308   :  { %v617_v25 = vmul.f32 %v5449_v3, %v607_v24 }
 0x30a   :  { %v627_v26 = vadd.f32 %v5450_v7, %v617_v25 }
 0x30c   :  { %5869 = vmatmul.mubr.msk.f32.gmra.mrb[2].mxu1 %vm554_vm5, %v627_v26 }
 0x346   :  { %v7222_v27 = vpop.f32.mrb[0].mxu1 }
 0x347   :  { %v7224_v28 = vpop.f32.mrb[1].mxu1 }
 0x348   :  { %5875 = vmatprep.mubr.msk.f32.mxu1 %vm731_vm6, %v7224_v28  ;;  %v7230_v29 = vpack.i.bf16 %v7222_v27, %v7224_v28 }
 0x34a   :  { %6525 = vrot.lane.b32.xlu0 %v7230_v29, %s6937_s0 }
 0x34e   :  { %6535 = vrot.lane.b32.xlu0 %v7230_v29, %s6938_s5 }
 0x352   :  { %927 = vrot.lane.b32.xlu0 %v7224_v28, %s6939_s9 }
 0x356   :  { %929 = vrot.lane.b32.xlu0 %v7222_v27, %s6939_s9 }
 0x3bc   :  { %v6526_v31 = vpop.permute.xlu0 %6525 }
 0x3bd   :  { %v6528_v32 = vunpack.i.h.bf16 %v6526_v31  ;;  %v6527_v34 = vunpack.i.l.bf16 %v6526_v31 }
 0x3bf   :  { %v6236_v36 = vpack.c.bf16 %v6528_v32, %v6527_v34 }
 0x3c0   :  { %v6536_v58 = vpop.permute.xlu0 %6535 }
 0x3c1   :  { %6238 = vmatprep.subr.msk.bf16.mxu1 %vm7242_vm7, %v6236_v36  ;;  %v6538_v60 = vunpack.i.h.bf16 %v6536_v58  ;;  %v6537_v61 = vunpack.i.l.bf16 %v6536_v58 }
 0x3c2   :  { %6241 = vmatpush3.bf16.xpose.msk.msra.mxu1 %vm7242_vm7, %v6236_v36 }
 0x3c3   :  { %v6246_v2 = vpack.c.bf16 %v6538_v60, %v6537_v61 }
 0x3c4   :  { %v928_v7 = vpop.permute.xlu0 %927 }
 0x3c8   :  { %v930_v8 = vpop.permute.xlu0 %929 }
 0x3c9   :  { %5876 = vmatmul.mubr.msk.f32.vlgmr.msra.gmra.mrb[4].mxu1 %vm731_vm6, %v7222_v27 }
 0x3df   :  { %v7252_v37 = vpop.f32.mrb[2].mxu1 }
 0x3e0   :  { %v7254_v38 = vpop.f32.mrb[3].mxu1 }
 0x3e1   :  { %v7258_v39 = vpack.i.bf16 %v7252_v37, %v7254_v38 }
 0x49c   :  { %v5877_v40 = vpop.f32.mrb[4].mxu1 }
 0x49d   :  { %v806_v41 = vpop.f32.mrb[5].mxu1  ;;  %v816_v43 = vmul.f32 0.35355338, %v5877_v40 }
 0x49e   :  { %v815_v42 = vmul.f32 0.35355338, %v806_v41 }
 0x49f   :  { %v821_v45 = vsel %vm817_vm8, %v816_v43, -inf }
 0x4a0   :  { %v818_v44 = vsel %vm817_vm8, %v815_v42, -inf }
 0x4a1   :  { %819 = vmax.xlane.f32.xlu1 %v818_v44 }
 0x4a5   :  { %822 = vmax.xlane.f32.xlu1 %v821_v45 }
 0x52e   :  { %v820_v46 = vpop.xlane.xlu1 %819 }
 0x52f   :  { %v824_v47 = vsub.f32 %v815_v42, %v820_v46 }
 0x531   :  { %v826_v50 = vmul.f32 1.442695, %v824_v47 }
 0x532   :  { %v823_v48 = vpop.xlane.xlu1 %822 }
 0x533   :  { %v825_v49 = vsub.f32 %v816_v43, %v823_v48 }
 0x535   :  { %v828_v51 = vmul.f32 1.442695, %v825_v49 }
 0x537   :  { %6694 = vpow2.f32 %v828_v51 }
 0x538   :  { %6696 = vpow2.f32 %v826_v50 }
 0x541   :  { %v6695_v52 = vpop.eup %6694 }
 0x542   :  { %v833_v53 = vsel %vm817_vm8, %v6695_v52, 0.0  ;;  %v6697_v54 = vpop.eup %6696 }
 0x543   :  { %834 = vadd.xlane.f32.xlu1 %v833_v53  ;;  %v830_v55 = vsel %vm817_vm8, %v6697_v54, 0.0 }
 0x547   :  { %831 = vadd.xlane.f32.xlu1 %v830_v55 }
 0x558   :  { %6530 = vrot.lane.b32.xlu1 %v7230_v29, %s6940_s13 }
 0x5d0   :  { %v835_v56 = vpop.xlane.xlu1 %834 }
 0x5d1   :  { %6698 = vrcp.f32 %v835_v56 }
 0x5d4   :  { %v832_v57 = vpop.xlane.xlu1 %831 }
 0x5d5   :  { %6700 = vrcp.f32 %v832_v57 }
 0x5d8   :  { %v6531_v59 = vpop.permute.xlu1 %6530 }
 0x5d9   :  { %v6533_v62 = vunpack.i.h.bf16 %v6531_v59  ;;  %v6532_v0 = vunpack.i.l.bf16 %v6531_v59 }
 0x5db   :  { %v6242_v1 = vpack.c.bf16 %v6533_v62, %v6532_v0  ;;  %v6699_v3 = vpop.eup %6698 }
 0x5dc   :  { %v839_v6 = vmul.f32 %v6699_v3, %v6695_v52 }
 0x5dd   :  { %6243 = vmatprep.subr.bf16.mxu1 %v6242_v1 }
 0x5de   :  { %6245 = vmatpush3.bf16.msra.mxu1 %v6242_v1 }
 0x5df   :  { %v6701_v4 = vpop.eup %6700  ;;  %6248 = vmatprep.subr.msk.bf16.mxu1 %vm7242_vm7, %v6246_v2 }
 0x5e0   :  { %v838_v5 = vmul.f32 %v6701_v4, %v6697_v54 }
 0x5e2   :  { %5882 = vmatprep.mubr.msk.f32.mxu1 %vm817_vm8, %v838_v5 }
 0x5e3   :  { %5883 = vmatmul.mubr.msk.f32.vlgmr.msra.gmra.mrb[6].mxu1 %vm817_vm8, %v839_v6 }
 0x5e4   :  { %5889 = vmatprep.mubr.msk.f32.mxu1 %vm731_vm6, %v928_v7 }
 0x5e7   :  { %6251 = vmatpush3.bf16.xpose.msk.msra.mxu1 %vm7242_vm7, %v6246_v2 }
 0x5ee   :  { %5890 = vmatmul.mubr.msk.f32.vlgmr.msra.gmra.mrb[8].mxu1 %vm731_vm6, %v930_v8 }
 0x6b6   :  { %v7274_v10 = vpop.f32.mrb[6].mxu1 }
 0x6b7   :  { %v7276_v11 = vpop.f32.mrb[7].mxu1 }
 0x6c1   :  { %v5891_v12 = vpop.f32.mrb[8].mxu1 }
 0x6c2   :  { %v1019_v13 = vmul.f32 0.35355338, %v5891_v12  ;;  %v1009_v14 = vpop.f32.mrb[9].mxu1 }
 0x6c3   :  { %v1018_v15 = vmul.f32 0.35355338, %v1009_v14 }
 0x6c4   :  { %v1023_v16 = vsel %vm817_vm8, %v1019_v13, -inf }
 0x6c5   :  { %1024 = vmax.xlane.f32.xlu0 %v1023_v16  ;;  %v1020_v17 = vsel %vm817_vm8, %v1018_v15, -inf }
 0x6c6   :  { %1021 = vmax.xlane.f32.xlu1 %v1020_v17 }
 0x6d7   :  { %6540 = vrot.lane.b32.xlu1 %v7230_v29, %s6941_s17 }
 0x6db   :  { %1129 = vrot.lane.b32.xlu1 %v7224_v28, %s6942_s21 }
 0x6df   :  { %1131 = vrot.lane.b32.xlu1 %v7222_v27, %s6942_s21 }
 0x752   :  { %v1025_v18 = vpop.xlane.xlu0 %1024 }
 0x753   :  { %v1027_v19 = vsub.f32 %v1019_v13, %v1025_v18  ;;  %v1022_v20 = vpop.xlane.xlu1 %1021 }
 0x754   :  { %v1026_v21 = vsub.f32 %v1018_v15, %v1022_v20 }
 0x755   :  { %v1030_v22 = vmul.f32 1.442695, %v1027_v19 }
 0x756   :  { %v1028_v23 = vmul.f32 1.442695, %v1026_v21 }
 0x757   :  { %6702 = vpow2.f32 %v1030_v22  ;;  %v6541_v24 = vpop.permute.xlu1 %6540 }
 0x758   :  { %v6543_v25 = vunpack.i.h.bf16 %v6541_v24  ;;  %v6542_v26 = vunpack.i.l.bf16 %v6541_v24  ;;  %6704 = vpow2.f32 %v1028_v23 }
 0x75a   :  { %v6252_v31 = vpack.c.bf16 %v6543_v25, %v6542_v26 }
 0x75b   :  { %v1130_v51 = vpop.permute.xlu1 %1129 }
 0x75c   :  { %6253 = vmatprep.subr.bf16.mxu1 %v6252_v31 }
 0x75d   :  { %6255 = vmatpush3.bf16.msra.mxu1 %v6252_v31 }
 0x75f   :  { %v1132_v52 = vpop.permute.xlu1 %1131 }
 0x761   :  { %v6703_v32 = vpop.eup %6702 }
 0x762   :  { %v1035_v34 = vsel %vm817_vm8, %v6703_v32, 0.0  ;;  %v6705_v36 = vpop.eup %6704 }
 0x763   :  { %1036 = vadd.xlane.f32.xlu0 %v1035_v34  ;;  %v1032_v40 = vsel %vm817_vm8, %v6705_v36, 0.0 }
 0x767   :  { %1033 = vadd.xlane.f32.xlu0 %v1032_v40 }
 0x77d   :  { %6545 = vrot.lane.b32.xlu0 %v7230_v29, %s6943_s25 }
 0x7f0   :  { %v1037_v41 = vpop.xlane.xlu0 %1036 }
 0x7f1   :  { %6706 = vrcp.f32 %v1037_v41 }
 0x7f4   :  { %v1034_v42 = vpop.xlane.xlu0 %1033 }
 0x7f5   :  { %6708 = vrcp.f32 %v1034_v42 }
 0x7f8   :  { %v6546_v43 = vpop.permute.xlu0 %6545 }
 0x7f9   :  { %v6548_v44 = vunpack.i.h.bf16 %v6546_v43  ;;  %v6547_v45 = vunpack.i.l.bf16 %v6546_v43 }
 0x7fb   :  { %v6256_v46 = vpack.c.bf16 %v6548_v44, %v6547_v45  ;;  %v6707_v47 = vpop.eup %6706 }
 0x7fc   :  { %v1041_v50 = vmul.f32 %v6707_v47, %v6703_v32 }
 0x7fd   :  { %6258 = vmatprep.subr.msk.bf16.mxu1 %vm7242_vm7, %v6256_v46 }
 0x7ff   :  { %v6709_v48 = vpop.eup %6708 }
 0x800   :  { %v1040_v49 = vmul.f32 %v6709_v48, %v6705_v36 }
 0x802   :  { %5896 = vmatprep.mubr.msk.f32.mxu1 %vm817_vm8, %v1040_v49 }
 0x803   :  { %5897 = vmatmul.mubr.msk.f32.vlgmr.msra.gmra.mrb[10].mxu1 %vm817_vm8, %v1041_v50 }
 0x804   :  { %6261 = vmatpush3.bf16.xpose.msk.msra.mxu1 %vm7242_vm7, %v6256_v46  ;;  %5903 = vmatprep.mubr.msk.f32.mxu1 %vm731_vm6, %v1130_v51 }
 0x80b   :  { %5904 = vmatmul.mubr.msk.f32.vlgmr.msra.gmra.mrb[12].mxu1 %vm731_vm6, %v1132_v52 }
 0x8d6   :  { %v7298_v53 = vpop.f32.mrb[10].mxu1 }
 0x8d7   :  { %v7300_v54 = vpop.f32.mrb[11].mxu1 }
 0x8de   :  { %v5905_v55 = vpop.f32.mrb[12].mxu1 }
 0x8df   :  { %v1221_v56 = vmul.f32 0.35355338, %v5905_v55  ;;  %v1211_v57 = vpop.f32.mrb[13].mxu1 }
 0x8e0   :  { %v1220_v58 = vmul.f32 0.35355338, %v1211_v57 }
 0x8e1   :  { %v1225_v59 = vsel %vm817_vm8, %v1221_v56, -inf }
 0x8e2   :  { %1226 = vmax.xlane.f32.xlu0 %v1225_v59  ;;  %v1222_v60 = vsel %vm817_vm8, %v1220_v58, -inf }
 0x8e3   :  { %1223 = vmax.xlane.f32.xlu1 %v1222_v60 }
 0x8f4   :  { %6550 = vrot.lane.b32.xlu1 %v7230_v29, %s6944_s27 }
 0x8f8   :  { %1331 = vrot.lane.b32.xlu1 %v7224_v28, %s6945_s22 }
 0x8fc   :  { %1333 = vrot.lane.b32.xlu1 %v7222_v27, %s6945_s22 }
 0x96f   :  { %v1227_v61 = vpop.xlane.xlu0 %1226 }
 0x970   :  { %v1229_v62 = vsub.f32 %v1221_v56, %v1227_v61  ;;  %v1224_v0 = vpop.xlane.xlu1 %1223 }
 0x971   :  { %v1228_v1 = vsub.f32 %v1220_v58, %v1224_v0 }
 0x972   :  { %v1232_v2 = vmul.f32 1.442695, %v1229_v62 }
 0x973   :  { %v1230_v3 = vmul.f32 1.442695, %v1228_v1 }
 0x974   :  { %6710 = vpow2.f32 %v1232_v2  ;;  %v6551_v4 = vpop.permute.xlu1 %6550 }
 0x975   :  { %v6553_v5 = vunpack.i.h.bf16 %v6551_v4  ;;  %v6552_v6 = vunpack.i.l.bf16 %v6551_v4  ;;  %6712 = vpow2.f32 %v1230_v3 }
 0x977   :  { %v6262_v7 = vpack.c.bf16 %v6553_v5, %v6552_v6 }
 0x978   :  { %v1332_v23 = vpop.permute.xlu1 %1331 }
 0x979   :  { %6263 = vmatprep.subr.bf16.mxu1 %v6262_v7 }
 0x97a   :  { %6265 = vmatpush3.bf16.msra.mxu1 %v6262_v7 }
 0x97c   :  { %v1334_v24 = vpop.permute.xlu1 %1333 }
 0x97e   :  { %v6711_v8 = vpop.eup %6710 }
 0x97f   :  { %v1237_v28 = vsel %vm817_vm8, %v6711_v8, 0.0  ;;  %v6713_v12 = vpop.eup %6712 }
 0x980   :  { %1238 = vadd.xlane.f32.xlu0 %v1237_v28  ;;  %v1234_v27 = vsel %vm817_vm8, %v6713_v12, 0.0 }
 0x984   :  { %1235 = vadd.xlane.f32.xlu0 %v1234_v27 }
 0x99a   :  { %6555 = vrot.lane.b32.xlu0 %v7230_v29, %s6946_s23 }
 0xa0d   :  { %v1239_v13 = vpop.xlane.xlu0 %1238 }
 0xa0e   :  { %6714 = vrcp.f32 %v1239_v13 }
 0xa11   :  { %v1236_v14 = vpop.xlane.xlu0 %1235 }
 0xa12   :  { %6716 = vrcp.f32 %v1236_v14 }
 0xa15   :  { %v6556_v15 = vpop.permute.xlu0 %6555 }
 0xa16   :  { %v6558_v16 = vunpack.i.h.bf16 %v6556_v15  ;;  %v6557_v17 = vunpack.i.l.bf16 %v6556_v15 }
 0xa18   :  { %v6266_v18 = vpack.c.bf16 %v6558_v16, %v6557_v17  ;;  %v6715_v19 = vpop.eup %6714 }
 0xa19   :  { %v1243_v22 = vmul.f32 %v6715_v19, %v6711_v8 }
 0xa1a   :  { %6268 = vmatprep.subr.msk.bf16.mxu1 %vm7242_vm7, %v6266_v18 }
 0xa1c   :  { %v6717_v20 = vpop.eup %6716 }
 0xa1d   :  { %v1242_v21 = vmul.f32 %v6717_v20, %v6713_v12 }
 0xa1f   :  { %5910 = vmatprep.mubr.msk.f32.mxu1 %vm817_vm8, %v1242_v21 }
 0xa20   :  { %5911 = vmatmul.mubr.msk.f32.vlgmr.msra.gmra.mrb[14].mxu1 %vm817_vm8, %v1243_v22 }
 0xa21   :  { %6271 = vmatpush3.bf16.xpose.msk.msra.mxu1 %vm7242_vm7, %v6266_v18  ;;  %5917 = vmatprep.mubr.msk.f32.mxu1 %vm731_vm6, %v1332_v23 }
 0xa28   :  { %5918 = vmatmul.mubr.msk.f32.vlgmr.msra.gmra.mrb[16].mxu1 %vm731_vm6, %v1334_v24 }
 0xaf3   :  { %v7322_v25 = vpop.f32.mrb[14].mxu1 }
 0xaf4   :  { %v7324_v26 = vpop.f32.mrb[15].mxu1 }
 0xafb   :  { %v5919_v31 = vpop.f32.mrb[16].mxu1 }
 0xafc   :  { %v1423_v32 = vmul.f32 0.35355338, %v5919_v31  ;;  %v1413_v34 = vpop.f32.mrb[17].mxu1 }
 0xafd   :  { %v1422_v36 = vmul.f32 0.35355338, %v1413_v34 }
 0xafe   :  { %v1427_v40 = vsel %vm817_vm8, %v1423_v32, -inf }
 0xaff   :  { %1428 = vmax.xlane.f32.xlu0 %v1427_v40  ;;  %v1424_v41 = vsel %vm817_vm8, %v1422_v36, -inf }
 0xb00   :  { %1425 = vmax.xlane.f32.xlu1 %v1424_v41 }
 0xb11   :  { %6560 = vrot.lane.b32.xlu1 %v7230_v29, %s6947_s26 }
 0xb8c   :  { %v1429_v42 = vpop.xlane.xlu0 %1428 }
 0xb8d   :  { %v1431_v43 = vsub.f32 %v1423_v32, %v1429_v42  ;;  %v1426_v44 = vpop.xlane.xlu1 %1425 }
 0xb8e   :  { %v1430_v45 = vsub.f32 %v1422_v36, %v1426_v44 }
 0xb8f   :  { %v1434_v46 = vmul.f32 1.442695, %v1431_v43 }
 0xb90   :  { %v1432_v47 = vmul.f32 1.442695, %v1430_v45 }
 0xb91   :  { %6718 = vpow2.f32 %v1434_v46  ;;  %v6561_v48 = vpop.permute.xlu1 %6560 }
 0xb92   :  { %v6563_v49 = vunpack.i.h.bf16 %v6561_v48  ;;  %v6562_v50 = vunpack.i.l.bf16 %v6561_v48  ;;  %6720 = vpow2.f32 %v1432_v47 }
 0xb94   :  { %v6272_v51 = vpack.c.bf16 %v6563_v49, %v6562_v50 }
 0xb96   :  { %6273 = vmatprep.subr.bf16.mxu0 %v6272_v51 }
 0xb97   :  { %6275 = vmatpush3.bf16.msra.mxu0 %v6272_v51 }
 0xb9b   :  { %v6719_v52 = vpop.eup %6718 }
 0xb9c   :  { %v1439_v55 = vsel %vm817_vm8, %v6719_v52, 0.0  ;;  %v6721_v56 = vpop.eup %6720 }
 0xb9d   :  { %1440 = vadd.xlane.f32.xlu0 %v1439_v55  ;;  %v1436_v29 = vsel %vm817_vm8, %v6721_v56, 0.0 }
 0xba1   :  { %1437 = vadd.xlane.f32.xlu0 %v1436_v29 }
 0xbb7   :  { %6565 = vrot.lane.b32.xlu0 %v7258_v39, %s6937_s0 }
 0xc2a   :  { %v1441_v57 = vpop.xlane.xlu0 %1440 }
 0xc2b   :  { %6722 = vrcp.f32 %v1441_v57 }
 0xc2e   :  { %v1438_v58 = vpop.xlane.xlu0 %1437 }
 0xc2f   :  { %6724 = vrcp.f32 %v1438_v58 }
 0xc32   :  { %v6566_v59 = vpop.permute.xlu0 %6565 }
 0xc33   :  { %v6568_v60 = vunpack.i.h.bf16 %v6566_v59  ;;  %v6567_v61 = vunpack.i.l.bf16 %v6566_v59 }
 0xc35   :  { %v6276_v62 = vpack.c.bf16 %v6568_v60, %v6567_v61  ;;  %v6723_v0 = vpop.eup %6722 }
 0xc36   :  { %v1445_v3 = vmul.f32 %v6723_v0, %v6719_v52 }
 0xc37   :  { %6278 = vmatprep.subr.msk.bf16.mxu0 %vm7242_vm7, %v6276_v62 }
 0xc39   :  { %v6725_v1 = vpop.eup %6724 }
 0xc3a   :  { %v1444_v2 = vmul.f32 %v6725_v1, %v6721_v56 }
 0xc3c   :  { %5924 = vmatprep.mubr.msk.f32.mxu0 %vm817_vm8, %v1444_v2 }
 0xc3d   :  { %5925 = vmatmul.mubr.msk.f32.vlgmr.msra.gmra.mrb[16].mxu0 %vm817_vm8, %v1445_v3 }
 0xc3e   :  { %6281 = vmatpush3.bf16.xpose.msk.msra.mxu0 %vm7242_vm7, %v6276_v62  ;;  %5931 = vmatprep.mubr.msk.f32.mxu0 %vm731_vm6, %v7254_v38 }
 0xc45   :  { %5932 = vmatmul.mubr.msk.f32.vlgmr.msra.gmra.mrb[18].mxu0 %vm731_vm6, %v7252_v37 }
 0xd10   :  { %v7344_v4 = vpop.f32.mrb[16].mxu0 }
 0xd11   :  { %v7346_v5 = vpop.f32.mrb[17].mxu0 }
 0xd18   :  { %v5933_v6 = vpop.f32.mrb[18].mxu0 }
 0xd19   :  { %v1654_v7 = vmul.f32 0.35355338, %v5933_v6  ;;  %v1644_v8 = vpop.f32.mrb[19].mxu0 }
 0xd1a   :  { %v1653_v28 = vmul.f32 0.35355338, %v1644_v8 }
 0xd1b   :  { %v1658_v12 = vsel %vm817_vm8, %v1654_v7, -inf }
 0xd1c   :  { %1659 = vmax.xlane.f32.xlu0 %v1658_v12  ;;  %v1655_v27 = vsel %vm817_vm8, %v1653_v28, -inf }
 0xd1d   :  { %1656 = vmax.xlane.f32.xlu1 %v1655_v27 }
 0xd2e   :  { %6570 = vrot.lane.b32.xlu1 %v7258_v39, %s6940_s13 }
 0xd32   :  { %1764 = vrot.lane.b32.xlu1 %v7254_v38, %s6939_s9 }
 0xda9   :  { %v1660_v13 = vpop.xlane.xlu0 %1659 }
 0xdaa   :  { %v1662_v14 = vsub.f32 %v1654_v7, %v1660_v13  ;;  %v1657_v15 = vpop.xlane.xlu1 %1656 }
 0xdab   :  { %v1661_v16 = vsub.f32 %v1653_v28, %v1657_v15 }
 0xdac   :  { %v1665_v17 = vmul.f32 1.442695, %v1662_v14 }
 0xdad   :  { %v1663_v18 = vmul.f32 1.442695, %v1661_v16 }
 0xdae   :  { %6726 = vpow2.f32 %v1665_v17  ;;  %v6571_v19 = vpop.permute.xlu1 %6570 }
 0xdaf   :  { %6728 = vpow2.f32 %v1663_v18  ;;  %v6573_v20 = vunpack.i.h.bf16 %v6571_v19  ;;  %v6572_v21 = vunpack.i.l.bf16 %v6571_v19 }
 0xdb1   :  { %v6282_v22 = vpack.c.bf16 %v6573_v20, %v6572_v21 }
 0xdb2   :  { %v1765_v34 = vpop.permute.xlu1 %1764 }
 0xdb3   :  { %6283 = vmatprep.subr.bf16.mxu1 %v6282_v22 }
 0xdb4   :  { %6285 = vmatpush3.bf16.msra.mxu1 %v6282_v22 }
 0xdb8   :  { %v6727_v23 = vpop.eup %6726 }
 0xdb9   :  { %v6729_v24 = vpop.eup %6728  ;;  %v1670_v31 = vsel %vm817_vm8, %v6727_v23, 0.0 }
 0xdba   :  { %1671 = vadd.xlane.f32.xlu0 %v1670_v31  ;;  %v1667_v32 = vsel %vm817_vm8, %v6729_v24, 0.0 }
 0xdbb   :  { %1668 = vadd.xlane.f32.xlu1 %v1667_v32 }
 0xdcc   :  { %1766 = vrot.lane.b32.xlu1 %v7252_v37, %s6939_s9 }
 0xdd0   :  { %6575 = vrot.lane.b32.xlu0 %v7258_v39, %s6938_s5 }
 0xe47   :  { %v1672_v36 = vpop.xlane.xlu0 %1671 }
 0xe48   :  { %6730 = vrcp.f32 %v1672_v36  ;;  %v1669_v40 = vpop.xlane.xlu1 %1668 }
 0xe49   :  { %6732 = vrcp.f32 %v1669_v40 }
 0xe4b   :  { %v6576_v41 = vpop.permute.xlu0 %6575 }
 0xe4c   :  { %v6578_v42 = vunpack.i.h.bf16 %v6576_v41  ;;  %v6577_v43 = vunpack.i.l.bf16 %v6576_v41  ;;  %v1767_v49 = vpop.permute.xlu1 %1766 }
 0xe4e   :  { %v6286_v44 = vpack.c.bf16 %v6578_v42, %v6577_v43 }
 0xe50   :  { %6288 = vmatprep.subr.msk.bf16.mxu1 %vm7242_vm7, %v6286_v44 }
 0xe52   :  { %v6731_v45 = vpop.eup %6730 }
 0xe53   :  { %v6733_v46 = vpop.eup %6732  ;;  %v1676_v48 = vmul.f32 %v6731_v45, %v6727_v23 }
 0xe54   :  { %v1675_v47 = vmul.f32 %v6733_v46, %v6729_v24 }
 0xe56   :  { %5938 = vmatprep.mubr.msk.f32.mxu1 %vm817_vm8, %v1675_v47 }
 0xe57   :  { %5939 = vmatmul.mubr.msk.f32.vlgmr.msra.gmra.mrb[18].mxu1 %vm817_vm8, %v1676_v48 }
 0xe58   :  { %6291 = vmatpush3.bf16.xpose.msk.msra.mxu1 %vm7242_vm7, %v6286_v44  ;;  %5945 = vmatprep.mubr.msk.f32.mxu1 %vm731_vm6, %v1765_v34 }
 0xe5f   :  { %5946 = vmatmul.mubr.msk.f32.vlgmr.msra.gmra.mrb[20].mxu1 %vm731_vm6, %v1767_v49 }
 0xf2a   :  { %v7368_v50 = vpop.f32.mrb[18].mxu1 }
 0xf2b   :  { %v7370_v51 = vpop.f32.mrb[19].mxu1 }
 0xf32   :  { %v5947_v52 = vpop.f32.mrb[20].mxu1 }
 0xf33   :  { %v1856_v55 = vmul.f32 0.35355338, %v5947_v52  ;;  %v1846_v56 = vpop.f32.mrb[21].mxu1 }
 0xf34   :  { %v1855_v29 = vmul.f32 0.35355338, %v1846_v56 }
 0xf35   :  { %v1860_v57 = vsel %vm817_vm8, %v1856_v55, -inf }
 0xf36   :  { %1861 = vmax.xlane.f32.xlu0 %v1860_v57  ;;  %v1857_v58 = vsel %vm817_vm8, %v1855_v29, -inf }
 0xf37   :  { %1858 = vmax.xlane.f32.xlu1 %v1857_v58 }
 0xf48   :  { %6580 = vrot.lane.b32.xlu1 %v7258_v39, %s6941_s17 }
 0xf4c   :  { %1966 = vrot.lane.b32.xlu1 %v7254_v38, %s6942_s21 }
 0xf50   :  { %1968 = vrot.lane.b32.xlu1 %v7252_v37, %s6942_s21 }
 0xfc3   :  { %v1862_v59 = vpop.xlane.xlu0 %1861 }
 0xfc4   :  { %v1864_v60 = vsub.f32 %v1856_v55, %v1862_v59  ;;  %v1859_v61 = vpop.xlane.xlu1 %1858 }
 0xfc5   :  { %v1863_v62 = vsub.f32 %v1855_v29, %v1859_v61 }
 0xfc6   :  { %v1867_v0 = vmul.f32 1.442695, %v1864_v60 }
 0xfc7   :  { %v1865_v1 = vmul.f32 1.442695, %v1863_v62 }
 0xfc8   :  { %6734 = vpow2.f32 %v1867_v0  ;;  %v6581_v2 = vpop.permute.xlu1 %6580 }
 0xfc9   :  { %v6583_v3 = vunpack.i.h.bf16 %v6581_v2  ;;  %v6582_v6 = vunpack.i.l.bf16 %v6581_v2  ;;  %6736 = vpow2.f32 %v1865_v1 }
 0xfcb   :  { %v6292_v7 = vpack.c.bf16 %v6583_v3, %v6582_v6 }
 0xfcc   :  { %v1967_v23 = vpop.permute.xlu1 %1966 }
 0xfcd   :  { %6293 = vmatprep.subr.bf16.mxu0 %v6292_v7 }
 0xfce   :  { %6295 = vmatpush3.bf16.msra.mxu0 %v6292_v7 }
 0xfd0   :  { %v1969_v24 = vpop.permute.xlu1 %1968 }
 0xfd2   :  { %v6735_v8 = vpop.eup %6734 }
 0xfd3   :  { %v1872_v28 = vsel %vm817_vm8, %v6735_v8, 0.0  ;;  %v6737_v12 = vpop.eup %6736 }
 0xfd4   :  { %1873 = vadd.xlane.f32.xlu0 %v1872_v28  ;;  %v1869_v27 = vsel %vm817_vm8, %v6737_v12, 0.0 }
 0xfd8   :  { %1870 = vadd.xlane.f32.xlu0 %v1869_v27 }
 0xfee   :  { %6585 = vrot.lane.b32.xlu0 %v7258_v39, %s6943_s25 }
0x1061   :  { %v1874_v13 = vpop.xlane.xlu0 %1873 }
0x1062   :  { %6738 = vrcp.f32 %v1874_v13 }
0x1065   :  { %v1871_v14 = vpop.xlane.xlu0 %1870 }
0x1066   :  { %6740 = vrcp.f32 %v1871_v14 }
0x1069   :  { %v6586_v15 = vpop.permute.xlu0 %6585 }
0x106a   :  { %v6588_v16 = vunpack.i.h.bf16 %v6586_v15  ;;  %v6587_v17 = vunpack.i.l.bf16 %v6586_v15 }
0x106c   :  { %v6296_v18 = vpack.c.bf16 %v6588_v16, %v6587_v17  ;;  %v6739_v19 = vpop.eup %6738 }
0x106d   :  { %v1878_v22 = vmul.f32 %v6739_v19, %v6735_v8 }
0x106e   :  { %6298 = vmatprep.subr.msk.bf16.mxu0 %vm7242_vm7, %v6296_v18 }
0x1070   :  { %v6741_v20 = vpop.eup %6740 }
0x1071   :  { %v1877_v21 = vmul.f32 %v6741_v20, %v6737_v12 }
0x1073   :  { %5952 = vmatprep.mubr.msk.f32.mxu0 %vm817_vm8, %v1877_v21 }
0x1074   :  { %5953 = vmatmul.mubr.msk.f32.vlgmr.msra.gmra.mrb[20].mxu0 %vm817_vm8, %v1878_v22 }
0x1075   :  { %6301 = vmatpush3.bf16.xpose.msk.msra.mxu0 %vm7242_vm7, %v6296_v18  ;;  %5959 = vmatprep.mubr.msk.f32.mxu0 %vm731_vm6, %v1967_v23 }
0x107c   :  { %5960 = vmatmul.mubr.msk.f32.vlgmr.msra.gmra.mrb[22].mxu0 %vm731_vm6, %v1969_v24 }
0x1147   :  { %v7392_v31 = vpop.f32.mrb[20].mxu0 }
0x1148   :  { %v7394_v32 = vpop.f32.mrb[21].mxu0 }
0x114f   :  { %v5961_v34 = vpop.f32.mrb[22].mxu0 }
0x1150   :  { %v2058_v36 = vmul.f32 0.35355338, %v5961_v34  ;;  %v2048_v40 = vpop.f32.mrb[23].mxu0 }
0x1151   :  { %v2057_v41 = vmul.f32 0.35355338, %v2048_v40  ;;  %v533_v40 = vld [vmem:[%s6994_s29] sm:$0xff] }
0x1152   :  { %v2062_v42 = vsel %vm817_vm8, %v2058_v36, -inf }
0x1153   :  { %2063 = vmax.xlane.f32.xlu0 %v2062_v42  ;;  %v2059_v43 = vsel %vm817_vm8, %v2057_v41, -inf }
0x1154   :  { %2060 = vmax.xlane.f32.xlu1 %v2059_v43 }
0x1165   :  { %6590 = vrot.lane.b32.xlu1 %v7258_v39, %s6944_s27 }
0x1169   :  { %2168 = vrot.lane.b32.xlu1 %v7254_v38, %s6945_s22 }
0x116d   :  { %2170 = vrot.lane.b32.xlu1 %v7252_v37, %s6945_s22 }
0x11e0   :  { %v2064_v44 = vpop.xlane.xlu0 %2063 }
0x11e1   :  { %v2066_v45 = vsub.f32 %v2058_v36, %v2064_v44  ;;  %v2061_v46 = vpop.xlane.xlu1 %2060 }
0x11e2   :  { %v2065_v47 = vsub.f32 %v2057_v41, %v2061_v46  ;;  %v534_v41 = vld [vmem:[%s6994_s29 + $0x8] sm:$0xff] }
0x11e3   :  { %v2069_v48 = vmul.f32 1.442695, %v2066_v45  ;;  %v6316_v42 = vpack.c.bf16 %v534_v41, %v533_v40  ;;  %v543_v40 = vld [vmem:[%s7014_s19 + $0x18] sm:$0xff] }
0x11e4   :  { %v2067_v49 = vmul.f32 1.442695, %v2065_v47 }
0x11e5   :  { %6742 = vpow2.f32 %v2069_v48  ;;  %v6591_v52 = vpop.permute.xlu1 %6590  ;;  %v535_v48 = vld [vmem:[%s6994_s29 + $0x10] sm:$0xff] }
0x11e6   :  { %v6593_v55 = vunpack.i.h.bf16 %v6591_v52  ;;  %v6592_v56 = vunpack.i.l.bf16 %v6591_v52  ;;  %6744 = vpow2.f32 %v2067_v49  ;;  %v536_v49 = vld [vmem:[%s6994_s29 + $0x18] sm:$0xff]  ;;  %s7933_s29 = sld [smem:[#allocation8_spill]] }
0x11e8   :  { %v6302_v29 = vpack.c.bf16 %v6593_v55, %v6592_v56 }
0x11e9   :  { %v2169_v8 = vpop.permute.xlu1 %2168 }
0x11ea   :  { %6303 = vmatprep.subr.bf16.mxu1 %v6302_v29 }
0x11eb   :  { %6305 = vmatpush3.bf16.msra.mxu1 %v6302_v29 }
0x11ed   :  { %v2171_v28 = vpop.permute.xlu1 %2170 }
0x11ef   :  { %v6743_v57 = vpop.eup %6742 }
0x11f0   :  { %v2074_v38 = vsel %vm817_vm8, %v6743_v57, 0.0  ;;  %v6745_v58 = vpop.eup %6744 }
0x11f1   :  { %2075 = vadd.xlane.f32.xlu0 %v2074_v38  ;;  %v2071_v37 = vsel %vm817_vm8, %v6745_v58, 0.0 }
0x11f5   :  { %2072 = vadd.xlane.f32.xlu0 %v2071_v37 }
0x120b   :  { %6595 = vrot.lane.b32.xlu0 %v7258_v39, %s6946_s23 }
0x127e   :  { %v2076_v59 = vpop.xlane.xlu0 %2075 }
0x127f   :  { %6746 = vrcp.f32 %v2076_v59 }
0x1282   :  { %v2073_v60 = vpop.xlane.xlu0 %2072 }
0x1283   :  { %6748 = vrcp.f32 %v2073_v60 }
0x1286   :  { %v6596_v61 = vpop.permute.xlu0 %6595 }
0x1287   :  { %v6598_v62 = vunpack.i.h.bf16 %v6596_v61  ;;  %v6597_v0 = vunpack.i.l.bf16 %v6596_v61 }
0x1289   :  { %v6306_v1 = vpack.c.bf16 %v6598_v62, %v6597_v0  ;;  %v6747_v2 = vpop.eup %6746 }
0x128a   :  { %v2080_v7 = vmul.f32 %v6747_v2, %v6743_v57  ;;  %v6320_v57 = vpack.c.bf16 %v536_v49, %v535_v48  ;;  %v5503_v2 = vld [vmem:[%s6999_s3] ss:$0 sm:$0xff]  ;;  %s7934_s3 = sld [smem:[#allocation6_spill]] }
0x128b   :  { %6308 = vmatprep.subr.msk.bf16.mxu1 %vm7242_vm7, %v6306_v1 }
0x128d   :  { %v6749_v3 = vpop.eup %6748 }
0x128e   :  { %v2079_v6 = vmul.f32 %v6749_v3, %v6745_v58 }
0x1290   :  { %5966 = vmatprep.mubr.msk.f32.mxu1 %vm817_vm8, %v2079_v6 }
0x1291   :  { %5967 = vmatmul.mubr.msk.f32.vlgmr.msra.gmra.mrb[22].mxu1 %vm817_vm8, %v2080_v7 }
0x1292   :  { %6311 = vmatpush3.bf16.xpose.msk.msra.mxu1 %vm7242_vm7, %v6306_v1  ;;  %5973 = vmatprep.mubr.msk.f32.mxu1 %vm731_vm6, %v2169_v8 }
0x1299   :  { %5974 = vmatmul.mubr.msk.f32.vlgmr.msra.gmra.mrb[24].mxu1 %vm731_vm6, %v2171_v28 }
0x1364   :  { %v5968_v12 = vpop.f32.mrb[22].mxu1 }
0x1365   :  { %v2159_v27 = vpop.f32.mrb[23].mxu1 }
0x136c   :  { %v5975_v13 = vpop.f32.mrb[24].mxu1 }
0x136d   :  { %v2260_v14 = vmul.f32 0.35355338, %v5975_v13  ;;  %v2250_v15 = vpop.f32.mrb[25].mxu1 }
0x136e   :  { %v2259_v16 = vmul.f32 0.35355338, %v2250_v15 }
0x136f   :  { %v2264_v17 = vsel %vm817_vm8, %v2260_v14, -inf }
0x1370   :  { %2265 = vmax.xlane.f32.xlu0 %v2264_v17  ;;  %v2261_v18 = vsel %vm817_vm8, %v2259_v16, -inf }
0x1371   :  { %2262 = vmax.xlane.f32.xlu1 %v2261_v18 }
0x1382   :  { %6600 = vrot.lane.b32.xlu1 %v7258_v39, %s6947_s26 }
0x1386   :  { %1537 = vrot.lane.b32.xlu1 %v7298_v53, %s6948_s1 }
0x138a   :  { %1543 = vrot.lane.b32.xlu1 %v7324_v26, %s6949_s28 }
0x138e   :  { %1545 = vrot.lane.b32.xlu1 %v7322_v25, %s6949_s28 }
0x1392   :  { %1553 = vrot.lane.b32.xlu1 %v7344_v4, %s6950_s2 }
0x1396   :  { %2374 = vrot.lane.b32.xlu1 %v7392_v31, %s6948_s1 }
0x139a   :  { %2382 = vrot.lane.b32.xlu1 %v5968_v12, %s6949_s28 }
0x13fd   :  { %v2266_v39 = vpop.xlane.xlu0 %2265 }
0x13fe   :  { %v2268_v19 = vsub.f32 %v2260_v14, %v2266_v39  ;;  %v2263_v20 = vpop.xlane.xlu1 %2262 }
0x13ff   :  { %v2267_v53 = vsub.f32 %v2259_v16, %v2263_v20 }
0x1400   :  { %v2271_v21 = vmul.f32 1.442695, %v2268_v19 }
0x1401   :  { %v2269_v22 = vmul.f32 1.442695, %v2267_v53 }
0x1402   :  { %6750 = vpow2.f32 %v2271_v21  ;;  %v6601_v26 = vpop.permute.xlu1 %6600 }
0x1403   :  { %v6603_v25 = vunpack.i.h.bf16 %v6601_v26  ;;  %v6602_v23 = vunpack.i.l.bf16 %v6601_v26  ;;  %6752 = vpow2.f32 %v2269_v22 }
0x1405   :  { %v6312_v24 = vpack.c.bf16 %v6603_v25, %v6602_v23 }
0x1406   :  { %v1538_v45 = vpop.permute.xlu1 %1537 }
0x1407   :  { %6313 = vmatprep.subr.bf16.mxu0 %v6312_v24  ;;  %v1558_v37 = vsel %vm731_vm6, %v7274_v10, %v1538_v45 }
0x1408   :  { %6315 = vmatpush3.bf16.msra.mxu0 %v6312_v24 }
0x1409   :  { %6317 = vmatprep.subr.bf16.mxu0 %v6316_v42 }
0x140a   :  { %v1544_v46 = vpop.permute.xlu1 %1543 }
0x140c   :  { %v6751_v4 = vpop.eup %6750 }
0x140d   :  { %v2276_v31 = vsel %vm817_vm8, %v6751_v4, 0.0  ;;  %v6753_v34 = vpop.eup %6752 }
0x140e   :  { %2277 = vadd.xlane.f32.xlu0 %v2276_v31  ;;  %v2273_v36 = vsel %vm817_vm8, %v6753_v34, 0.0  ;;  %v1546_v29 = vpop.permute.xlu1 %1545  ;;  %v541_v31 = vld [vmem:[%s7014_s19 + $0x8] sm:$0xff] }
0x140f   :  { %v1560_v59 = vsel %vm817_vm8, %v1558_v37, %v1546_v29 }
0x1412   :  { %2274 = vadd.xlane.f32.xlu0 %v2273_v36  ;;  %v542_v36 = vld [vmem:[%s7014_s19 + $0x10] sm:$0xff] }
0x1413   :  { %v6328_v41 = vpack.c.bf16 %v543_v40, %v542_v36 }
0x1428   :  { %1535 = vrot.lane.b32.xlu0 %v7300_v54, %s6948_s1 }
0x142c   :  { %1551 = vrot.lane.b32.xlu0 %v7346_v5, %s6950_s2 }
0x1430   :  { %2372 = vrot.lane.b32.xlu0 %v7394_v32, %s6948_s1 }
0x1434   :  { %2380 = vrot.lane.b32.xlu0 %v2159_v27, %s6949_s28 }
0x149b   :  { %v2278_v43 = vpop.xlane.xlu0 %2277 }
0x149c   :  { %6754 = vrcp.f32 %v2278_v43 }
0x149f   :  { %v2275_v44 = vpop.xlane.xlu0 %2274 }
0x14a0   :  { %6756 = vrcp.f32 %v2275_v44 }
0x14a3   :  { %v1536_v54 = vpop.permute.xlu0 %1535 }
0x14a4   :  { %v1557_v5 = vsel %vm731_vm6, %v7276_v11, %v1536_v54  ;;  %v1554_v11 = vpop.permute.xlu1 %1553 }
0x14a5   :  { %v1559_v38 = vsel %vm817_vm8, %v1557_v5, %v1544_v46  ;;  %v1563_v60 = vsel %vm1561_vm9, %v1560_v59, %v1554_v11 }
0x14a6   :  { %v6755_v47 = vpop.eup %6754 }
0x14a7   :  { %v1552_v55 = vpop.permute.xlu0 %1551  ;;  %v2282_v32 = vmul.f32 %v6755_v47, %v6751_v4  ;;  %v540_v4 = vld [vmem:[%s7014_s19] sm:$0xff]  ;;  %s7937_s19 = sld [smem:[#allocation10_spill]] }
0x14a8   :  { %v1562_v58 = vsel %vm1561_vm9, %v1559_v38, %v1552_v55  ;;  %v2375_v12 = vpop.permute.xlu1 %2374 }
0x14a9   :  { %v2395_v17 = vsel %vm731_vm6, %v7368_v50, %v2375_v12 }
0x14aa   :  { %v6757_v52 = vpop.eup %6756 }
0x14ab   :  { %v2281_v56 = vmul.f32 %v6757_v52, %v6753_v34  ;;  %v2373_v27 = vpop.permute.xlu0 %2372  ;;  %v6324_v34 = vpack.c.bf16 %v541_v31, %v540_v4 }
0x14ac   :  { %v2383_v13 = vpop.permute.xlu1 %2382  ;;  %v2394_v15 = vsel %vm731_vm6, %v7370_v51, %v2373_v27 }
0x14ad   :  { %5980 = vmatprep.mubr.msk.f32.mxu0 %vm817_vm8, %v2281_v56  ;;  %6325 = vmatprep.subr.bf16.mxu1 %v6324_v34 }
0x14ae   :  { %5981 = vmatmul.mubr.msk.f32.vlgmr.msra.gmra.mrb[24].mxu0 %vm817_vm8, %v2282_v32  ;;  %6327 = vmatpush3.bf16.msra.mxu1 %v6324_v34 }
0x14af   :  { %6319 = vmatpush3.bf16.msra.mxu0 %v6316_v42  ;;  %5991 = vmatprep.mubr.msk.f32.mxu0 %vm554_vm5, %v1562_v58  ;;  %v2381_v14 = vpop.permute.xlu0 %2380  ;;  %v7487_v58 = vld [vmem:[%s7009_s14] ss:$0 sm:$0xff]  ;;  %s7936_s14 = sld [smem:[#allocation9_spill]] }
0x14b0   :  { %6321 = vmatprep.subr.bf16.mxu0 %v6320_v57  ;;  %6329 = vmatprep.subr.bf16.mxu1 %v6328_v41 }
0x14b2   :  { %6331 = vmatpush3.bf16.msra.mxu1 %v6328_v41 }
0x14b3   :  { %6323 = vmatpush3.bf16.msra.mxu0 %v6320_v57  ;;  %v7484_v57 = vld [vmem:[%s7004_s8] ss:$0 sm:$0xff]  ;;  %s7935_s8 = sld [smem:[#allocation7_spill]] }
0x14b6   :  { %5992 = vmatmul.mubr.msk.f32.vlgmr.msra.gmra.mrb[26].mxu0 %vm554_vm5, %v1563_v60 }
0x1581   :  { %v5982_v61 = vpop.f32.mrb[24].mxu0 }
0x1582   :  { %2390 = vrot.lane.b32.xlu1 %v5982_v61, %s6950_s2  ;;  %v2361_v62 = vpop.f32.mrb[25].mxu0  ;;  %v545_v61 = vld [vmem:[%s7024_s30] sm:$0xff] }
0x1583   :  { %2388 = vrot.lane.b32.xlu0 %v2361_v62, %s6950_s2  ;;  %v546_v62 = vld [vmem:[%s7024_s30 + $0x8] sm:$0xff] }
0x1589   :  { %v5993_v0 = vpop.f32.mrb[26].mxu0 }
0x158a   :  { %v2484_v1 = vpop.f32.mrb[27].mxu0  ;;  %v2490_v6 = vadd.f32 %v5993_v0, %v5503_v2  ;;  %v6332_v0 = vpack.c.bf16 %v546_v62, %v545_v61 }
0x158b   :  { %v2485_v3 = vadd.f32 %v5503_v2, %v2484_v1  ;;  %v547_v1 = vld [vmem:[%s7024_s30 + $0x10] sm:$0xff] }
0x158c   :  { %v2504_v8 = vadd.f32 %v2490_v6, %v7181_v63  ;;  %v2397_v63 = vsel %vm817_vm8, %v2395_v17, %v2383_v13  ;;  %6333 = vmatprep.subr.bf16.mxu0 %v6332_v0  ;;  %v549_v6 = vld [vmem:[%s7024_s30 + $0x20] sm:$0xff] }
0x158d   :  { %v2503_v10 = vadd.f32 %v2485_v3, %v7168_v33  ;;  %v2396_v33 = vsel %vm817_vm8, %v2394_v15, %v2381_v14  ;;  %6335 = vmatpush3.bf16.msra.mxu0 %v6332_v0 }
0x158e   :  { %v2510_v28 = vsel %vm554_vm5, %v2504_v8, 0.0 }
0x158f   :  { %v2507_v7 = vsel %vm554_vm5, %v2503_v10, 0.0 }
0x15a2   :  { %2508 = vadd.xlane.f32.xlu0 %v2507_v7 }
0x15a6   :  { %2511 = vadd.xlane.f32.xlu1 %v2510_v28  ;;  %v552_v28 = vld [vmem:[%s7024_s30 + $0x38] sm:$0xff] }
0x15f4   :  { %v2391_v16 = vpop.permute.xlu1 %2390 }
0x15f5   :  { %v2389_v18 = vpop.permute.xlu0 %2388  ;;  %v2399_v19 = vsel %vm1561_vm9, %v2397_v63, %v2391_v16 }
0x15f6   :  { %v2398_v39 = vsel %vm1561_vm9, %v2396_v33, %v2389_v18 }
0x15f7   :  { %5994 = vmatprep.mubr.msk.f32.mxu0 %vm554_vm5, %v2398_v39 }
0x15f8   :  { %5995 = vmatmul.mubr.msk.f32.gmra.mrb[28].mxu0 %vm554_vm5, %v2399_v19  ;;  %v5510_v19 = vld [vmem:[%s7019_s24] ss:$0 sm:$0xff]  ;;  %s7938_s24 = sld [smem:[#allocation13_spill]] }
0x162f   :  { %v2509_v51 = vpop.xlane.xlu0 %2508 }
0x1630   :  { %v2519_v20 = vmul.f32 0.03125, %v2509_v51 }
0x1632   :  { %v2523_v53 = vsub.f32 %v2503_v10, %v2519_v20  ;;  %v550_v10 = vld [vmem:[%s7024_s30 + $0x28] sm:$0xff] }
0x1633   :  { %v2512_v50 = vpop.xlane.xlu1 %2511  ;;  %v6340_v7 = vpack.c.bf16 %v550_v10, %v549_v6 }
0x1634   :  { %v2520_v21 = vmul.f32 0.03125, %v2512_v50  ;;  %v2527_v22 = vmul.f32 %v2523_v53, %v2523_v53 }
0x1636   :  { %v2524_v26 = vsub.f32 %v2504_v8, %v2520_v21  ;;  %v2531_v25 = vsel %vm554_vm5, %v2527_v22, 0.0  ;;  %v551_v8 = vld [vmem:[%s7024_s30 + $0x30] sm:$0xff] }
0x1637   :  { %2532 = vadd.xlane.f32.xlu0 %v2531_v25  ;;  %v6344_v12 = vpack.c.bf16 %v552_v28, %v551_v8 }
0x1638   :  { %v2528_v23 = vmul.f32 %v2524_v26, %v2524_v26 }
0x163a   :  { %v2534_v24 = vsel %vm554_vm5, %v2528_v23, 0.0 }
0x163b   :  { %2535 = vadd.xlane.f32.xlu0 %v2534_v24 }
0x16c4   :  { %v2533_v42 = vpop.xlane.xlu0 %2532 }
0x16c5   :  { %v2543_v43 = vmul.f32 0.03125, %v2533_v42 }
0x16c7   :  { %v2547_v44 = vadd.f32 1e-05, %v2543_v43 }
0x16c8   :  { %v2536_v45 = vpop.xlane.xlu0 %2535 }
0x16c9   :  { %6758 = vrsqrt.f32 %v2547_v44  ;;  %v2544_v54 = vmul.f32 0.03125, %v2536_v45 }
0x16cb   :  { %v2548_v46 = vadd.f32 1e-05, %v2544_v54  ;;  %v5996_v47 = vpop.f32.mrb[28].mxu0 }
0x16cc   :  { %v2500_v48 = vadd.f32 %v5996_v47, %v5503_v2  ;;  %v2494_v49 = vpop.f32.mrb[29].mxu0 }
0x16cd   :  { %6760 = vrsqrt.f32 %v2548_v46  ;;  %v2495_v52 = vadd.f32 %v5503_v2, %v2494_v49  ;;  %v548_v2 = vld [vmem:[%s7024_s30 + $0x18] sm:$0xff]  ;;  %s7939_s30 = sld [smem:[#allocation11_spill]] }
0x16ce   :  { %v2506_v5 = vadd.f32 %v2500_v48, %v7200_v30  ;;  %v6336_v3 = vpack.c.bf16 %v548_v2, %v547_v1 }
0x16cf   :  { %v2505_v55 = vadd.f32 %v2495_v52, %v7189_v9 }
0x16d0   :  { %v2516_v56 = vsel %vm554_vm5, %v2506_v5, 0.0  ;;  %6337 = vmatprep.subr.bf16.mxu0 %v6336_v3 }
0x16d1   :  { %2517 = vadd.xlane.f32.xlu1 %v2516_v56  ;;  %v2513_v29 = vsel %vm554_vm5, %v2505_v55, 0.0  ;;  %6339 = vmatpush3.bf16.msra.mxu0 %v6336_v3  ;;  %v7527_v56 = vld [vmem:[%s7029_s6] ss:$0 sm:$0xff]  ;;  %s7940_s6 = sld [smem:[#allocation12_spill]] }
0x16d2   :  { %2514 = vadd.xlane.f32.xlu0 %v2513_v29  ;;  %6341 = vmatprep.subr.bf16.mxu0 %v6340_v7 }
0x16d3   :  { %v6759_v32 = vpop.eup %6758 }
0x16d4   :  { %v2555_v38 = vmul.f32 %v6759_v32, %v2523_v53 }
0x16d5   :  { %6343 = vmatpush3.bf16.msra.mxu0 %v6340_v7 }
0x16d6   :  { %v2565_v30 = vmul.f32 %v7484_v57, %v2555_v38  ;;  %6345 = vmatprep.subr.bf16.mxu0 %v6344_v12 }
0x16d7   :  { %v6761_v11 = vpop.eup %6760 }
0x16d8   :  { %v2556_v9 = vmul.f32 %v6761_v11, %v2524_v26  ;;  %v7491_v37 = vadd.f32 %v7487_v58, %v2565_v30 }
0x16d9   :  { %6347 = vmatpush3.bf16.msra.mxu0 %v6344_v12 }
0x16da   :  { %6005 = vmatprep.mubr.msk.f32.mxu1 %vm554_vm5, %v7491_v37  ;;  %v2566_v59 = vmul.f32 %v7484_v57, %v2556_v9 }
0x16dc   :  { %v7497_v60 = vadd.f32 %v7487_v58, %v2566_v59 }
0x16de   :  { %6006 = vmatmul.mubr.msk.f32.vlgmr.msra.gmra.mrb[26].mxu1 %vm554_vm5, %v7497_v60 }
0x175e   :  { %v2518_v27 = vpop.xlane.xlu1 %2517 }
0x175f   :  { %v2522_v13 = vmul.f32 0.03125, %v2518_v27  ;;  %v2515_v14 = vpop.xlane.xlu0 %2514 }
0x1760   :  { %v2521_v15 = vmul.f32 0.03125, %v2515_v14 }
0x1761   :  { %v2526_v16 = vsub.f32 %v2506_v5, %v2522_v13 }
0x1762   :  { %v2525_v17 = vsub.f32 %v2505_v55, %v2521_v15 }
0x1763   :  { %v2530_v33 = vmul.f32 %v2526_v16, %v2526_v16 }
0x1764   :  { %v2529_v18 = vmul.f32 %v2525_v17, %v2525_v17 }
0x1765   :  { %v2540_v63 = vsel %vm554_vm5, %v2530_v33, 0.0 }
0x1766   :  { %2541 = vadd.xlane.f32.xlu1 %v2540_v63  ;;  %v2537_v39 = vsel %vm554_vm5, %v2529_v18, 0.0 }
0x1767   :  { %2538 = vadd.xlane.f32.xlu0 %v2537_v39  ;;  %v2816_v39 = vld [vmem:[%s7933_s29] sm:$0xff] }
0x17b1   :  { %v6007_v51 = vpop.f32.mrb[26].mxu1 }
0x17b2   :  { %v2669_v20 = vadd.f32 %v6007_v51, %v5510_v19  ;;  %v2663_v53 = vpop.f32.mrb[27].mxu1 }
0x17b3   :  { %v2664_v50 = vadd.f32 %v5510_v19, %v2663_v53  ;;  %v2819_v53 = vld [vmem:[%s7933_s29 + $0x18] sm:$0xff] }
0x17b4   :  { %v2687_v21 = vmul.f32 0.70710677, %v2669_v20  ;;  %v2683_v31 = vmul.f32 0.5, %v2669_v20  ;;  %v2818_v20 = vld [vmem:[%s7933_s29 + $0x10] sm:$0xff] }
0x17b5   :  { %v2686_v22 = vmul.f32 0.70710677, %v2664_v50  ;;  %v2682_v24 = vmul.f32 0.5, %v2664_v50  ;;  %v6352_v50 = vpack.c.bf16 %v2819_v53, %v2818_v20 }
0x17b6   :  { %6762 = verf.f32 %v2687_v21 }
0x17b7   :  { %6764 = verf.f32 %v2686_v22 }
0x17c0   :  { %v6763_v26 = vpop.eup %6762 }
0x17c1   :  { %v6765_v25 = vpop.eup %6764  ;;  %v2695_v23 = vadd.f32 1.0, %v6763_v26 }
0x17c2   :  { %v2694_v4 = vadd.f32 1.0, %v6765_v25 }
0x17c3   :  { %v2699_v36 = vmul.f32 %v2695_v23, %v2683_v31 }
0x17c4   :  { %v2698_v34 = vmul.f32 %v2694_v4, %v2682_v24 }
0x17c6   :  { %6027 = vmatprep.mubr.msk.f32.mxu0 %vm2702_vm10, %v2698_v34 }
0x17c7   :  { %6028 = vmatmul.mubr.msk.f32.vlgmr.msra.gmra.mrb[30].mxu0 %vm2702_vm10, %v2699_v36 }
0x17f3   :  { %v2542_v40 = vpop.xlane.xlu1 %2541 }
0x17f4   :  { %v2546_v41 = vmul.f32 0.03125, %v2542_v40  ;;  %v2539_v42 = vpop.xlane.xlu0 %2538 }
0x17f5   :  { %v2545_v43 = vmul.f32 0.03125, %v2539_v42 }
0x17f6   :  { %v2550_v44 = vadd.f32 1e-05, %v2546_v41 }
0x17f7   :  { %v2549_v45 = vadd.f32 1e-05, %v2545_v43 }
0x17f8   :  { %6766 = vrsqrt.f32 %v2550_v44 }
0x17f9   :  { %6768 = vrsqrt.f32 %v2549_v45  ;;  %v5520_v45 = vld [vmem:[%s7934_s3] ss:$0 sm:$0xff] }
0x1802   :  { %v6767_v54 = vpop.eup %6766 }
0x1803   :  { %v6769_v46 = vpop.eup %6768  ;;  %v2558_v47 = vmul.f32 %v6767_v54, %v2526_v16 }
0x1804   :  { %v2557_v48 = vmul.f32 %v6769_v46, %v2525_v17 }
0x1805   :  { %v2568_v49 = vmul.f32 %v7484_v57, %v2558_v47 }
0x1806   :  { %v2567_v52 = vmul.f32 %v7484_v57, %v2557_v48  ;;  %v5521_v48 = vld [vmem:[%s7935_s8] ss:$0 sm:$0xff] }
0x1807   :  { %v7520_v55 = vadd.f32 %v7487_v58, %v2568_v49 }
0x1808   :  { %v7517_v5 = vadd.f32 %v7487_v58, %v2567_v52 }
0x180a   :  { %6008 = vmatprep.mubr.msk.f32.mxu1 %vm554_vm5, %v7517_v5 }
0x180b   :  { %6009 = vmatmul.mubr.msk.f32.gmra.mrb[28].mxu1 %vm554_vm5, %v7520_v55 }
0x189a   :  { %v6029_v29 = vpop.f32.mrb[30].mxu0 }
0x189b   :  { %v2801_v32 = vadd.f32 %v6029_v29, %v7497_v60  ;;  %v2781_v38 = vpop.f32.mrb[31].mxu0 }
0x189c   :  { %v2800_v57 = vadd.f32 %v2781_v38, %v7491_v37 }
0x189d   :  { %v7532_v30 = vadd.f32 %v7527_v56, %v2801_v32 }
0x189e   :  { %v7535_v58 = vadd.f32 %v7527_v56, %v2800_v57 }
0x189f   :  { %v2844_v11 = vsel %vm554_vm5, %v7532_v30, 0.0 }
0x18a0   :  { %2845 = vadd.xlane.f32.xlu1 %v2844_v11  ;;  %v2841_v9 = vsel %vm554_vm5, %v7535_v58, 0.0 }
0x18a1   :  { %2842 = vadd.xlane.f32.xlu0 %v2841_v9 }
0x18de   :  { %v6010_v59 = vpop.f32.mrb[28].mxu1 }
0x18df   :  { %v2679_v61 = vadd.f32 %v6010_v59, %v5510_v19  ;;  %v2673_v60 = vpop.f32.mrb[29].mxu1 }
0x18e0   :  { %v2674_v62 = vadd.f32 %v5510_v19, %v2673_v60  ;;  %v2817_v19 = vld [vmem:[%s7933_s29 + $0x8] sm:$0xff] }
0x18e1   :  { %v2689_v0 = vmul.f32 0.70710677, %v2679_v61  ;;  %v2685_v7 = vmul.f32 0.5, %v2679_v61  ;;  %v6348_v51 = vpack.c.bf16 %v2817_v19, %v2816_v39 }
0x18e2   :  { %v2688_v37 = vmul.f32 0.70710677, %v2674_v62  ;;  %v2684_v6 = vmul.f32 0.5, %v2674_v62 }
0x18e3   :  { %6770 = verf.f32 %v2689_v0  ;;  %6349 = vmatprep.subr.bf16.mxu1 %v6348_v51 }
0x18e4   :  { %6772 = verf.f32 %v2688_v37  ;;  %6351 = vmatpush3.bf16.msra.mxu1 %v6348_v51 }
0x18e5   :  { %6353 = vmatprep.subr.bf16.mxu1 %v6352_v50 }
0x18e8   :  { %6355 = vmatpush3.bf16.msra.mxu1 %v6352_v50 }
0x18ed   :  { %v6771_v1 = vpop.eup %6770 }
0x18ee   :  { %v6773_v2 = vpop.eup %6772  ;;  %v2697_v3 = vadd.f32 1.0, %v6771_v1 }
0x18ef   :  { %v2696_v10 = vadd.f32 1.0, %v6773_v2 }
0x18f0   :  { %v2701_v28 = vmul.f32 %v2697_v3, %v2685_v7 }
0x18f1   :  { %v2700_v8 = vmul.f32 %v2696_v10, %v2684_v6 }
0x18f3   :  { %6030 = vmatprep.mubr.msk.f32.mxu0 %vm2702_vm10, %v2700_v8 }
0x18f4   :  { %6031 = vmatmul.mubr.msk.f32.gmra.mrb[32].mxu0 %vm2702_vm10, %v2701_v28 }
0x192d   :  { %v2846_v12 = vpop.xlane.xlu1 %2845 }
0x192e   :  { %v2854_v27 = vmul.f32 0.03125, %v2846_v12  ;;  %v2843_v13 = vpop.xlane.xlu0 %2842 }
0x192f   :  { %v2853_v14 = vmul.f32 0.03125, %v2843_v13 }
0x1930   :  { %v2858_v15 = vsub.f32 %v7532_v30, %v2854_v27 }
0x1931   :  { %v2857_v16 = vsub.f32 %v7535_v58, %v2853_v14 }
0x1932   :  { %v2862_v17 = vmul.f32 %v2858_v15, %v2858_v15 }
0x1933   :  { %v2861_v33 = vmul.f32 %v2857_v16, %v2857_v16 }
0x1934   :  { %v2868_v18 = vsel %vm554_vm5, %v2862_v17, 0.0 }
0x1935   :  { %2869 = vadd.xlane.f32.xlu1 %v2868_v18  ;;  %v2865_v63 = vsel %vm554_vm5, %v2861_v33, 0.0 }
0x1936   :  { %2866 = vadd.xlane.f32.xlu0 %v2865_v63 }
0x19c2   :  { %v2870_v21 = vpop.xlane.xlu1 %2869 }
0x19c3   :  { %v2878_v22 = vmul.f32 0.03125, %v2870_v21  ;;  %v2867_v26 = vpop.xlane.xlu0 %2866 }
0x19c4   :  { %v2877_v25 = vmul.f32 0.03125, %v2867_v26 }
0x19c5   :  { %v2882_v23 = vadd.f32 1e-05, %v2878_v22 }
0x19c6   :  { %v2881_v24 = vadd.f32 1e-05, %v2877_v25 }
0x19c7   :  { %6774 = vrsqrt.f32 %v2882_v23  ;;  %v6032_v4 = vpop.f32.mrb[32].mxu0 }
0x19c8   :  { %6776 = vrsqrt.f32 %v2881_v24  ;;  %v2803_v31 = vadd.f32 %v6032_v4, %v7520_v55  ;;  %v2791_v34 = vpop.f32.mrb[33].mxu0 }
0x19c9   :  { %v2802_v36 = vadd.f32 %v2791_v34, %v7517_v5 }
0x19ca   :  { %v7554_v40 = vadd.f32 %v7527_v56, %v2803_v31 }
0x19cb   :  { %v7557_v41 = vadd.f32 %v7527_v56, %v2802_v36 }
0x19cc   :  { %v2850_v42 = vsel %vm554_vm5, %v7554_v40, 0.0 }
0x19cd   :  { %2851 = vadd.xlane.f32.xlu1 %v2850_v42  ;;  %v2847_v43 = vsel %vm554_vm5, %v7557_v41, 0.0 }
0x19ce   :  { %2848 = vadd.xlane.f32.xlu0 %v2847_v43 }
0x19d1   :  { %v6775_v44 = vpop.eup %6774 }
0x19d2   :  { %v6777_v54 = vpop.eup %6776  ;;  %v2890_v46 = vmul.f32 %v6775_v44, %v2858_v15 }
0x19d3   :  { %v2889_v47 = vmul.f32 %v6777_v54, %v2857_v16 }
0x19d4   :  { %v2900_v49 = vmul.f32 %v5520_v45, %v2890_v46 }
0x19d5   :  { %v2899_v52 = vmul.f32 %v5520_v45, %v2889_v47 }
0x19d6   :  { %v2910_v55 = vadd.f32 %v5521_v48, %v2900_v49 }
0x19d7   :  { %v2909_v5 = vadd.f32 %v5521_v48, %v2899_v52 }
0x19d9   :  { %6041 = vmatprep.mubr.msk.f32.mxu1 %vm554_vm5, %v2909_v5 }
0x19da   :  { %6042 = vmatmul.mubr.msk.f32.vlgmr.msra.gmra.mrb[30].mxu1 %vm554_vm5, %v2910_v55 }
0x1a5a   :  { %v2852_v56 = vpop.xlane.xlu1 %2851 }
0x1a5b   :  { %v2856_v29 = vmul.f32 0.03125, %v2852_v56  ;;  %v2849_v32 = vpop.xlane.xlu0 %2848 }
0x1a5c   :  { %v2855_v38 = vmul.f32 0.03125, %v2849_v32 }
0x1a5d   :  { %v2860_v57 = vsub.f32 %v7554_v40, %v2856_v29 }
0x1a5e   :  { %v2859_v11 = vsub.f32 %v7557_v41, %v2855_v38 }
0x1a5f   :  { %v2864_v9 = vmul.f32 %v2860_v57, %v2860_v57 }
0x1a60   :  { %v2863_v59 = vmul.f32 %v2859_v11, %v2859_v11 }
0x1a61   :  { %v2874_v61 = vsel %vm554_vm5, %v2864_v9, 0.0 }
0x1a62   :  { %2875 = vadd.xlane.f32.xlu1 %v2874_v61  ;;  %v2871_v60 = vsel %vm554_vm5, %v2863_v59, 0.0 }
0x1a63   :  { %2872 = vadd.xlane.f32.xlu0 %v2871_v60 }
0x1aad   :  { %v7571_v62 = vpop.f32.mrb[30].mxu1 }
0x1aae   :  { %v7573_v0 = vpop.f32.mrb[31].mxu1 }
0x1aaf   :  { %v7577_v37 = vpack.i.bf16 %v7571_v62, %v7573_v0 }
0x1ab1   :  { %6610 = vrot.lane.b32.xlu1 %v7577_v37, %s6938_s5  ;;  %6605 = vrot.lane.b32.xlu0 %v7577_v37, %s6937_s0 }
0x1ab5   :  { %3210 = vrot.lane.b32.xlu1 %v7573_v0, %s6939_s9  ;;  %3212 = vrot.lane.b32.xlu0 %v7571_v62, %s6939_s9 }
0x1ab9   :  { %6615 = vrot.lane.b32.xlu1 %v7577_v37, %s6943_s25  ;;  %3414 = vrot.lane.b32.xlu0 %v7571_v62, %s6942_s21 }
0x1abd   :  { %3412 = vrot.lane.b32.xlu1 %v7573_v0, %s6942_s21 }
0x1aef   :  { %v2876_v1 = vpop.xlane.xlu1 %2875 }
0x1af0   :  { %v2880_v2 = vmul.f32 0.03125, %v2876_v1  ;;  %v2873_v3 = vpop.xlane.xlu0 %2872 }
0x1af1   :  { %v2879_v6 = vmul.f32 0.03125, %v2873_v3 }
0x1af2   :  { %v2884_v10 = vadd.f32 1e-05, %v2880_v2 }
0x1af3   :  { %v2883_v7 = vadd.f32 1e-05, %v2879_v6 }
0x1af4   :  { %6778 = vrsqrt.f32 %v2884_v10 }
0x1af5   :  { %6780 = vrsqrt.f32 %v2883_v7 }
0x1afe   :  { %v6779_v8 = vpop.eup %6778 }
0x1aff   :  { %v6781_v28 = vpop.eup %6780  ;;  %v2892_v12 = vmul.f32 %v6779_v8, %v2860_v57 }
0x1b00   :  { %v2891_v27 = vmul.f32 %v6781_v28, %v2859_v11 }
0x1b01   :  { %v2902_v13 = vmul.f32 %v5520_v45, %v2892_v12 }
0x1b02   :  { %v2901_v14 = vmul.f32 %v5520_v45, %v2891_v27 }
0x1b03   :  { %v2912_v16 = vadd.f32 %v5521_v48, %v2902_v13 }
0x1b04   :  { %v2911_v15 = vadd.f32 %v5521_v48, %v2901_v14 }
0x1b06   :  { %6044 = vmatprep.mubr.msk.f32.mxu1 %vm554_vm5, %v2911_v15 }
0x1b07   :  { %6045 = vmatmul.mubr.msk.f32.gmra.mrb[32].mxu1 %vm554_vm5, %v2912_v16 }
0x1b08   :  { %6051 = vmatprep.mubr.msk.f32.mxu1 %vm731_vm6, %v7573_v0 }
0x1b23   :  { %v6611_v17 = vpop.permute.xlu1 %6610  ;;  %v6606_v33 = vpop.permute.xlu0 %6605 }
0x1b24   :  { %v6613_v18 = vunpack.i.h.bf16 %v6611_v17  ;;  %v6612_v63 = vunpack.i.l.bf16 %v6611_v17  ;;  %v6608_v39 = vunpack.i.h.bf16 %v6606_v33  ;;  %v6607_v19 = vunpack.i.l.bf16 %v6606_v33 }
0x1b26   :  { %v6366_v51 = vpack.c.bf16 %v6613_v18, %v6612_v63  ;;  %v6356_v20 = vpack.c.bf16 %v6608_v39, %v6607_v19 }
0x1b27   :  { %v3211_v53 = vpop.permute.xlu1 %3210  ;;  %v3213_v23 = vpop.permute.xlu0 %3212 }
0x1b28   :  { %6358 = vmatprep.subr.msk.bf16.mxu1 %vm7242_vm7, %v6356_v20  ;;  %6368 = vmatprep.subr.msk.bf16.mxu0 %vm7242_vm7, %v6366_v51 }
0x1b29   :  { %6065 = vmatprep.mubr.msk.f32.mxu0 %vm731_vm6, %v3211_v53  ;;  %6361 = vmatpush3.bf16.xpose.msk.msra.mxu1 %vm7242_vm7, %v6356_v20 }
0x1b2a   :  { %6371 = vmatpush3.bf16.xpose.msk.msra.mxu0 %vm7242_vm7, %v6366_v51 }
0x1b2b   :  { %v6616_v50 = vpop.permute.xlu1 %6615  ;;  %v3415_v24 = vpop.permute.xlu0 %3414 }
0x1b2c   :  { %v6618_v21 = vunpack.i.h.bf16 %v6616_v50  ;;  %v6617_v22 = vunpack.i.l.bf16 %v6616_v50 }
0x1b2e   :  { %v6376_v26 = vpack.c.bf16 %v6618_v21, %v6617_v22 }
0x1b2f   :  { %v3413_v25 = vpop.permute.xlu1 %3412 }
0x1b30   :  { %6052 = vmatmul.mubr.msk.f32.vlgmr.msra.gmra.mrb[34].mxu1 %vm731_vm6, %v7571_v62  ;;  %6378 = vmatprep.subr.msk.bf16.mxu0 %vm7242_vm7, %v6376_v26 }
0x1b31   :  { %6066 = vmatmul.mubr.msk.f32.vlgmr.msra.gmra.mrb[34].mxu0 %vm731_vm6, %v3213_v23 }
0x1b32   :  { %6381 = vmatpush3.bf16.xpose.msk.msra.mxu0 %vm7242_vm7, %v6376_v26  ;;  %6079 = vmatprep.mubr.msk.f32.mxu0 %vm731_vm6, %v3413_v25 }
0x1b39   :  { %6080 = vmatmul.mubr.msk.f32.vlgmr.msra.gmra.mrb[36].mxu0 %vm731_vm6, %v3415_v24 }
0x1bda   :  { %v7615_v4 = vpop.f32.mrb[32].mxu1 }
0x1bdb   :  { %v7617_v31 = vpop.f32.mrb[33].mxu1 }
0x1bdc   :  { %v7621_v34 = vpack.i.bf16 %v7615_v4, %v7617_v31 }
0x1c03   :  { %v6053_v36 = vpop.f32.mrb[34].mxu1 }
0x1c04   :  { %v3100_v42 = vmul.f32 0.35355338, %v6053_v36  ;;  %v6067_v43 = vpop.f32.mrb[34].mxu0  ;;  %v3090_v44 = vpop.f32.mrb[35].mxu1 }
0x1c05   :  { %v3099_v45 = vmul.f32 0.35355338, %v3090_v44  ;;  %v3292_v54 = vpop.f32.mrb[35].mxu0  ;;  %v3302_v49 = vmul.f32 0.35355338, %v6067_v43 }
0x1c06   :  { %v3301_v46 = vmul.f32 0.35355338, %v3292_v54  ;;  %v3104_v47 = vsel %vm817_vm8, %v3100_v42, -inf }
0x1c07   :  { %3105 = vmax.xlane.f32.xlu0 %v3104_v47  ;;  %v3101_v48 = vsel %vm817_vm8, %v3099_v45, -inf  ;;  %v3306_v32 = vsel %vm817_vm8, %v3302_v49, -inf }
0x1c08   :  { %3102 = vmax.xlane.f32.xlu1 %v3101_v48  ;;  %v3303_v52 = vsel %vm817_vm8, %v3301_v46, -inf }
0x1c0b   :  { %3304 = vmax.xlane.f32.xlu0 %v3303_v52 }
0x1c0c   :  { %v6081_v5 = vpop.f32.mrb[36].mxu0 }
0x1c0d   :  { %v3494_v55 = vpop.f32.mrb[37].mxu0  ;;  %v3504_v56 = vmul.f32 0.35355338, %v6081_v5 }
0x1c0e   :  { %v3503_v29 = vmul.f32 0.35355338, %v3494_v55 }
0x1c0f   :  { %3307 = vmax.xlane.f32.xlu0 %v3306_v32  ;;  %v3508_v57 = vsel %vm817_vm8, %v3504_v56, -inf }
0x1c10   :  { %v3505_v38 = vsel %vm817_vm8, %v3503_v29, -inf }
0x1c11   :  { %3506 = vmax.xlane.f32.xlu1 %v3505_v38 }
0x1c13   :  { %3509 = vmax.xlane.f32.xlu0 %v3508_v57 }
0x1c22   :  { %6620 = vrot.lane.b32.xlu1 %v7577_v37, %s6940_s13 }
0x1c94   :  { %v3106_v11 = vpop.xlane.xlu0 %3105 }
0x1c95   :  { %v3108_v9 = vsub.f32 %v3100_v42, %v3106_v11  ;;  %v3103_v59 = vpop.xlane.xlu1 %3102 }
0x1c96   :  { %v3107_v61 = vsub.f32 %v3099_v45, %v3103_v59 }
0x1c97   :  { %v3111_v60 = vmul.f32 1.442695, %v3108_v9 }
0x1c98   :  { %v3109_v1 = vmul.f32 1.442695, %v3107_v61  ;;  %v3305_v2 = vpop.xlane.xlu0 %3304 }
0x1c99   :  { %6782 = vpow2.f32 %v3111_v60  ;;  %v3309_v3 = vsub.f32 %v3301_v46, %v3305_v2 }
0x1c9a   :  { %6784 = vpow2.f32 %v3109_v1 }
0x1c9b   :  { %v3311_v6 = vmul.f32 1.442695, %v3309_v3 }
0x1c9c   :  { %v3308_v10 = vpop.xlane.xlu0 %3307 }
0x1c9d   :  { %6786 = vpow2.f32 %v3311_v6  ;;  %v3310_v7 = vsub.f32 %v3302_v49, %v3308_v10 }
0x1c9e   :  { %v3507_v8 = vpop.xlane.xlu1 %3506 }
0x1c9f   :  { %v3313_v28 = vmul.f32 1.442695, %v3310_v7  ;;  %v3511_v22 = vsub.f32 %v3503_v29, %v3507_v8 }
0x1ca0   :  { %v3510_v12 = vpop.xlane.xlu0 %3509 }
0x1ca1   :  { %6788 = vpow2.f32 %v3313_v28  ;;  %v3512_v27 = vsub.f32 %v3504_v56, %v3510_v12  ;;  %v3513_v26 = vmul.f32 1.442695, %v3511_v22 }
0x1ca2   :  { %v6621_v13 = vpop.permute.xlu1 %6620 }
0x1ca3   :  { %v6783_v14 = vpop.eup %6782  ;;  %v3515_v15 = vmul.f32 1.442695, %v3512_v27  ;;  %v6623_v16 = vunpack.i.h.bf16 %v6621_v13  ;;  %v6622_v17 = vunpack.i.l.bf16 %v6621_v13 }
0x1ca4   :  { %v6785_v33 = vpop.eup %6784  ;;  %v3116_v18 = vsel %vm817_vm8, %v6783_v14, 0.0 }
0x1ca5   :  { %6790 = vpow2.f32 %v3515_v15  ;;  %v6362_v63 = vpack.c.bf16 %v6623_v16, %v6622_v17  ;;  %3117 = vadd.xlane.f32.xlu0 %v3116_v18  ;;  %v3113_v39 = vsel %vm817_vm8, %v6785_v33, 0.0 }
0x1ca6   :  { %3114 = vadd.xlane.f32.xlu1 %v3113_v39  ;;  %6792 = vpow2.f32 %v3513_v26 }
0x1ca7   :  { %v6787_v19 = vpop.eup %6786  ;;  %6363 = vmatprep.subr.bf16.mxu1 %v6362_v63 }
0x1ca8   :  { %6365 = vmatpush3.bf16.msra.mxu1 %v6362_v63  ;;  %v3315_v51 = vsel %vm817_vm8, %v6787_v19, 0.0 }
0x1caa   :  { %3316 = vadd.xlane.f32.xlu1 %v3315_v51 }
0x1cab   :  { %v6789_v20 = vpop.eup %6788 }
0x1cac   :  { %v3318_v53 = vsel %vm817_vm8, %v6789_v20, 0.0 }
0x1cad   :  { %3319 = vadd.xlane.f32.xlu0 %v3318_v53 }
0x1caf   :  { %v6791_v50 = vpop.eup %6790 }
0x1cb0   :  { %v3520_v21 = vsel %vm817_vm8, %v6791_v50, 0.0  ;;  %v6793_v25 = vpop.eup %6792 }
0x1cb1   :  { %3521 = vadd.xlane.f32.xlu0 %v3520_v21  ;;  %v3517_v23 = vsel %vm817_vm8, %v6793_v25, 0.0 }
0x1cbb   :  { %6630 = vrot.lane.b32.xlu1 %v7577_v37, %s6944_s27 }
0x1cbf   :  { %6635 = vrot.lane.b32.xlu1 %v7577_v37, %s6946_s23 }
0x1cc7   :  { %6625 = vrot.lane.b32.xlu0 %v7577_v37, %s6941_s17 }
0x1ccb   :  { %3616 = vrot.lane.b32.xlu0 %v7571_v62, %s6945_s22 }
0x1ce3   :  { %3518 = vadd.xlane.f32.xlu1 %v3517_v23 }
0x1cf4   :  { %3614 = vrot.lane.b32.xlu1 %v7573_v0, %s6945_s22 }
0x1d32   :  { %v3118_v24 = vpop.xlane.xlu0 %3117 }
0x1d33   :  { %6794 = vrcp.f32 %v3118_v24  ;;  %v3115_v36 = vpop.xlane.xlu1 %3114 }
0x1d34   :  { %6796 = vrcp.f32 %v3115_v36 }
0x1d37   :  { %v3317_v42 = vpop.xlane.xlu1 %3316 }
0x1d38   :  { %6798 = vrcp.f32 %v3317_v42 }
0x1d3a   :  { %v3320_v43 = vpop.xlane.xlu0 %3319 }
0x1d3b   :  { %6800 = vrcp.f32 %v3320_v43  ;;  %v6631_v45 = vpop.permute.xlu1 %6630 }
0x1d3c   :  { %v6633_v49 = vunpack.i.h.bf16 %v6631_v45  ;;  %v6632_v0 = vunpack.i.l.bf16 %v6631_v45 }
0x1d3d   :  { %v6795_v44 = vpop.eup %6794 }
0x1d3e   :  { %v6797_v62 = vpop.eup %6796  ;;  %v3522_v54 = vpop.xlane.xlu0 %3521  ;;  %v3122_v47 = vmul.f32 %v6795_v44, %v6783_v14  ;;  %v6382_v57 = vpack.c.bf16 %v6633_v49, %v6632_v0 }
0x1d3f   :  { %v3121_v46 = vmul.f32 %v6797_v62, %v6785_v33  ;;  %v6636_v29 = vpop.permute.xlu1 %6635  ;;  %6802 = vrcp.f32 %v3522_v54 }
0x1d40   :  { %v6638_v11 = vunpack.i.h.bf16 %v6636_v29  ;;  %v6637_v9 = vunpack.i.l.bf16 %v6636_v29 }
0x1d41   :  { %6058 = vmatprep.mubr.msk.f32.mxu1 %vm817_vm8, %v3121_v46 }
0x1d42   :  { %v6799_v48 = vpop.eup %6798  ;;  %v6626_v52 = vpop.permute.xlu0 %6625  ;;  %6059 = vmatmul.mubr.msk.f32.vlgmr.msra.gmra.mrb[36].mxu1 %vm817_vm8, %v3122_v47  ;;  %v6386_v61 = vpack.c.bf16 %v6638_v11, %v6637_v9 }
0x1d43   :  { %v6628_v5 = vunpack.i.h.bf16 %v6626_v52  ;;  %v6627_v55 = vunpack.i.l.bf16 %v6626_v52  ;;  %v3323_v56 = vmul.f32 %v6799_v48, %v6787_v19 }
0x1d45   :  { %v6372_v32 = vpack.c.bf16 %v6628_v5, %v6627_v55  ;;  %6072 = vmatprep.mubr.msk.f32.mxu1 %vm817_vm8, %v3323_v56  ;;  %v6801_v38 = vpop.eup %6800 }
0x1d46   :  { %v3324_v59 = vmul.f32 %v6801_v38, %v6789_v20  ;;  %v3617_v7 = vpop.permute.xlu0 %3616 }
0x1d47   :  { %6373 = vmatprep.subr.bf16.mxu1 %v6372_v32 }
0x1d48   :  { %6375 = vmatpush3.bf16.msra.mxu1 %v6372_v32 }
0x1d49   :  { %6383 = vmatprep.subr.bf16.mxu1 %v6382_v57  ;;  %v6803_v1 = vpop.eup %6802 }
0x1d4a   :  { %v3526_v6 = vmul.f32 %v6803_v1, %v6791_v50 }
0x1d4b   :  { %6073 = vmatmul.mubr.msk.f32.vlgmr.msra.gmra.mrb[38].mxu1 %vm817_vm8, %v3324_v59 }
0x1d4c   :  { %6385 = vmatpush3.bf16.msra.mxu1 %v6382_v57 }
0x1d4d   :  { %6388 = vmatprep.subr.msk.bf16.mxu1 %vm7242_vm7, %v6386_v61 }
0x1d70   :  { %v3519_v60 = vpop.xlane.xlu1 %3518 }
0x1d71   :  { %6804 = vrcp.f32 %v3519_v60 }
0x1d74   :  { %v3615_v10 = vpop.permute.xlu1 %3614 }
0x1d7b   :  { %v6805_v2 = vpop.eup %6804 }
0x1d7c   :  { %v3525_v3 = vmul.f32 %v6805_v2, %v6793_v25 }
0x1d7e   :  { %6086 = vmatprep.mubr.msk.f32.mxu1 %vm817_vm8, %v3525_v3 }
0x1d7f   :  { %6087 = vmatmul.mubr.msk.f32.vlgmr.msra.gmra.mrb[40].mxu1 %vm817_vm8, %v3526_v6 }
0x1d80   :  { %6391 = vmatpush3.bf16.xpose.msk.msra.mxu1 %vm7242_vm7, %v6386_v61  ;;  %6093 = vmatprep.mubr.msk.f32.mxu1 %vm731_vm6, %v3615_v10 }
0x1d87   :  { %6094 = vmatmul.mubr.msk.f32.vlgmr.msra.gmra.mrb[42].mxu1 %vm731_vm6, %v3617_v7 }
0x1e15   :  { %v7659_v8 = vpop.f32.mrb[36].mxu1 }
0x1e16   :  { %v7661_v28 = vpop.f32.mrb[37].mxu1 }
0x1e1e   :  { %v7663_v12 = vpop.f32.mrb[38].mxu1 }
0x1e1f   :  { %v7665_v27 = vpop.f32.mrb[39].mxu1 }
0x1e52   :  { %v7667_v13 = vpop.f32.mrb[40].mxu1 }
0x1e53   :  { %v7669_v14 = vpop.f32.mrb[41].mxu1 }
0x1e5a   :  { %v6095_v15 = vpop.f32.mrb[42].mxu1 }
0x1e5b   :  { %v3706_v16 = vmul.f32 0.35355338, %v6095_v15  ;;  %v3696_v17 = vpop.f32.mrb[43].mxu1 }
0x1e5c   :  { %v3705_v33 = vmul.f32 0.35355338, %v3696_v17 }
0x1e5d   :  { %v3710_v18 = vsel %vm817_vm8, %v3706_v16, -inf }
0x1e5e   :  { %3711 = vmax.xlane.f32.xlu0 %v3710_v18  ;;  %v3707_v63 = vsel %vm817_vm8, %v3705_v33, -inf }
0x1e5f   :  { %3708 = vmax.xlane.f32.xlu1 %v3707_v63 }
0x1e70   :  { %6640 = vrot.lane.b32.xlu1 %v7577_v37, %s6947_s26 }
0x1eeb   :  { %v3712_v39 = vpop.xlane.xlu0 %3711 }
0x1eec   :  { %v3714_v19 = vsub.f32 %v3706_v16, %v3712_v39  ;;  %v3709_v51 = vpop.xlane.xlu1 %3708 }
0x1eed   :  { %v3713_v20 = vsub.f32 %v3705_v33, %v3709_v51 }
0x1eee   :  { %v3717_v53 = vmul.f32 1.442695, %v3714_v19 }
0x1eef   :  { %v3715_v50 = vmul.f32 1.442695, %v3713_v20 }
0x1ef0   :  { %6806 = vpow2.f32 %v3717_v53  ;;  %v6641_v21 = vpop.permute.xlu1 %6640 }
0x1ef1   :  { %v6643_v22 = vunpack.i.h.bf16 %v6641_v21  ;;  %v6642_v26 = vunpack.i.l.bf16 %v6641_v21  ;;  %6808 = vpow2.f32 %v3715_v50 }
0x1ef3   :  { %v6392_v25 = vpack.c.bf16 %v6643_v22, %v6642_v26 }
0x1ef5   :  { %6393 = vmatprep.subr.bf16.mxu0 %v6392_v25 }
0x1ef6   :  { %6395 = vmatpush3.bf16.msra.mxu0 %v6392_v25 }
0x1efa   :  { %v6807_v23 = vpop.eup %6806 }
0x1efb   :  { %v3722_v24 = vsel %vm817_vm8, %v6807_v23, 0.0  ;;  %v6809_v36 = vpop.eup %6808 }
0x1efc   :  { %3723 = vadd.xlane.f32.xlu0 %v3722_v24  ;;  %v3719_v37 = vsel %vm817_vm8, %v6809_v36, 0.0 }
0x1f00   :  { %3720 = vadd.xlane.f32.xlu0 %v3719_v37 }
0x1f16   :  { %6645 = vrot.lane.b32.xlu0 %v7621_v34, %s6937_s0 }
0x1f89   :  { %v3724_v42 = vpop.xlane.xlu0 %3723 }
0x1f8a   :  { %6810 = vrcp.f32 %v3724_v42 }
0x1f8d   :  { %v3721_v43 = vpop.xlane.xlu0 %3720 }
0x1f8e   :  { %6812 = vrcp.f32 %v3721_v43 }
0x1f91   :  { %v6646_v44 = vpop.permute.xlu0 %6645 }
0x1f92   :  { %v6648_v62 = vunpack.i.h.bf16 %v6646_v44  ;;  %v6647_v45 = vunpack.i.l.bf16 %v6646_v44 }
0x1f94   :  { %v6396_v54 = vpack.c.bf16 %v6648_v62, %v6647_v45  ;;  %v6811_v46 = vpop.eup %6810 }
0x1f95   :  { %v3728_v49 = vmul.f32 %v6811_v46, %v6807_v23 }
0x1f96   :  { %6398 = vmatprep.subr.msk.bf16.mxu0 %vm7242_vm7, %v6396_v54 }
0x1f98   :  { %v6813_v47 = vpop.eup %6812 }
0x1f99   :  { %v3727_v48 = vmul.f32 %v6813_v47, %v6809_v36 }
0x1f9b   :  { %6100 = vmatprep.mubr.msk.f32.mxu0 %vm817_vm8, %v3727_v48 }
0x1f9c   :  { %6101 = vmatmul.mubr.msk.f32.vlgmr.msra.gmra.mrb[38].mxu0 %vm817_vm8, %v3728_v49 }
0x1f9d   :  { %6401 = vmatpush3.bf16.xpose.msk.msra.mxu0 %vm7242_vm7, %v6396_v54  ;;  %6107 = vmatprep.mubr.msk.f32.mxu0 %vm731_vm6, %v7617_v31 }
0x1fa4   :  { %6108 = vmatmul.mubr.msk.f32.vlgmr.msra.gmra.mrb[40].mxu0 %vm731_vm6, %v7615_v4 }
0x206f   :  { %v7689_v52 = vpop.f32.mrb[38].mxu0 }
0x2070   :  { %v7691_v0 = vpop.f32.mrb[39].mxu0 }
0x2077   :  { %v6109_v5 = vpop.f32.mrb[40].mxu0 }
0x2078   :  { %v3936_v55 = vmul.f32 0.35355338, %v6109_v5  ;;  %v3926_v56 = vpop.f32.mrb[41].mxu0 }
0x2079   :  { %v3935_v29 = vmul.f32 0.35355338, %v3926_v56 }
0x207a   :  { %v3940_v32 = vsel %vm817_vm8, %v3936_v55, -inf }
0x207b   :  { %3941 = vmax.xlane.f32.xlu0 %v3940_v32  ;;  %v3937_v38 = vsel %vm817_vm8, %v3935_v29, -inf }
0x207c   :  { %3938 = vmax.xlane.f32.xlu1 %v3937_v38 }
0x208d   :  { %6650 = vrot.lane.b32.xlu1 %v7621_v34, %s6940_s13 }
0x2091   :  { %4046 = vrot.lane.b32.xlu1 %v7617_v31, %s6939_s9 }
0x2108   :  { %v3942_v57 = vpop.xlane.xlu0 %3941 }
0x2109   :  { %v3944_v11 = vsub.f32 %v3936_v55, %v3942_v57  ;;  %v3939_v9 = vpop.xlane.xlu1 %3938 }
0x210a   :  { %v3943_v59 = vsub.f32 %v3935_v29, %v3939_v9 }
0x210b   :  { %v3947_v61 = vmul.f32 1.442695, %v3944_v11 }
0x210c   :  { %v3945_v60 = vmul.f32 1.442695, %v3943_v59 }
0x210d   :  { %6814 = vpow2.f32 %v3947_v61  ;;  %v6651_v1 = vpop.permute.xlu1 %6650 }
0x210e   :  { %6816 = vpow2.f32 %v3945_v60  ;;  %v6653_v2 = vunpack.i.h.bf16 %v6651_v1  ;;  %v6652_v3 = vunpack.i.l.bf16 %v6651_v1 }
0x2110   :  { %v6402_v6 = vpack.c.bf16 %v6653_v2, %v6652_v3 }
0x2111   :  { %v4047_v17 = vpop.permute.xlu1 %4046 }
0x2112   :  { %6403 = vmatprep.subr.bf16.mxu1 %v6402_v6 }
0x2113   :  { %6405 = vmatpush3.bf16.msra.mxu1 %v6402_v6 }
0x2117   :  { %v6815_v10 = vpop.eup %6814 }
0x2118   :  { %v6817_v7 = vpop.eup %6816  ;;  %v3952_v15 = vsel %vm817_vm8, %v6815_v10, 0.0 }
0x2119   :  { %3953 = vadd.xlane.f32.xlu0 %v3952_v15  ;;  %v3949_v16 = vsel %vm817_vm8, %v6817_v7, 0.0 }
0x211a   :  { %3950 = vadd.xlane.f32.xlu1 %v3949_v16 }
0x212b   :  { %4048 = vrot.lane.b32.xlu1 %v7615_v4, %s6939_s9 }
0x212f   :  { %6655 = vrot.lane.b32.xlu0 %v7621_v34, %s6938_s5 }
0x21a6   :  { %v3954_v33 = vpop.xlane.xlu0 %3953 }
0x21a7   :  { %6818 = vrcp.f32 %v3954_v33  ;;  %v3951_v18 = vpop.xlane.xlu1 %3950 }
0x21a8   :  { %6820 = vrcp.f32 %v3951_v18 }
0x21aa   :  { %v6656_v63 = vpop.permute.xlu0 %6655 }
0x21ab   :  { %v6658_v39 = vunpack.i.h.bf16 %v6656_v63  ;;  %v6657_v19 = vunpack.i.l.bf16 %v6656_v63  ;;  %v4049_v22 = vpop.permute.xlu1 %4048 }
0x21ad   :  { %v6406_v51 = vpack.c.bf16 %v6658_v39, %v6657_v19 }
0x21af   :  { %6408 = vmatprep.subr.msk.bf16.mxu1 %vm7242_vm7, %v6406_v51 }
0x21b1   :  { %v6819_v20 = vpop.eup %6818 }
0x21b2   :  { %v6821_v53 = vpop.eup %6820  ;;  %v3958_v21 = vmul.f32 %v6819_v20, %v6815_v10 }
0x21b3   :  { %v3957_v50 = vmul.f32 %v6821_v53, %v6817_v7 }
0x21b5   :  { %6114 = vmatprep.mubr.msk.f32.mxu1 %vm817_vm8, %v3957_v50 }
0x21b6   :  { %6115 = vmatmul.mubr.msk.f32.vlgmr.msra.gmra.mrb[44].mxu1 %vm817_vm8, %v3958_v21 }
0x21b7   :  { %6411 = vmatpush3.bf16.xpose.msk.msra.mxu1 %vm7242_vm7, %v6406_v51  ;;  %6121 = vmatprep.mubr.msk.f32.mxu1 %vm731_vm6, %v4047_v17 }
0x21be   :  { %6122 = vmatmul.mubr.msk.f32.vlgmr.msra.gmra.mrb[46].mxu1 %vm731_vm6, %v4049_v22 }
0x2289   :  { %v7713_v26 = vpop.f32.mrb[44].mxu1 }
0x228a   :  { %v7715_v25 = vpop.f32.mrb[45].mxu1 }
0x2291   :  { %v6123_v23 = vpop.f32.mrb[46].mxu1 }
0x2292   :  { %v4138_v24 = vmul.f32 0.35355338, %v6123_v23  ;;  %v4128_v36 = vpop.f32.mrb[47].mxu1 }
0x2293   :  { %v4137_v37 = vmul.f32 0.35355338, %v4128_v36 }
0x2294   :  { %v4142_v42 = vsel %vm817_vm8, %v4138_v24, -inf }
0x2295   :  { %4143 = vmax.xlane.f32.xlu0 %v4142_v42  ;;  %v4139_v43 = vsel %vm817_vm8, %v4137_v37, -inf }
0x2296   :  { %4140 = vmax.xlane.f32.xlu1 %v4139_v43 }
0x22a7   :  { %6660 = vrot.lane.b32.xlu1 %v7621_v34, %s6941_s17 }
0x22ab   :  { %4248 = vrot.lane.b32.xlu1 %v7617_v31, %s6942_s21 }
0x22af   :  { %4250 = vrot.lane.b32.xlu1 %v7615_v4, %s6942_s21 }
0x2322   :  { %v4144_v44 = vpop.xlane.xlu0 %4143 }
0x2323   :  { %v4146_v62 = vsub.f32 %v4138_v24, %v4144_v44  ;;  %v4141_v45 = vpop.xlane.xlu1 %4140 }
0x2324   :  { %v4145_v54 = vsub.f32 %v4137_v37, %v4141_v45 }
0x2325   :  { %v4149_v46 = vmul.f32 1.442695, %v4146_v62 }
0x2326   :  { %v4147_v47 = vmul.f32 1.442695, %v4145_v54 }
0x2327   :  { %6822 = vpow2.f32 %v4149_v46  ;;  %v6661_v48 = vpop.permute.xlu1 %6660 }
0x2328   :  { %v6663_v49 = vunpack.i.h.bf16 %v6661_v48  ;;  %v6662_v5 = vunpack.i.l.bf16 %v6661_v48  ;;  %6824 = vpow2.f32 %v4147_v47 }
0x232a   :  { %v6412_v55 = vpack.c.bf16 %v6663_v49, %v6662_v5 }
0x232b   :  { %v4249_v10 = vpop.permute.xlu1 %4248 }
0x232c   :  { %6413 = vmatprep.subr.bf16.mxu0 %v6412_v55 }
0x232d   :  { %6415 = vmatpush3.bf16.msra.mxu0 %v6412_v55 }
0x232f   :  { %v4251_v7 = vpop.permute.xlu1 %4250 }
0x2331   :  { %v6823_v56 = vpop.eup %6822 }
0x2332   :  { %v4154_v29 = vsel %vm817_vm8, %v6823_v56, 0.0  ;;  %v6825_v32 = vpop.eup %6824 }
0x2333   :  { %4155 = vadd.xlane.f32.xlu0 %v4154_v29  ;;  %v4151_v38 = vsel %vm817_vm8, %v6825_v32, 0.0 }
0x2337   :  { %4152 = vadd.xlane.f32.xlu0 %v4151_v38 }
0x234d   :  { %6665 = vrot.lane.b32.xlu0 %v7621_v34, %s6943_s25 }
0x23c0   :  { %v4156_v57 = vpop.xlane.xlu0 %4155 }
0x23c1   :  { %6826 = vrcp.f32 %v4156_v57 }
0x23c4   :  { %v4153_v11 = vpop.xlane.xlu0 %4152 }
0x23c5   :  { %6828 = vrcp.f32 %v4153_v11 }
0x23c8   :  { %v6666_v9 = vpop.permute.xlu0 %6665 }
0x23c9   :  { %v6668_v59 = vunpack.i.h.bf16 %v6666_v9  ;;  %v6667_v61 = vunpack.i.l.bf16 %v6666_v9 }
0x23cb   :  { %v6416_v60 = vpack.c.bf16 %v6668_v59, %v6667_v61  ;;  %v6827_v1 = vpop.eup %6826 }
0x23cc   :  { %v4160_v6 = vmul.f32 %v6827_v1, %v6823_v56 }
0x23cd   :  { %6418 = vmatprep.subr.msk.bf16.mxu0 %vm7242_vm7, %v6416_v60 }
0x23cf   :  { %v6829_v2 = vpop.eup %6828 }
0x23d0   :  { %v4159_v3 = vmul.f32 %v6829_v2, %v6825_v32 }
0x23d2   :  { %6128 = vmatprep.mubr.msk.f32.mxu0 %vm817_vm8, %v4159_v3 }
0x23d3   :  { %6129 = vmatmul.mubr.msk.f32.vlgmr.msra.gmra.mrb[42].mxu0 %vm817_vm8, %v4160_v6 }
0x23d4   :  { %6421 = vmatpush3.bf16.xpose.msk.msra.mxu0 %vm7242_vm7, %v6416_v60  ;;  %6135 = vmatprep.mubr.msk.f32.mxu0 %vm731_vm6, %v4249_v10 }
0x23db   :  { %6136 = vmatmul.mubr.msk.f32.vlgmr.msra.gmra.mrb[44].mxu0 %vm731_vm6, %v4251_v7 }
0x24a6   :  { %v7737_v15 = vpop.f32.mrb[42].mxu0 }
0x24a7   :  { %v7739_v16 = vpop.f32.mrb[43].mxu0 }
0x24ae   :  { %v6137_v17 = vpop.f32.mrb[44].mxu0 }
0x24af   :  { %v4340_v33 = vmul.f32 0.35355338, %v6137_v17  ;;  %v4330_v18 = vpop.f32.mrb[45].mxu0 }
0x24b0   :  { %v4339_v63 = vmul.f32 0.35355338, %v4330_v18  ;;  %v2821_v18 = vld [vmem:[%s7936_s14 + $0x8] sm:$0xff] }
0x24b1   :  { %v4344_v39 = vsel %vm817_vm8, %v4340_v33, -inf }
0x24b2   :  { %4345 = vmax.xlane.f32.xlu0 %v4344_v39  ;;  %v4341_v19 = vsel %vm817_vm8, %v4339_v63, -inf }
0x24b3   :  { %4342 = vmax.xlane.f32.xlu1 %v4341_v19 }
0x24c4   :  { %6670 = vrot.lane.b32.xlu1 %v7621_v34, %s6944_s27 }
0x24c8   :  { %4450 = vrot.lane.b32.xlu1 %v7617_v31, %s6945_s22 }
0x24cc   :  { %4452 = vrot.lane.b32.xlu1 %v7615_v4, %s6945_s22 }
0x253f   :  { %v4346_v51 = vpop.xlane.xlu0 %4345 }
0x2540   :  { %v4348_v20 = vsub.f32 %v4340_v33, %v4346_v51  ;;  %v4343_v53 = vpop.xlane.xlu1 %4342  ;;  %v2820_v33 = vld [vmem:[%s7936_s14] sm:$0xff] }
0x2541   :  { %v4347_v50 = vsub.f32 %v4339_v63, %v4343_v53  ;;  %v6436_v63 = vpack.c.bf16 %v2821_v18, %v2820_v33 }
0x2542   :  { %v4351_v21 = vmul.f32 1.442695, %v4348_v20 }
0x2543   :  { %v4349_v22 = vmul.f32 1.442695, %v4347_v50 }
0x2544   :  { %6830 = vpow2.f32 %v4351_v21  ;;  %v6671_v23 = vpop.permute.xlu1 %6670  ;;  %v2822_v21 = vld [vmem:[%s7936_s14 + $0x10] sm:$0xff] }
0x2545   :  { %v6673_v24 = vunpack.i.h.bf16 %v6671_v23  ;;  %v6672_v36 = vunpack.i.l.bf16 %v6671_v23  ;;  %6832 = vpow2.f32 %v4349_v22  ;;  %v2823_v22 = vld [vmem:[%s7936_s14 + $0x18] sm:$0xff] }
0x2547   :  { %v6422_v37 = vpack.c.bf16 %v6673_v24, %v6672_v36 }
0x2548   :  { %v4451_v56 = vpop.permute.xlu1 %4450 }
0x2549   :  { %6423 = vmatprep.subr.bf16.mxu1 %v6422_v37 }
0x254a   :  { %6425 = vmatpush3.bf16.msra.mxu1 %v6422_v37  ;;  %v6440_v37 = vpack.c.bf16 %v2823_v22, %v2822_v21 }
0x254c   :  { %v4453_v29 = vpop.permute.xlu1 %4452 }
0x254e   :  { %v6831_v42 = vpop.eup %6830 }
0x254f   :  { %v4356_v31 = vsel %vm817_vm8, %v6831_v42, 0.0  ;;  %v6833_v43 = vpop.eup %6832 }
0x2550   :  { %4357 = vadd.xlane.f32.xlu0 %v4356_v31  ;;  %v4353_v4 = vsel %vm817_vm8, %v6833_v43, 0.0 }
0x2554   :  { %4354 = vadd.xlane.f32.xlu0 %v4353_v4 }
0x256a   :  { %6675 = vrot.lane.b32.xlu0 %v7621_v34, %s6946_s23 }
0x25dd   :  { %v4358_v44 = vpop.xlane.xlu0 %4357 }
0x25de   :  { %6834 = vrcp.f32 %v4358_v44 }
0x25e1   :  { %v4355_v62 = vpop.xlane.xlu0 %4354 }
0x25e2   :  { %6836 = vrcp.f32 %v4355_v62 }
0x25e5   :  { %v6676_v45 = vpop.permute.xlu0 %6675 }
0x25e6   :  { %v6678_v54 = vunpack.i.h.bf16 %v6676_v45  ;;  %v6677_v46 = vunpack.i.l.bf16 %v6676_v45 }
0x25e8   :  { %v6426_v47 = vpack.c.bf16 %v6678_v54, %v6677_v46  ;;  %v6835_v48 = vpop.eup %6834 }
0x25e9   :  { %v4362_v55 = vmul.f32 %v6835_v48, %v6831_v42 }
0x25ea   :  { %6428 = vmatprep.subr.msk.bf16.mxu1 %vm7242_vm7, %v6426_v47 }
0x25ec   :  { %v6837_v49 = vpop.eup %6836 }
0x25ed   :  { %v4361_v5 = vmul.f32 %v6837_v49, %v6833_v43 }
0x25ef   :  { %6142 = vmatprep.mubr.msk.f32.mxu1 %vm817_vm8, %v4361_v5 }
0x25f0   :  { %6143 = vmatmul.mubr.msk.f32.vlgmr.msra.gmra.mrb[48].mxu1 %vm817_vm8, %v4362_v55 }
0x25f1   :  { %6431 = vmatpush3.bf16.xpose.msk.msra.mxu1 %vm7242_vm7, %v6426_v47  ;;  %6149 = vmatprep.mubr.msk.f32.mxu1 %vm731_vm6, %v4451_v56  ;;  %v5574_v47 = vld [vmem:[%s7937_s19] ss:$0 sm:$0xff] }
0x25f8   :  { %6150 = vmatmul.mubr.msk.f32.vlgmr.msra.gmra.mrb[50].mxu1 %vm731_vm6, %v4453_v29 }
0x26c3   :  { %v6144_v32 = vpop.f32.mrb[48].mxu1 }
0x26c4   :  { %v4441_v38 = vpop.f32.mrb[49].mxu1 }
0x26cb   :  { %v6151_v57 = vpop.f32.mrb[50].mxu1 }
0x26cc   :  { %v4542_v11 = vmul.f32 0.35355338, %v6151_v57  ;;  %v4532_v9 = vpop.f32.mrb[51].mxu1 }
0x26cd   :  { %v4541_v59 = vmul.f32 0.35355338, %v4532_v9 }
0x26ce   :  { %v4546_v61 = vsel %vm817_vm8, %v4542_v11, -inf }
0x26cf   :  { %4547 = vmax.xlane.f32.xlu0 %v4546_v61  ;;  %v4543_v60 = vsel %vm817_vm8, %v4541_v59, -inf }
0x26d0   :  { %4544 = vmax.xlane.f32.xlu1 %v4543_v60 }
0x26e1   :  { %6680 = vrot.lane.b32.xlu1 %v7621_v34, %s6947_s26 }
0x26e5   :  { %3820 = vrot.lane.b32.xlu1 %v7663_v12, %s6948_s1 }
0x26e9   :  { %3826 = vrot.lane.b32.xlu1 %v7669_v14, %s6949_s28 }
0x26ed   :  { %3828 = vrot.lane.b32.xlu1 %v7667_v13, %s6949_s28 }
0x26f1   :  { %3836 = vrot.lane.b32.xlu1 %v7689_v52, %s6950_s2 }
0x26f5   :  { %4656 = vrot.lane.b32.xlu1 %v7737_v15, %s6948_s1 }
0x26f9   :  { %4664 = vrot.lane.b32.xlu1 %v6144_v32, %s6949_s28 }
0x275c   :  { %v4548_v35 = vpop.xlane.xlu0 %4547 }
0x275d   :  { %v4550_v1 = vsub.f32 %v4542_v11, %v4548_v35  ;;  %v4545_v34 = vpop.xlane.xlu1 %4544 }
0x275e   :  { %v4549_v2 = vsub.f32 %v4541_v59, %v4545_v34 }
0x275f   :  { %v4553_v3 = vmul.f32 1.442695, %v4550_v1 }
0x2760   :  { %v4551_v12 = vmul.f32 1.442695, %v4549_v2 }
0x2761   :  { %v6681_v6 = vpop.permute.xlu1 %6680 }
0x2762   :  { %6838 = vpow2.f32 %v4551_v12  ;;  %v6683_v14 = vunpack.i.h.bf16 %v6681_v6  ;;  %v6682_v13 = vunpack.i.l.bf16 %v6681_v6 }
0x2763   :  { %6840 = vpow2.f32 %v4553_v3 }
0x2764   :  { %v6432_v10 = vpack.c.bf16 %v6683_v14, %v6682_v13 }
0x2765   :  { %v3821_v19 = vpop.permute.xlu1 %3820 }
0x2766   :  { %6433 = vmatprep.subr.bf16.mxu0 %v6432_v10 }
0x2767   :  { %6435 = vmatpush3.bf16.msra.mxu0 %v6432_v10 }
0x2768   :  { %6437 = vmatprep.subr.bf16.mxu0 %v6436_v63 }
0x2769   :  { %v3827_v20 = vpop.permute.xlu1 %3826 }
0x276c   :  { %v6839_v52 = vpop.eup %6838 }
0x276d   :  { %v4555_v7 = vsel %vm817_vm8, %v6839_v52, 0.0  ;;  %v6841_v15 = vpop.eup %6840  ;;  %v3829_v24 = vpop.permute.xlu1 %3828 }
0x276e   :  { %4556 = vadd.xlane.f32.xlu0 %v4555_v7  ;;  %v4558_v17 = vsel %vm817_vm8, %v6841_v15, 0.0 }
0x2771   :  { %v3837_v43 = vpop.permute.xlu1 %3836 }
0x2772   :  { %4559 = vadd.xlane.f32.xlu0 %v4558_v17 }
0x2775   :  { %v4657_v29 = vpop.permute.xlu1 %4656 }
0x2776   :  { %v4677_v59 = vsel %vm731_vm6, %v7713_v26, %v4657_v29 }
0x2788   :  { %3818 = vrot.lane.b32.xlu0 %v7665_v27, %s6948_s1 }
0x278c   :  { %3834 = vrot.lane.b32.xlu0 %v7691_v0, %s6950_s2 }
0x2790   :  { %4654 = vrot.lane.b32.xlu0 %v7739_v16, %s6948_s1 }
0x2794   :  { %4662 = vrot.lane.b32.xlu0 %v4441_v38, %s6949_s28  ;;  %v4665_v38 = vpop.permute.xlu1 %4664 }
0x2795   :  { %v4679_v61 = vsel %vm817_vm8, %v4677_v59, %v4665_v38  ;;  %v2835_v38 = vld [vmem:[%s7941_s10 + $0x18] sm:$0xff] }
0x27fb   :  { %v4557_v39 = vpop.xlane.xlu0 %4556 }
0x27fc   :  { %6842 = vrcp.f32 %v4557_v39  ;;  %v2827_v39 = vld [vmem:[%s7938_s24] sm:$0xff] }
0x27ff   :  { %v4560_v51 = vpop.xlane.xlu0 %4559 }
0x2800   :  { %6844 = vrcp.f32 %v4560_v51  ;;  %v2829_v51 = vld [vmem:[%s7938_s24 + $0x10] sm:$0xff] }
0x2803   :  { %v3819_v27 = vpop.permute.xlu0 %3818 }
0x2804   :  { %v3840_v0 = vsel %vm731_vm6, %v7661_v28, %v3819_v27  ;;  %v3841_v28 = vsel %vm731_vm6, %v7659_v8, %v3821_v19  ;;  %v2828_v19 = vld [vmem:[%s7938_s24 + $0x8] sm:$0xff] }
0x2805   :  { %v3842_v42 = vsel %vm817_vm8, %v3840_v0, %v3827_v20  ;;  %v3843_v4 = vsel %vm817_vm8, %v3841_v28, %v3829_v24  ;;  %v6444_v27 = vpack.c.bf16 %v2828_v19, %v2827_v39  ;;  %v2830_v20 = vld [vmem:[%s7938_s24 + $0x18] sm:$0xff] }
0x2806   :  { %v6843_v53 = vpop.eup %6842  ;;  %v3845_v44 = vsel %vm1561_vm9, %v3843_v4, %v3837_v43 }
0x2807   :  { %v4563_v50 = vmul.f32 %v6843_v53, %v6839_v52  ;;  %v3835_v16 = vpop.permute.xlu0 %3834  ;;  %v6448_v53 = vpack.c.bf16 %v2830_v20, %v2829_v51  ;;  %6445 = vmatprep.subr.bf16.mxu1 %v6444_v27 }
0x2808   :  { %v3844_v31 = vsel %vm1561_vm9, %v3842_v42, %v3835_v16  ;;  %6447 = vmatpush3.bf16.msra.mxu1 %v6444_v27 }
0x2809   :  { %6156 = vmatprep.mubr.msk.f32.mxu0 %vm817_vm8, %v4563_v50  ;;  %6449 = vmatprep.subr.bf16.mxu1 %v6448_v53 }
0x280a   :  { %v6845_v23 = vpop.eup %6844 }
0x280b   :  { %v4564_v36 = vmul.f32 %v6845_v23, %v6841_v15  ;;  %v4655_v32 = vpop.permute.xlu0 %4654 }
0x280c   :  { %v4676_v11 = vsel %vm731_vm6, %v7715_v25, %v4655_v32  ;;  %6451 = vmatpush3.bf16.msra.mxu1 %v6448_v53  ;;  %v2834_v32 = vld [vmem:[%s7941_s10 + $0x10] sm:$0xff] }
0x280d   :  { %6157 = vmatmul.mubr.msk.f32.vlgmr.msra.gmra.mrb[46].mxu0 %vm817_vm8, %v4564_v36 }
0x280e   :  { %6439 = vmatpush3.bf16.msra.mxu0 %v6436_v63  ;;  %6167 = vmatprep.mubr.msk.f32.mxu0 %vm554_vm5, %v3844_v31 }
0x280f   :  { %6441 = vmatprep.subr.bf16.mxu0 %v6440_v37  ;;  %v4663_v57 = vpop.permute.xlu0 %4662 }
0x2812   :  { %6443 = vmatpush3.bf16.msra.mxu0 %v6440_v37 }
0x2815   :  { %6168 = vmatmul.mubr.msk.f32.vlgmr.msra.gmra.mrb[48].mxu0 %vm554_vm5, %v3845_v44 }
0x28e0   :  { %v6158_v62 = vpop.f32.mrb[46].mxu0 }
0x28e1   :  { %4672 = vrot.lane.b32.xlu1 %v6158_v62, %s6950_s2  ;;  %v4643_v45 = vpop.f32.mrb[47].mxu0 }
0x28e2   :  { %4670 = vrot.lane.b32.xlu0 %v4643_v45, %s6950_s2  ;;  %v5579_v45 = vld [vmem:[%s7939_s30] ss:$0 sm:$0xff] }
0x28e8   :  { %v6169_v54 = vpop.f32.mrb[48].mxu0 }
0x28e9   :  { %v4766_v46 = vpop.f32.mrb[49].mxu0  ;;  %v4772_v49 = vadd.f32 %v6169_v54, %v5574_v47 }
0x28ea   :  { %v4767_v48 = vadd.f32 %v5574_v47, %v4766_v46 }
0x28eb   :  { %v4786_v5 = vadd.f32 %v4772_v49, %v7532_v30 }
0x28ec   :  { %v4785_v8 = vadd.f32 %v4767_v48, %v7535_v58  ;;  %v4678_v58 = vsel %vm817_vm8, %v4676_v11, %v4663_v57  ;;  %v5580_v48 = vld [vmem:[%s7940_s6] ss:$0 sm:$0xff]  ;;  %v6456_v57 = vpack.c.bf16 %v2835_v38, %v2834_v32 }
0x28ed   :  { %v4792_v56 = vsel %vm554_vm5, %v4786_v5, 0.0  ;;  %v2836_v11 = vld [vmem:[%s7941_s10 + $0x20] sm:$0xff] }
0x28ee   :  { %v4789_v55 = vsel %vm554_vm5, %v4785_v8, 0.0 }
0x2901   :  { %4790 = vadd.xlane.f32.xlu0 %v4789_v55  ;;  %v2832_v55 = vld [vmem:[%s7941_s10] sm:$0xff] }
0x2905   :  { %4793 = vadd.xlane.f32.xlu1 %v4792_v56  ;;  %v2833_v56 = vld [vmem:[%s7941_s10 + $0x8] sm:$0xff] }
0x2906   :  { %v6452_v29 = vpack.c.bf16 %v2833_v56, %v2832_v55 }
0x2908   :  { %6453 = vmatprep.subr.bf16.mxu0 %v6452_v29 }
0x2909   :  { %6455 = vmatpush3.bf16.msra.mxu0 %v6452_v29 }
0x290a   :  { %6457 = vmatprep.subr.bf16.mxu0 %v6456_v57 }
0x290d   :  { %6459 = vmatpush3.bf16.msra.mxu0 %v6456_v57 }
0x2953   :  { %v4673_v9 = vpop.permute.xlu1 %4672 }
0x2954   :  { %v4671_v30 = vpop.permute.xlu0 %4670  ;;  %v4681_v35 = vsel %vm1561_vm9, %v4679_v61, %v4673_v9  ;;  %v2837_v9 = vld [vmem:[%s7941_s10 + $0x28] sm:$0xff] }
0x2955   :  { %v4680_v60 = vsel %vm1561_vm9, %v4678_v58, %v4671_v30  ;;  %v6460_v59 = vpack.c.bf16 %v2837_v9, %v2836_v11  ;;  %v2838_v58 = vld [vmem:[%s7941_s10 + $0x30] sm:$0xff]  ;;  %v2839_v30 = vld [vmem:[%s7941_s10 + $0x38] sm:$0xff] }
0x2956   :  { %6170 = vmatprep.mubr.msk.f32.mxu0 %vm554_vm5, %v4680_v60  ;;  %v6464_v61 = vpack.c.bf16 %v2839_v30, %v2838_v58 }
0x2957   :  { %6171 = vmatmul.mubr.msk.f32.gmra.mrb[50].mxu0 %vm554_vm5, %v4681_v35  ;;  %6461 = vmatprep.subr.bf16.mxu0 %v6460_v59 }
0x2958   :  { %6463 = vmatpush3.bf16.msra.mxu0 %v6460_v59 }
0x2959   :  { %6465 = vmatprep.subr.bf16.mxu0 %v6464_v61 }
0x295c   :  { %6467 = vmatpush3.bf16.msra.mxu0 %v6464_v61 }
0x298e   :  { %v4791_v26 = vpop.xlane.xlu0 %4790 }
0x298f   :  { %v4801_v14 = vmul.f32 0.03125, %v4791_v26 }
0x2991   :  { %v4805_v7 = vsub.f32 %v4785_v8, %v4801_v14 }
0x2992   :  { %v4794_v1 = vpop.xlane.xlu1 %4793 }
0x2993   :  { %v4802_v34 = vmul.f32 0.03125, %v4794_v1  ;;  %v4809_v18 = vmul.f32 %v4805_v7, %v4805_v7 }
0x2995   :  { %v4806_v25 = vsub.f32 %v4786_v5, %v4802_v34  ;;  %v4813_v63 = vsel %vm554_vm5, %v4809_v18, 0.0 }
0x2997   :  { %v4810_v2 = vmul.f32 %v4806_v25, %v4806_v25 }
0x2999   :  { %v4816_v3 = vsel %vm554_vm5, %v4810_v2, 0.0 }
0x299a   :  { %4817 = vadd.xlane.f32.xlu1 %v4816_v3 }
0x2a2a   :  { %v6172_v12 = vpop.f32.mrb[50].mxu0 }
0x2a2b   :  { %v4776_v6 = vpop.f32.mrb[51].mxu0  ;;  %v4782_v13 = vadd.f32 %v6172_v12, %v5574_v47 }
0x2a2c   :  { %v4777_v10 = vadd.f32 %v5574_v47, %v4776_v6 }
0x2a2d   :  { %v4788_v15 = vadd.f32 %v4782_v13, %v7554_v40  ;;  %v4818_v40 = vpop.xlane.xlu1 %4817 }
0x2a2e   :  { %v4787_v52 = vadd.f32 %v4777_v10, %v7557_v41  ;;  %v4826_v41 = vmul.f32 0.03125, %v4818_v40 }
0x2a2f   :  { %v4798_v33 = vsel %vm554_vm5, %v4788_v15, 0.0 }
0x2a30   :  { %v4795_v17 = vsel %vm554_vm5, %v4787_v52, 0.0  ;;  %v4830_v0 = vadd.f32 1e-05, %v4826_v41 }
0x2a31   :  { %4796 = vadd.xlane.f32.xlu0 %v4795_v17 }
0x2a32   :  { %6846 = vrsqrt.f32 %v4830_v0 }
0x2a35   :  { %4799 = vadd.xlane.f32.xlu0 %v4798_v33 }
0x2a39   :  { %4814 = vadd.xlane.f32.xlu0 %v4813_v63 }
0x2a3c   :  { %v6847_v44 = vpop.eup %6846 }
0x2a3d   :  { %v4838_v62 = vmul.f32 %v6847_v44, %v4806_v25 }
0x2a3f   :  { %v4848_v47 = vmul.f32 %v5579_v45, %v4838_v62  ;;  %v5590_v62 = vld [vmem:[%s7943_s11] ss:$0 sm:$0xff] }
0x2a41   :  { %v7834_v5 = vadd.f32 %v5580_v48, %v4848_v47 }
0x2abe   :  { %v4797_v50 = vpop.xlane.xlu0 %4796 }
0x2abf   :  { %v4803_v21 = vmul.f32 0.03125, %v4797_v50 }
0x2ac1   :  { %v4807_v22 = vsub.f32 %v4787_v52, %v4803_v21 }
0x2ac2   :  { %v4800_v23 = vpop.xlane.xlu0 %4799 }
0x2ac3   :  { %v4804_v16 = vmul.f32 0.03125, %v4800_v23  ;;  %v4811_v24 = vmul.f32 %v4807_v22, %v4807_v22 }
0x2ac5   :  { %v4808_v36 = vsub.f32 %v4788_v15, %v4804_v16  ;;  %v4819_v37 = vsel %vm554_vm5, %v4811_v24, 0.0 }
0x2ac6   :  { %4820 = vadd.xlane.f32.xlu0 %v4819_v37  ;;  %v4815_v42 = vpop.xlane.xlu0 %4814 }
0x2ac7   :  { %v4825_v31 = vmul.f32 0.03125, %v4815_v42  ;;  %v4812_v43 = vmul.f32 %v4808_v36, %v4808_v36 }
0x2ac9   :  { %v4829_v28 = vadd.f32 1e-05, %v4825_v31  ;;  %v4822_v4 = vsel %vm554_vm5, %v4812_v43, 0.0 }
0x2aca   :  { %4823 = vadd.xlane.f32.xlu1 %v4822_v4 }
0x2acb   :  { %6848 = vrsqrt.f32 %v4829_v28 }
0x2ad5   :  { %v6849_v54 = vpop.eup %6848 }
0x2ad6   :  { %v4837_v46 = vmul.f32 %v6849_v54, %v4805_v7  ;;  %v5581_v7 = vld [vmem:[%s7942_s7] ss:$0 sm:$0xff] }
0x2ad8   :  { %v4847_v49 = vmul.f32 %v5579_v45, %v4837_v46 }
0x2ada   :  { %v7832_v8 = vadd.f32 %v5580_v48, %v4847_v49 }
0x2adc   :  { %6181 = vmatprep.mubr.msk.f32.mxu1 %vm554_vm5, %v7832_v8 }
0x2add   :  { %6182 = vmatmul.mubr.msk.f32.vlgmr.msra.gmra.mrb[52].mxu1 %vm554_vm5, %v7834_v5 }
0x2b53   :  { %v4821_v60 = vpop.xlane.xlu0 %4820 }
0x2b54   :  { %v4827_v35 = vmul.f32 0.03125, %v4821_v60 }
0x2b56   :  { %v4831_v1 = vadd.f32 1e-05, %v4827_v35 }
0x2b57   :  { %v4824_v34 = vpop.xlane.xlu1 %4823 }
0x2b58   :  { %6850 = vrsqrt.f32 %v4831_v1  ;;  %v4828_v25 = vmul.f32 0.03125, %v4824_v34 }
0x2b5a   :  { %v4832_v2 = vadd.f32 1e-05, %v4828_v25 }
0x2b5c   :  { %6852 = vrsqrt.f32 %v4832_v2 }
0x2b62   :  { %v6851_v3 = vpop.eup %6850 }
0x2b63   :  { %v4839_v26 = vmul.f32 %v6851_v3, %v4807_v22 }
0x2b65   :  { %v4849_v12 = vmul.f32 %v5579_v45, %v4839_v26 }
0x2b66   :  { %v6853_v6 = vpop.eup %6852 }
0x2b67   :  { %v4859_v14 = vadd.f32 %v5580_v48, %v4849_v12  ;;  %v4840_v13 = vmul.f32 %v6853_v6, %v4808_v36 }
0x2b69   :  { %6184 = vmatprep.mubr.msk.f32.mxu1 %vm554_vm5, %v4859_v14  ;;  %v4850_v10 = vmul.f32 %v5579_v45, %v4840_v13 }
0x2b6b   :  { %v4860_v52 = vadd.f32 %v5580_v48, %v4850_v10 }
0x2b6d   :  { %6185 = vmatmul.mubr.msk.f32.gmra.mrb[54].mxu1 %vm554_vm5, %v4860_v52 }
0x2bb0   :  { %v6183_v15 = vpop.f32.mrb[52].mxu1 }
0x2bb1   :  { %v4951_v17 = vadd.f32 %v6183_v15, %v5581_v7  ;;  %v4945_v33 = vpop.f32.mrb[53].mxu1 }
0x2bb2   :  { %v4946_v18 = vadd.f32 %v5581_v7, %v4945_v33 }
0x2bb3   :  { %v4969_v63 = vmul.f32 0.70710677, %v4951_v17  ;;  %v4965_v40 = vmul.f32 0.5, %v4951_v17 }
0x2bb4   :  { %v4968_v39 = vmul.f32 0.70710677, %v4946_v18  ;;  %v4964_v20 = vmul.f32 0.5, %v4946_v18 }
0x2bb5   :  { %6854 = verf.f32 %v4969_v63 }
0x2bb6   :  { %6856 = verf.f32 %v4968_v39 }
0x2bbf   :  { %v6855_v19 = vpop.eup %6854 }
0x2bc0   :  { %v6857_v51 = vpop.eup %6856  ;;  %v4977_v27 = vadd.f32 1.0, %v6855_v19 }
0x2bc1   :  { %v4976_v53 = vadd.f32 1.0, %v6857_v51 }
0x2bc2   :  { %v4981_v50 = vmul.f32 %v4977_v27, %v4965_v40  ;;  %v5591_v27 = vld [vmem:[%s7944_s16] ss:$0 sm:$0xff] }
0x2bc3   :  { %v4980_v41 = vmul.f32 %v4976_v53, %v4964_v20  ;;  %v5592_v40 = vld [vmem:[%s7945_s15] ss:$0 sm:$0xff] }
0x2bc5   :  { %6203 = vmatprep.mubr.msk.f32.mxu0 %vm2702_vm10, %v4980_v41 }
0x2bc6   :  { %6204 = vmatmul.mubr.msk.f32.vlgmr.msra.gmra.mrb[52].mxu0 %vm2702_vm10, %v4981_v50 }
0x2c40   :  { %v6186_v21 = vpop.f32.mrb[54].mxu1 }
0x2c41   :  { %v4961_v22 = vadd.f32 %v6186_v21, %v5581_v7  ;;  %v4955_v0 = vpop.f32.mrb[55].mxu1  ;;  %v5593_v21 = vld [vmem:[%s7946_s18] ss:$0 sm:$0xff] }
0x2c42   :  { %v4956_v23 = vadd.f32 %v5581_v7, %v4955_v0 }
0x2c43   :  { %v4971_v16 = vmul.f32 0.70710677, %v4961_v22  ;;  %v4967_v28 = vmul.f32 0.5, %v4961_v22 }
0x2c44   :  { %v4970_v24 = vmul.f32 0.70710677, %v4956_v23  ;;  %v4966_v31 = vmul.f32 0.5, %v4956_v23 }
0x2c45   :  { %6858 = verf.f32 %v4971_v16 }
0x2c46   :  { %6860 = verf.f32 %v4970_v24 }
0x2c4f   :  { %v6859_v36 = vpop.eup %6858 }
0x2c50   :  { %v6861_v37 = vpop.eup %6860  ;;  %v4979_v42 = vadd.f32 1.0, %v6859_v36 }
0x2c51   :  { %v4978_v43 = vadd.f32 1.0, %v6861_v37 }
0x2c52   :  { %v4983_v44 = vmul.f32 %v4979_v42, %v4967_v28  ;;  %v6951_v42 = vmov 0  }
0x2c53   :  { %v4982_v4 = vmul.f32 %v4978_v43, %v4966_v31  ;;  %6685 = vset.pattern.permute.xlu1 %v6951_v42  ;;  %6684 = vset.pattern.permute.xlu0 %v6951_v42 }
0x2c55   :  { %6206 = vmatprep.mubr.msk.f32.mxu0 %vm2702_vm10, %v4982_v4 }
0x2c56   :  { %6207 = vmatmul.mubr.msk.f32.gmra.mrb[54].mxu0 %vm2702_vm10, %v4983_v44 }
0x2c99   :  { %v6205_v45 = vpop.f32.mrb[52].mxu0 }
0x2c9a   :  { %v5082_v54 = vadd.f32 %v6205_v45, %v7834_v5  ;;  %v5062_v46 = vpop.f32.mrb[53].mxu0 }
0x2c9b   :  { %v5081_v47 = vadd.f32 %v5062_v46, %v7832_v8 }
0x2c9c   :  { %v5092_v48 = vadd.f32 %v5590_v62, %v5082_v54 }
0x2c9d   :  { %v5091_v49 = vadd.f32 %v5590_v62, %v5081_v47 }
0x2c9e   :  { %v5100_v55 = vsel %vm554_vm5, %v5092_v48, 0.0 }
0x2c9f   :  { %5101 = vadd.xlane.f32.xlu1 %v5100_v55  ;;  %v5097_v56 = vsel %vm554_vm5, %v5091_v49, 0.0  ;;  %v5594_v55 = vld [vmem:[#allocation2] ss:$0 sm:$0xff] }
0x2ca0   :  { %5098 = vadd.xlane.f32.xlu0 %v5097_v56 }
0x2d29   :  { %v6208_v29 = vpop.f32.mrb[54].mxu0 }
0x2d2a   :  { %v5084_v32 = vadd.f32 %v6208_v29, %v4860_v52  ;;  %v5072_v38 = vpop.f32.mrb[55].mxu0 }
0x2d2b   :  { %v5083_v57 = vadd.f32 %v5072_v38, %v4859_v14 }
0x2d2c   :  { %v5094_v11 = vadd.f32 %v5590_v62, %v5084_v32  ;;  %v5102_v9 = vpop.xlane.xlu1 %5101 }
0x2d2d   :  { %v5093_v59 = vadd.f32 %v5590_v62, %v5083_v57  ;;  %v5110_v58 = vmul.f32 0.03125, %v5102_v9  ;;  %v5099_v5 = vpop.xlane.xlu0 %5098 }
0x2d2e   :  { %v5109_v30 = vmul.f32 0.03125, %v5099_v5  ;;  %v5106_v8 = vsel %vm554_vm5, %v5094_v11, 0.0 }
0x2d2f   :  { %v5114_v61 = vsub.f32 %v5092_v48, %v5110_v58  ;;  %5107 = vadd.xlane.f32.xlu1 %v5106_v8  ;;  %v5103_v60 = vsel %vm554_vm5, %v5093_v59, 0.0 }
0x2d30   :  { %v5113_v35 = vsub.f32 %v5091_v49, %v5109_v30  ;;  %5104 = vadd.xlane.f32.xlu0 %v5103_v60 }
0x2d31   :  { %v5118_v1 = vmul.f32 %v5114_v61, %v5114_v61 }
0x2d32   :  { %v5117_v34 = vmul.f32 %v5113_v35, %v5113_v35 }
0x2d33   :  { %v5124_v25 = vsel %vm554_vm5, %v5118_v1, 0.0 }
0x2d34   :  { %5125 = vadd.xlane.f32.xlu1 %v5124_v25  ;;  %v5121_v2 = vsel %vm554_vm5, %v5117_v34, 0.0 }
0x2d35   :  { %5122 = vadd.xlane.f32.xlu0 %v5121_v2 }
0x2dbc   :  { %v5108_v3 = vpop.xlane.xlu1 %5107 }
0x2dbd   :  { %v5112_v26 = vmul.f32 0.03125, %v5108_v3  ;;  %v5105_v12 = vpop.xlane.xlu0 %5104 }
0x2dbe   :  { %v5111_v6 = vmul.f32 0.03125, %v5105_v12 }
0x2dbf   :  { %v5116_v14 = vsub.f32 %v5094_v11, %v5112_v26 }
0x2dc0   :  { %v5115_v13 = vsub.f32 %v5093_v59, %v5111_v6 }
0x2dc1   :  { %v5126_v10 = vpop.xlane.xlu1 %5125  ;;  %v5120_v52 = vmul.f32 %v5116_v14, %v5116_v14 }
0x2dc2   :  { %v5134_v7 = vmul.f32 0.03125, %v5126_v10  ;;  %v5123_v15 = vpop.xlane.xlu0 %5122  ;;  %v5119_v17 = vmul.f32 %v5115_v13, %v5115_v13 }
0x2dc3   :  { %v5133_v33 = vmul.f32 0.03125, %v5123_v15  ;;  %v5130_v18 = vsel %vm554_vm5, %v5120_v52, 0.0 }
0x2dc4   :  { %v5138_v63 = vadd.f32 1e-05, %v5134_v7  ;;  %5131 = vadd.xlane.f32.xlu1 %v5130_v18  ;;  %v5127_v39 = vsel %vm554_vm5, %v5119_v17, 0.0 }
0x2dc5   :  { %v5137_v19 = vadd.f32 1e-05, %v5133_v33  ;;  %5128 = vadd.xlane.f32.xlu0 %v5127_v39 }
0x2dc6   :  { %6862 = vrsqrt.f32 %v5138_v63 }
0x2dc7   :  { %6864 = vrsqrt.f32 %v5137_v19 }
0x2dd0   :  { %v6863_v51 = vpop.eup %6862 }
0x2dd1   :  { %v6865_v20 = vpop.eup %6864  ;;  %v5146_v53 = vmul.f32 %v6863_v51, %v5114_v61 }
0x2dd2   :  { %v5145_v41 = vmul.f32 %v6865_v20, %v5113_v35 }
0x2dd3   :  { %v5156_v50 = vmul.f32 %v5591_v27, %v5146_v53 }
0x2dd4   :  { %v5155_v22 = vmul.f32 %v5591_v27, %v5145_v41 }
0x2dd5   :  { %v7869_v0 = vadd.f32 %v5592_v40, %v5156_v50 }
0x2dd6   :  { %v7871_v23 = vadd.f32 %v5592_v40, %v5155_v22 }
0x2dd7   :  { %v5177_v16 = vmul.f32 %v5593_v21, %v7869_v0 }
0x2dd8   :  { %v5176_v24 = vmul.f32 %v5593_v21, %v7871_v23 }
0x2dd9   :  { %v5183_v36 = vsel %vm554_vm5, %v5177_v16, 0.0 }
0x2dda   :  { %5184 = vadd.xlane.f32.xlu1 %v5183_v36  ;;  %v5180_v37 = vsel %vm554_vm5, %v5176_v24, 0.0 }
0x2ddb   :  { %5181 = vadd.xlane.f32.xlu0 %v5180_v37 }
0x2e51   :  { %v5132_v31 = vpop.xlane.xlu1 %5131 }
0x2e52   :  { %v5136_v43 = vmul.f32 0.03125, %v5132_v31  ;;  %v5129_v28 = vpop.xlane.xlu0 %5128 }
0x2e53   :  { %v5135_v4 = vmul.f32 0.03125, %v5129_v28 }
0x2e54   :  { %v5140_v44 = vadd.f32 1e-05, %v5136_v43 }
0x2e55   :  { %v5139_v62 = vadd.f32 1e-05, %v5135_v4 }
0x2e56   :  { %6866 = vrsqrt.f32 %v5140_v44 }
0x2e57   :  { %6868 = vrsqrt.f32 %v5139_v62 }
0x2e60   :  { %v6867_v45 = vpop.eup %6866 }
0x2e61   :  { %v6869_v54 = vpop.eup %6868  ;;  %v5148_v46 = vmul.f32 %v6867_v45, %v5116_v14 }
0x2e62   :  { %v5147_v47 = vmul.f32 %v6869_v54, %v5115_v13 }
0x2e63   :  { %v5158_v48 = vmul.f32 %v5591_v27, %v5148_v46 }
0x2e64   :  { %v5157_v49 = vmul.f32 %v5591_v27, %v5147_v47 }
0x2e65   :  { %v7877_v56 = vadd.f32 %v5592_v40, %v5158_v48 }
0x2e66   :  { %v7879_v29 = vadd.f32 %v5592_v40, %v5157_v49 }
0x2e67   :  { %v5185_v32 = vpop.xlane.xlu1 %5184  ;;  %v5179_v38 = vmul.f32 %v5593_v21, %v7877_v56 }
0x2e68   :  { %v5200_v57 = vadd.f32 %v5594_v55, %v5185_v32  ;;  %v5182_v11 = vpop.xlane.xlu0 %5181  ;;  %v5178_v9 = vmul.f32 %v5593_v21, %v7879_v29 }
0x2e69   :  { %v5199_v59 = vadd.f32 %v5594_v55, %v5182_v11  ;;  %v5189_v58 = vsel %vm554_vm5, %v5179_v38, 0.0 }
0x2e6a   :  { %v5205_v5 = vsel %vm5203_vm11, %v5200_v57, -inf  ;;  %5190 = vadd.xlane.f32.xlu1 %v5189_v58  ;;  %v5186_v30 = vsel %vm554_vm5, %v5178_v9, 0.0  ;;  %v5301_v58 = vld [vmem:[%s7107_s4] sm:$0xff] }
0x2e6b   :  { %v5204_v8 = vsel %vm5203_vm11, %v5199_v59, -inf  ;;  %5187 = vadd.xlane.f32.xlu0 %v5186_v30 }
0x2e6c   :  { %v5206_v61 = vmax.f32 %v5204_v8, %v5205_v5  ;;  %v5302_v5 = vld [vmem:[%s7107_s4 + $0x8] sm:$0xff]  ;;  %v6952_v8 = vmov 0.0|0.0  }
0x2e6d   :  { %v6469_v30 = vpack.c.bf16 %v5302_v5, %v5301_v58  ;;  %6468 = vmatprep.subr.bf16.mxu1 %v6952_v8 }
0x2e6e   :  { %v5207_v60 = vrot.slane %v5206_v61, 4 }
0x2e6f   :  { %6470 = vmatpush3.bf16.msra.mxu1 %v6469_v30 }
0x2e70   :  { %v5208_v35 = vmax.f32 %v5206_v61, %v5207_v60  ;;  %6471 = vmatprep.subr.bf16.mxu1 %v6952_v8  ;;  %v5303_v61 = vld [vmem:[%s7107_s4 + $0x10] sm:$0xff]  ;;  %v5304_v60 = vld [vmem:[%s7107_s4 + $0x18] sm:$0xff]  ;;  %s6955_s4 = smov [#allocation3]  }
0x2e71   :  { %s5393_s0 = sshll.u32 %s6955_s4, 4  ;;  %s5394_s0 = int_to_ptr.vmem [resolvable:$true] %s5393_s0 }
0x2e72   :  { %v5209_v1 = vrot.slane %v5208_v35, 2  ;;  %s6882_s5 = scalar_lea.vmem %s5394_s0, 32  ;;  %p6887_p1 = scmp.lt.s32.totalorder %s5394_s0, %s5394_s0 }
0x2e73   :  { %p6883_p0 = scmp.ne.s32.totalorder %s5394_s0, %s6882_s5  ;;  %p6888_p2 = scmp.lt.s32.totalorder %s6882_s5, %s6882_s5 }
0x2e74   :  { %v5210_v34 = vmax.f32 %v5208_v35, %v5209_v1  ;;  %v6472_v35 = vpack.c.bf16 %v5304_v60, %v5303_v61  ;;  %v6954_v1 = vmov 0.0  }
0x2e75   :  { %6217 = vmatprep.mubr.msk.f32.mxu1 %vm6953_vm12, %v6954_v1  ;;  %p6889_p3 = por %p6888_p2, %p6887_p1 }
0x2e76   :  { %v5211_v25 = vrot.slane %v5210_v34, 1  ;;  %6473 = vmatpush3.bf16.msra.mxu1 %v6472_v35 }
0x2e77   :  { %p6890_p4 = pnand %p6889_p3, %p6883_p0 }
0x2e78   :  { %v5212_v2 = vmax.f32 %v5210_v34, %v5211_v25 }
0x2e7a   :  { %v5213_v3 = vsub.f32 %v5199_v59, %v5212_v2  ;;  %v5214_v26 = vsub.f32 %v5200_v57, %v5212_v2 }
0x2e7c   :  { %v5215_v12 = vmul.f32 1.442695, %v5213_v3  ;;  %v5217_v6 = vmul.f32 1.442695, %v5214_v26 }
0x2e7e   :  { %6870 = vpow2.f32 %v5215_v12 }
0x2e7f   :  { %6872 = vpow2.f32 %v5217_v6 }
0x2e88   :  { %v6871_v14 = vpop.eup %6870 }
0x2e89   :  { %v6873_v13 = vpop.eup %6872  ;;  %v5219_v10 = vsel %vm5203_vm11, %v6871_v14, 0.0 }
0x2e8a   :  { %v5220_v52 = vsel %vm5203_vm11, %v6873_v13, 0.0 }
0x2e8b   :  { %v5221_v7 = vadd.f32 %v5220_v52, %v5219_v10 }
0x2e8d   :  { %v5222_v15 = vrot.slane %v5221_v7, 4 }
0x2e8f   :  { %v5223_v17 = vadd.f32 %v5222_v15, %v5221_v7 }
0x2e91   :  { %v5224_v33 = vrot.slane %v5223_v17, 2 }
0x2e93   :  { %v5225_v18 = vadd.f32 %v5224_v33, %v5223_v17 }
0x2e95   :  { %v5226_v63 = vrot.slane %v5225_v18, 1 }
0x2e97   :  { %v5227_v39 = vadd.f32 %v5226_v63, %v5225_v18 }
0x2e99   :  { %6874 = vrcp.f32 %v5227_v39 }
0x2ea3   :  { %v6875_v19 = vpop.eup %6874 }
0x2ea4   :  { %v5230_v51 = vmul.f32 %v6875_v19, %v6873_v13  ;;  %v5229_v27 = vmul.f32 %v6875_v19, %v6871_v14 }
0x2ea6   :  { %5238 = vperm.xlu1 %6685, %v5230_v51   ;;  %5233 = vperm.xlu0 %6684, %v5229_v27  }
0x2ef7   :  { %v5191_v20 = vpop.xlane.xlu1 %5190 }
0x2ef8   :  { %v5202_v53 = vadd.f32 %v5594_v55, %v5191_v20  ;;  %v5188_v40 = vpop.xlane.xlu0 %5187 }
0x2ef9   :  { %v5201_v41 = vadd.f32 %v5594_v55, %v5188_v40 }
0x2efa   :  { %v5253_v50 = vsel %vm5203_vm11, %v5202_v53, -inf }
0x2efb   :  { %v5252_v21 = vsel %vm5203_vm11, %v5201_v41, -inf }
0x2efc   :  { %v5254_v22 = vmax.f32 %v5252_v21, %v5253_v50 }
0x2efe   :  { %v5255_v16 = vrot.slane %v5254_v22, 4 }
0x2f00   :  { %v5256_v24 = vmax.f32 %v5254_v22, %v5255_v16 }
0x2f02   :  { %v5257_v36 = vrot.slane %v5256_v24, 2 }
0x2f04   :  { %v5258_v37 = vmax.f32 %v5256_v24, %v5257_v36 }
0x2f06   :  { %v5259_v42 = vrot.slane %v5258_v37, 1 }
0x2f08   :  { %v5260_v31 = vmax.f32 %v5258_v37, %v5259_v42 }
0x2f0a   :  { %v5261_v43 = vsub.f32 %v5201_v41, %v5260_v31  ;;  %v5262_v28 = vsub.f32 %v5202_v53, %v5260_v31 }
0x2f0c   :  { %v5263_v4 = vmul.f32 1.442695, %v5261_v43  ;;  %v5265_v44 = vmul.f32 1.442695, %v5262_v28 }
0x2f0e   :  { %6876 = vpow2.f32 %v5263_v4 }
0x2f0f   :  { %6878 = vpow2.f32 %v5265_v44 }
0x2f18   :  { %v6877_v62 = vpop.eup %6876 }
0x2f19   :  { %v6879_v45 = vpop.eup %6878  ;;  %v5267_v54 = vsel %vm5203_vm11, %v6877_v62, 0.0 }
0x2f1a   :  { %v5268_v46 = vsel %vm5203_vm11, %v6879_v45, 0.0 }
0x2f1b   :  { %v5269_v47 = vadd.f32 %v5268_v46, %v5267_v54 }
0x2f1d   :  { %v5270_v48 = vrot.slane %v5269_v47, 4 }
0x2f1f   :  { %v5271_v49 = vadd.f32 %v5270_v48, %v5269_v47 }
0x2f21   :  { %v5272_v55 = vrot.slane %v5271_v49, 2 }
0x2f23   :  { %v5273_v32 = vadd.f32 %v5272_v55, %v5271_v49 }
0x2f25   :  { %v5274_v38 = vrot.slane %v5273_v32, 1  ;;  %v5239_v34 = vpop.permute.xlu1 %5238  ;;  %v5234_v25 = vpop.permute.xlu0 %5233 }
0x2f26   :  { %v5242_v2 = vmul.f32 %v5239_v34, %v7869_v0  ;;  %v5241_v3 = vmul.f32 %v5234_v25, %v7871_v23 }
0x2f27   :  { %v5275_v57 = vadd.f32 %v5274_v38, %v5273_v32 }
0x2f28   :  { %v5244_v26 = vsel %vm554_vm5, %v5242_v2, 0.0  ;;  %v5243_v12 = vsel %vm554_vm5, %v5241_v3, 0.0 }
0x2f29   :  { %6880 = vrcp.f32 %v5275_v57  ;;  %v5245_v6 = vadd.f32 %v5244_v26, %v5243_v12 }
0x2f2b   :  { %v5246_v14 = vrot.slane %v5245_v6, 4 }
0x2f2d   :  { %v5247_v52 = vadd.f32 %v5246_v14, %v5245_v6 }
0x2f2f   :  { %v5248_v33 = vrot.slane %v5247_v52, 2 }
0x2f31   :  { %v5249_v63 = vadd.f32 %v5248_v33, %v5247_v52 }
0x2f33   :  { %v6881_v11 = vpop.eup %6880  ;;  %v5250_v51 = vrot.slane %v5249_v63, 1 }
0x2f34   :  { %v5277_v9 = vmul.f32 %v6881_v11, %v6877_v62  ;;  %v5278_v59 = vmul.f32 %v6881_v11, %v6879_v45 }
0x2f35   :  { %v5251_v53 = vadd.f32 %v5250_v51, %v5249_v63 }
0x2f36   :  { %5281 = vperm.xlu1 %6685, %v5277_v9  }
0x2f3a   :  { %5286 = vperm.xlu1 %6685, %v5278_v59  }
0x2fb5   :  { %v5282_v13 = vpop.permute.xlu1 %5281 }
0x2fb6   :  { %v5289_v10 = vmul.f32 %v5282_v13, %v7879_v29 }
0x2fb8   :  { %v5291_v17 = vsel %vm554_vm5, %v5289_v10, 0.0 }
0x2fb9   :  { %v5287_v7 = vpop.permute.xlu1 %5286 }
0x2fba   :  { %v5290_v15 = vmul.f32 %v5287_v7, %v7877_v56  ;;  %v5595_v56 = vld [vmem:[%s7112_s12] ss:$0 sm:$0xff] }
0x2fbc   :  { %v5292_v0 = vsel %vm554_vm5, %v5290_v15, 0.0 }
0x2fbd   :  { %v5293_v23 = vadd.f32 %v5292_v0, %v5291_v17 }
0x2fbf   :  { %v5294_v18 = vrot.slane %v5293_v23, 4 }
0x2fc1   :  { %v5295_v39 = vadd.f32 %v5294_v18, %v5293_v23 }
0x2fc3   :  { %v5296_v19 = vrot.slane %v5295_v39, 2 }
0x2fc5   :  { %v5297_v27 = vadd.f32 %v5296_v19, %v5295_v39 }
0x2fc7   :  { %v5298_v20 = vrot.slane %v5297_v27, 1 }
0x2fc9   :  { %v5299_v29 = vadd.f32 %v5298_v20, %v5297_v27 }
0x2fcb   :  { %v5300_v40 = vsel %vm383_vm2, %v5251_v53, %v5299_v29 }
0x2fcc   :  { %6218 = vmatmul.mubr.msk.f32.vlgmr.msra.gmra.mrb[56].mxu1 %vm554_vm5, %v5300_v40 }
0x309f   :  { %v5381_v41 = vpop.f32.mrb[56].mxu1 }
0x30a0   :  { %v5382_v50 = vadd.f32 %v5595_v56, %v5381_v41  ;;  %v6219_v21 = vpop.f32.mrb[57].mxu1 }
0x30a2   :  { %5386 = vst.msk [vmem:[#allocation3] sm:$0x3] %vm5385_vm13, %v5382_v50 }
0x30a3   :  { %6893 = shalt.err (!%p6890_p4)
}
0x30a4   :  { %s6894_s9 = scalar_lea.hbm %s7117_s20, 32 }
0x30a5   :  { %p6895_p5 = scmp.ne.s32.totalorder %s7117_s20, %s6894_s9  ;;  %p6898_p6 = scmp.lt.u32.totalorder %s6894_s9, %s7117_s20 }
0x30a7   :  { %p6900_p7 = pnand %p6898_p6, %p6895_p5 }
0x30a9   :  { %6903 = shalt.err (!%p6900_p7)
}
0x30aa   :  { %5396 = dma.vmem_to_hbm [thread:$0]  %s5394_s0, 32, %s7117_s20, [#allocation4]  }
0x30ab   :  { %6904 = dma.done.wait [#allocation4], 32  }
0x30ac   :  { %6905 = vsyncadd [#allocation4], 4294967264 }
0x30ad   :  { %5400 = vsyncpa [#allocation4], 1 }

</bundles_post_ra>
